<compile_context>
chip_gen: v5e
topology: v5e:2x2
jax: 0.10.0
libtpu: 0.0.40
codegen_flags: <defaults>
</compile_context>

<pallas_src>
import functools

import jax
import jax.numpy as jnp
from jax import lax
from jax.experimental import pallas as pl
from jax.experimental.pallas import tpu as pltpu

LANE = 128


def _round_up(x, m):
    return (x + m - 1) // m * m


# -----------------------------------------------------------------------------
# Generation-aware knobs (pure Python, evaluated at trace time)
# -----------------------------------------------------------------------------
def _device_kind():
    try:
        return jax.devices()[0].device_kind.lower()
    except Exception:
        return ""


def _is_v7():
    kind = _device_kind()
    return ("v7" in kind) or ("7x" in kind)


def _default_gate_dtype():
    """bf16 EUP/VPU gate math on v6e/v7x; f32 on <= v5 (no bf16 EUP/VPU)."""
    kind = _device_kind()
    if any(t in kind for t in ("v2", "v3", "v4", "v5")):
        return jnp.float32
    return jnp.bfloat16


def _pick_batch_tile(B):
    """Largest 8-aligned divisor of B under a generation-aware VMEM cap, with
    >= 2 tiles on v7x (2 TensorCores) so dimension_semantics=('parallel',)
    actually shards the grid."""
    is_v7 = _is_v7()
    cap = 256 if is_v7 else 512          # v7x: 64 MiB VMEM; v5e/v6e: 128 MiB
    tb = B
    if B > cap:
        # NOTE: if B has no 8-aligned divisor <= cap this falls back to one
        # giant tile; pad B upstream if that ever blows VMEM at scale.
        tb = next((c for c in range(cap, 7, -8) if B % c == 0), B)
    if is_v7 and B >= 16:
        half = min(tb, B // 2)
        half -= half % 8
        tb = next((c for c in range(half, 7, -8) if B % c == 0), tb)
    return tb


def _vmem_limit_bytes(S, TB, F, G, Hp):
    """Raise the scoped VMEM limit only when the scratch estimate outgrows the
    conservative defaults (16/32 MiB).  Capped below physical VMEM per chip."""
    weights = 2 * ((F * G + Hp * G + F * G) * 2 + 2 * G * 4)   # double-buffered
    scratch = S * TB * F * 4 + S * TB * G * 4                  # rows + xproj
    out = 2 * TB * 2 * Hp * 4
    est = weights + scratch + out
    if est <= (8 << 20):
        return None
    cap = (56 << 20) if _is_v7() else (100 << 20)
    return int(min(cap, max(32 << 20, 2 * est)))


# -----------------------------------------------------------------------------
# Shared LSTM gate math (used by the kernel and by the pure-JAX reference)
# -----------------------------------------------------------------------------
def _gate_nonlin(gates, c, Hp, gate_dtype):
    """LSTM gate math, gate-block order (i, f, o, g); returns (h, c) in f32.

    * sigmoid evaluated in tanh form 0.5*tanh(0.5x)+0.5 -> one EUP op per
      element instead of exp + reciprocal, fused over the contiguous i|f|o
      slice.
    * transcendentals evaluated in `gate_dtype` (bf16 on v6e/v7x); the cell
      state update / combine stays f32.
    Padded lanes (zero pre-activations) stay exactly 0 in c and h because
    g = tanh(0) = 0; padded W_hh rows are zero as a second safeguard.
    """
    g_ = gates.astype(gate_dtype)
    sig = (0.5 * jnp.tanh(0.5 * g_[:, :3 * Hp]) + 0.5).astype(jnp.float32)
    i = sig[:, 0 * Hp:1 * Hp]
    f = sig[:, 1 * Hp:2 * Hp]
    o = sig[:, 2 * Hp:3 * Hp]
    g = jnp.tanh(g_[:, 3 * Hp:4 * Hp]).astype(jnp.float32)
    c_new = f * c + i * g
    h_new = o * jnp.tanh(c_new.astype(gate_dtype)).astype(jnp.float32)
    return h_new, c_new


# -----------------------------------------------------------------------------
# Kernel
# -----------------------------------------------------------------------------
def _lstm_agg_kernel(idx_ref,                        # [S*B] int32 (SMEM, prefetch)
                     feat_ref,                       # [N, F]   f32 (HBM, pl.ANY)
                     wih_f_ref, whh_f_ref, b_f_ref,  # fwd: [F,4Hp] [Hp,4Hp] [1,4Hp]
                     wih_b_ref, b_b_ref,             # bwd: [F,4Hp] [1,4Hp]
                     out_ref,                        # [TB, 2*Hp]
                     rows_ref,                       # scratch [S*TB, F] f32
                     xproj_ref,                      # scratch [S, TB, 4Hp] f32
                     gsem,                           # DMA semaphore (1,)
                     *, gate_dtype, unroll):
    S, TB, G = xproj_ref.shape
    Hp = G // 4
    B = idx_ref.shape[0] // S
    cdt = wih_f_ref.dtype                # matmul-operand dtype (bf16)
    b0 = pl.program_id(0) * TB

    # --- fused neighbor gather: per-row HBM->VMEM DMAs keyed by SMEM ids -----
    # (avoids materializing the gathered [S, B, F] tensor in HBM)
    @pl.loop(0, S)
    def _(t):
        @pl.loop(0, TB)
        def _(j):
            node = idx_ref[t * B + b0 + j]
            pltpu.make_async_copy(
                feat_ref.at[pl.ds(node, 1), :],
                rows_ref.at[pl.ds(t * TB + j, 1), :],
                gsem.at[0]).start()

    @pl.loop(0, S * TB)
    def _(k):
        # All copies are identical in size; waiting with a same-shaped
        # descriptor consumes exactly one completed row copy.
        pltpu.make_async_copy(
            feat_ref.at[pl.ds(0, 1), :],
            rows_ref.at[pl.ds(0, 1), :],
            gsem.at[0]).wait()

    # --- hoisted input projection: one MXU matmul, bias added once -----------
    x_all = rows_ref[...].astype(cdt)                           # [S*TB, F]
    proj = jnp.dot(x_all, wih_f_ref[...], preferred_element_type=jnp.float32)
    xproj_ref[...] = (proj + b_f_ref[...]).reshape(S, TB, G)

    whh_f = whh_f_ref[...]
    h0 = jnp.zeros((TB, Hp), jnp.float32)
    c0 = jnp.zeros((TB, Hp), jnp.float32)

    # --- forward recurrence: one small matmul + gate math per step -----------
    def step(t, carry):
        h, c = carry
        gates = xproj_ref[t] + jnp.dot(h.astype(cdt), whh_f,
                                       preferred_element_type=jnp.float32)
        return _gate_nonlin(gates, c, Hp, gate_dtype)

    h_fwd, _ = lax.fori_loop(0, S, step, (h0, c0), unroll=unroll)

    # --- backward-direction hidden at the last position ----------------------
    # Zero initial state => the recurrent term h0 @ W_hh_bwd is exactly 0.
    x_last = rows_ref[pl.ds((S - 1) * TB, TB), :].astype(cdt)
    gates_b = jnp.dot(x_last, wih_b_ref[...],
                      preferred_element_type=jnp.float32) + b_b_ref[...]
    h_bwd, _ = _gate_nonlin(gates_b, c0, Hp, gate_dtype)

    # --- direct lane-dense stores, no concatenate -----------------------------
    out_ref[:, :Hp] = h_fwd.astype(out_ref.dtype)
    out_ref[:, Hp:] = h_bwd.astype(out_ref.dtype)


# -----------------------------------------------------------------------------
# pallas_call wrapper
# -----------------------------------------------------------------------------
def lstm_aggregate(idx_tm_flat, features_table, kparams, *, batch, seq_len,
                   gate_dtype, batch_tile=None, out_dtype=jnp.float32):
    """idx_tm_flat: [S*B] int32 permuted, time-major neighbor ids.
    features_table: [N, F] f32 node embeddings (stays in HBM).
    Returns padded output [B, 2*Hp]."""
    B, S = batch, seq_len
    _, F = features_table.shape
    G = kparams["wih_f"].shape[1]        # 4 * Hp
    Hp = G // 4

    if batch_tile is None:
        batch_tile = _pick_batch_tile(B)
    TB = batch_tile
    assert B % TB == 0, (B, TB)
    nb = B // TB

    # Full unroll for short sequences; partial unroll for long ones so the
    # resident W_hh + per-step xproj tiles do not overflow the 64-vreg file.
    unroll = True if S <= 16 else 4

    kernel = functools.partial(_lstm_agg_kernel,
                               gate_dtype=gate_dtype, unroll=unroll)

    grid_spec = pltpu.PrefetchScalarGridSpec(
        num_scalar_prefetch=1,                                  # neighbor ids
        grid=(nb,),
        in_specs=[
            pl.BlockSpec(memory_space=pl.ANY),                  # feature table (HBM)
            pl.BlockSpec((F, G), lambda i, idx: (0, 0)),        # W_ih fwd
            pl.BlockSpec((Hp, G), lambda i, idx: (0, 0)),       # W_hh fwd
            pl.BlockSpec((1, G), lambda i, idx: (0, 0)),        # bias fwd
            pl.BlockSpec((F, G), lambda i, idx: (0, 0)),        # W_ih bwd
            pl.BlockSpec((1, G), lambda i, idx: (0, 0)),        # bias bwd
        ],
        out_specs=pl.BlockSpec((TB, 2 * Hp), lambda i, idx: (i, 0)),
        scratch_shapes=[
            pltpu.VMEM((S * TB, F), jnp.float32),    # gathered neighbor rows
            pltpu.VMEM((S, TB, G), jnp.float32),     # hoisted input projection
            pltpu.SemaphoreType.DMA((1,)),           # shared gather semaphore
        ],
    )

    return pl.pallas_call(
        kernel,
        out_shape=jax.ShapeDtypeStruct((B, 2 * Hp), out_dtype),
        grid_spec=grid_spec,
        compiler_params=pltpu.CompilerParams(
            dimension_semantics=("parallel",),      # shard batch tiles over TCs
            vmem_limit_bytes=_vmem_limit_bytes(S, TB, F, G, Hp)),
    )(idx_tm_flat, features_table,
      kparams["wih_f"], kparams["whh_f"], kparams["b_f"],
      kparams["wih_b"], kparams["b_b"])


# -----------------------------------------------------------------------------
# Parameters
# -----------------------------------------------------------------------------
def init_lstm_params(key, input_dim, hidden_dim):
    """PyTorch-style uniform(-1/sqrt(H), 1/sqrt(H)) init, bidirectional LSTM.

    Returns raw (unpadded, f32) params: W_ih^T [F,4H], W_hh^T [H,4H], summed
    biases [1,4H] per direction, in PyTorch gate order (i, f, g, o)."""
    H = hidden_dim // 2
    bound = 1.0 / jnp.sqrt(jnp.float32(H))
    keys = jax.random.split(key, 8)

    def u(k, shape):
        return jax.random.uniform(k, shape, jnp.float32, -bound, bound)

    return {
        "wih_f": u(keys[0], (4 * H, input_dim)).T,                 # [F, 4H]
        "whh_f": u(keys[1], (4 * H, H)).T,                         # [H, 4H]
        "b_f": (u(keys[2], (4 * H,)) + u(keys[3], (4 * H,))).reshape(1, 4 * H),
        "wih_b": u(keys[4], (4 * H, input_dim)).T,
        "whh_b": u(keys[5], (4 * H, H)).T,                         # unused (zero h0)
        "b_b": (u(keys[6], (4 * H,)) + u(keys[7], (4 * H,))).reshape(1, 4 * H),
    }


def _reorder_gates(w, H):
    """PyTorch gate-block order (i, f, g, o) -> kernel order (i, f, o, g) so the
    three sigmoid gates form one contiguous slice."""
    return jnp.concatenate([w[:, :2 * H], w[:, 3 * H:4 * H], w[:, 2 * H:3 * H]],
                           axis=-1)


def prepare_kernel_params(raw, hidden_dim, compute_dtype=jnp.bfloat16):
    """Reorder gate blocks to (i,f,o,g), zero-pad each gate block to a 128-lane
    multiple, cast matmul operands to bf16 (f32 MXU accumulation in-kernel).
    Zero-padded columns / padded W_hh rows keep padded state lanes exactly 0."""
    H = hidden_dim // 2
    Hp = _round_up(H, LANE)

    def prep_cols(w):                     # [*, 4H] -> reorder + pad -> [*, 4Hp]
        w = _reorder_gates(w, H)
        r = w.shape[0]
        return jnp.pad(w.reshape(r, 4, H),
                       ((0, 0), (0, 0), (0, Hp - H))).reshape(r, 4 * Hp)

    def prep_whh(w):                      # [H, 4H] -> [Hp, 4Hp], zero rows/cols
        return jnp.pad(prep_cols(w), ((0, Hp - H), (0, 0)))

    return {
        "wih_f": prep_cols(raw["wih_f"]).astype(compute_dtype),
        "whh_f": prep_whh(raw["whh_f"]).astype(compute_dtype),
        "b_f":   prep_cols(raw["b_f"]).astype(jnp.float32),
        "wih_b": prep_cols(raw["wih_b"]).astype(compute_dtype),
        "b_b":   prep_cols(raw["b_b"]).astype(jnp.float32),
    }


# -----------------------------------------------------------------------------
# Forward (graph glue + kernel)
# -----------------------------------------------------------------------------
@functools.partial(jax.jit, static_argnames=("hidden_dim", "gate_dtype",
                                             "batch_tile"))
def lstm_aggregator_forward(neigh_idx, features_table, kparams, perm_key,
                            hidden_dim, gate_dtype=jnp.float32, batch_tile=None):
    """
    neigh_idx:      [B, S] int32 sampled-neighbor node ids per target node
    features_table: [num_nodes, F] float32 node embeddings ("features" fn)
    Returns:        [B, hidden_dim] aggregated features (f32).
    """
    B, S = neigh_idx.shape
    H = hidden_dim // 2
    Hp = kparams["wih_f"].shape[1] // 4

    # TODO(synk): torch.randperm is per-sequence & host-side; replaced here by
    # one shared deterministic permutation folded into the gather indices.
    perm = jax.random.permutation(perm_key, S)
    idx_tm = jnp.transpose(neigh_idx)[perm]            # [S, B], time-major
    idx_flat = idx_tm.reshape(-1).astype(jnp.int32)    # 1-D (cheap SMEM prefetch)

    out_padded = lstm_aggregate(idx_flat, features_table, kparams,
                                batch=B, seq_len=S, gate_dtype=gate_dtype,
                                batch_tile=batch_tile)
    if Hp == H:                                        # no lane padding to strip
        return out_padded
    # Strip the lane padding: [fwd_Hp | bwd_Hp] -> [B, hidden_dim].
    return jnp.concatenate([out_padded[:, :H], out_padded[:, Hp:Hp + H]], axis=-1)


# -----------------------------------------------------------------------------
# Pure-JAX reference (same gather, gate math and matmul precision, unpadded)
# -----------------------------------------------------------------------------
def _reference(seqs_tm, raw, hidden_dim, gate_dtype, compute_dtype=jnp.bfloat16):
    S, B, F = seqs_tm.shape
    H = hidden_dim // 2
    x = seqs_tm.astype(compute_dtype)

    wih_f = _reorder_gates(raw["wih_f"], H).astype(compute_dtype)
    whh_f = _reorder_gates(raw["whh_f"], H).astype(compute_dtype)
    b_f = _reorder_gates(raw["b_f"], H)
    wih_b = _reorder_gates(raw["wih_b"], H).astype(compute_dtype)
    whh_b = _reorder_gates(raw["whh_b"], H).astype(compute_dtype)
    b_b = _reorder_gates(raw["b_b"], H)

    def cell(x_t, h, c, wih, whh, b):
        gates = (jnp.dot(x_t, wih, preferred_element_type=jnp.float32)
                 + jnp.dot(h.astype(compute_dtype), whh,
                           preferred_element_type=jnp.float32)
                 + b)
        return _gate_nonlin(gates, c, H, gate_dtype)

    h = jnp.zeros((B, H), jnp.float32)
    c = jnp.zeros((B, H), jnp.float32)
    for t in range(S):
        h, c = cell(x[t], h, c, wih_f, whh_f, b_f)
    hb, _ = cell(x[S - 1], jnp.zeros((B, H), jnp.float32),
                 jnp.zeros((B, H), jnp.float32), wih_b, whh_b, b_b)
    return jnp.concatenate([h, hb], axis=-1)


if __name__ == "__main__":
    key = jax.random.PRNGKey(0)
    k_feat, k_neigh, k_params, k_perm = jax.random.split(key, 4)

    input_dim = 32
    hidden_dim = 32          # bidirectional -> per-direction hidden H = 16
    num_nodes = 20
    batch = 8                # number of target nodes
    num_sample = 10          # neighbors sampled per node (sequence length)

    features_table = jax.random.normal(k_feat, (num_nodes, input_dim), jnp.float32)
    neigh_idx = jax.random.randint(k_neigh, (batch, num_sample), 0, num_nodes,
                                   dtype=jnp.int32)
    raw_params = init_lstm_params(k_params, input_dim, hidden_dim)
    kparams = prepare_kernel_params(raw_params, hidden_dim)

    gate_dtype = _default_gate_dtype()   # bf16 EUP math on v6e/v7x, f32 on <= v5

    out = lstm_aggregator_forward(neigh_idx, features_table, kparams, k_perm,
                                  hidden_dim=hidden_dim, gate_dtype=gate_dtype)
    out = jax.block_until_ready(out)
    assert out.shape == (batch, hidden_dim), out.shape

    # Verify against a pure-JAX reference using the same gather/permutation and
    # the same matmul / gate-math precision.
    perm = jax.random.permutation(k_perm, num_sample)
    seqs_tm = features_table[jnp.transpose(neigh_idx)[perm]]
    ref = _reference(seqs_tm, raw_params, hidden_dim, gate_dtype)
    err = float(jnp.max(jnp.abs(out - ref)))
    tol = 5e-3 if gate_dtype == jnp.float32 else 3e-2
    assert err < tol, err

    print("KERNEL_OK")
</pallas_src>

<mosaic_0001>
module attributes {stable_mosaic.version = 11 : i64} {
  func.func @_lstm_agg_kernel(%arg0: i32, %arg1: memref<80xi32, #tpu.memory_space<smem>>, %arg2: memref<20x32xf32, #tpu.memory_space<any>>, %arg3: memref<32x512xbf16, #tpu.memory_space<vmem>>, %arg4: memref<128x512xbf16, #tpu.memory_space<vmem>>, %arg5: memref<1x512xf32, #tpu.memory_space<vmem>>, %arg6: memref<32x512xbf16, #tpu.memory_space<vmem>>, %arg7: memref<1x512xf32, #tpu.memory_space<vmem>>, %arg8: memref<8x256xf32, #tpu.memory_space<vmem>>, %arg9: memref<80x32xf32, #tpu.memory_space<vmem>>, %arg10: memref<10x8x512xf32, #tpu.memory_space<vmem>>, %arg11: memref<1x!tpu.dma_semaphore, #tpu.memory_space<semaphore_mem>>) attributes {dimension_semantics = [#tpu.dimension_semantics<parallel>], iteration_bounds = array<i64: 1>, scalar_prefetch = 1 : i64, scratch_operands = 3 : i64, tpu.core_type = #tpu.core_type<tc>, window_params = [{}, {pipeline_mode = #tpu.pipeline_mode<synchronous>, transform_indices = @transform_1, window_bounds = array<i64: 32, 512>}, {pipeline_mode = #tpu.pipeline_mode<synchronous>, transform_indices = @transform_2, window_bounds = array<i64: 128, 512>}, {pipeline_mode = #tpu.pipeline_mode<synchronous>, transform_indices = @transform_3, window_bounds = array<i64: 1, 512>}, {pipeline_mode = #tpu.pipeline_mode<synchronous>, transform_indices = @transform_4, window_bounds = array<i64: 32, 512>}, {pipeline_mode = #tpu.pipeline_mode<synchronous>, transform_indices = @transform_5, window_bounds = array<i64: 1, 512>}, {transform_indices = @transform_6, window_bounds = array<i64: 8, 256>}]} {
    %c8_i32 = arith.constant 8 : i32
    %0 = arith.muli %arg0, %c8_i32 : i32
    %c0_i32 = arith.constant 0 : i32
    %c10_i32 = arith.constant 10 : i32
    %1 = arith.addi %c0_i32, %c10_i32 : i32
    %c1_i32 = arith.constant 1 : i32
    scf.for %arg12 = %c0_i32 to %1 step %c1_i32  : i32 {
      %c1_i32_91 = arith.constant 1 : i32
      %337 = arith.muli %arg12, %c1_i32_91 : i32
      %c0_i32_92 = arith.constant 0 : i32
      %338 = arith.addi %c0_i32_92, %337 : i32
      %c0_i32_93 = arith.constant 0 : i32
      %c8_i32_94 = arith.constant 8 : i32
      %339 = arith.addi %c0_i32_93, %c8_i32_94 : i32
      %c1_i32_95 = arith.constant 1 : i32
      scf.for %arg13 = %c0_i32_93 to %339 step %c1_i32_95  : i32 {
        %c1_i32_97 = arith.constant 1 : i32
        %340 = arith.muli %arg13, %c1_i32_97 : i32
        %c0_i32_98 = arith.constant 0 : i32
        %341 = arith.addi %c0_i32_98, %340 : i32
        %c8_i32_99 = arith.constant 8 : i32
        %342 = arith.muli %338, %c8_i32_99 : i32
        %343 = arith.addi %342, %0 : i32
        %344 = arith.addi %343, %341 : i32
        %345 = arith.index_cast %344 : i32 to index
        %346 = memref.load %arg1[%345] : memref<80xi32, #tpu.memory_space<smem>>
        %c8_i32_100 = arith.constant 8 : i32
        %347 = arith.muli %338, %c8_i32_100 : i32
        %348 = arith.addi %347, %341 : i32
        %c0_i32_101 = arith.constant 0 : i32
        %c0_i32_102 = arith.constant 0 : i32
        %349 = tpu.memref_slice %arg2[%346, %c0_i32_102] : memref<20x32xf32, #tpu.memory_space<any>> -> memref<1x32xf32, #tpu.memory_space<any>>
        %c0_i32_103 = arith.constant 0 : i32
        %350 = tpu.memref_slice %arg9[%348, %c0_i32_103] : memref<80x32xf32, #tpu.memory_space<vmem>> -> memref<1x32xf32, #tpu.memory_space<vmem>>
        %351 = tpu.memref_slice %arg11[%c0_i32_101] : memref<1x!tpu.dma_semaphore, #tpu.memory_space<semaphore_mem>> -> memref<1x!tpu.dma_semaphore, #tpu.memory_space<semaphore_mem>>
        %352 = tpu.memref_squeeze %351 : memref<1x!tpu.dma_semaphore, #tpu.memory_space<semaphore_mem>> -> memref<!tpu.dma_semaphore, #tpu.memory_space<semaphore_mem>>
        tpu.enqueue_dma source(%349 : memref<1x32xf32, #tpu.memory_space<any>>) target(%350 : memref<1x32xf32, #tpu.memory_space<vmem>>) target_semaphore(%352 : memref<!tpu.dma_semaphore, #tpu.memory_space<semaphore_mem>>)
      }
      %c8_i32_96 = arith.constant 8 : i32
    }
    %c10_i32_0 = arith.constant 10 : i32
    %c0_i32_1 = arith.constant 0 : i32
    %c80_i32 = arith.constant 80 : i32
    %2 = arith.addi %c0_i32_1, %c80_i32 : i32
    %c1_i32_2 = arith.constant 1 : i32
    scf.for %arg12 = %c0_i32_1 to %2 step %c1_i32_2  : i32 {
      %c0_i32_91 = arith.constant 0 : i32
      %c0_i32_92 = arith.constant 0 : i32
      %c0_i32_93 = arith.constant 0 : i32
      %337 = tpu.memref_slice %arg2[%c0_i32_92, %c0_i32_93] : memref<20x32xf32, #tpu.memory_space<any>> -> memref<1x32xf32, #tpu.memory_space<any>>
      %c0_i32_94 = arith.constant 0 : i32
      %c0_i32_95 = arith.constant 0 : i32
      %338 = tpu.memref_slice %arg9[%c0_i32_94, %c0_i32_95] : memref<80x32xf32, #tpu.memory_space<vmem>> -> memref<1x32xf32, #tpu.memory_space<vmem>>
      %339 = tpu.memref_slice %arg11[%c0_i32_91] : memref<1x!tpu.dma_semaphore, #tpu.memory_space<semaphore_mem>> -> memref<1x!tpu.dma_semaphore, #tpu.memory_space<semaphore_mem>>
      %340 = tpu.memref_squeeze %339 : memref<1x!tpu.dma_semaphore, #tpu.memory_space<semaphore_mem>> -> memref<!tpu.dma_semaphore, #tpu.memory_space<semaphore_mem>>
      tpu.wait_dma2 semaphore(%340 : memref<!tpu.dma_semaphore, #tpu.memory_space<semaphore_mem>>) src(%337 : memref<1x32xf32, #tpu.memory_space<any>>) dst(%338 : memref<1x32xf32, #tpu.memory_space<vmem>>)
    }
    %c0 = arith.constant 0 : index
    %c0_3 = arith.constant 0 : index
    %3 = vector.load %arg9[%c0, %c0_3] : memref<80x32xf32, #tpu.memory_space<vmem>>, vector<80x32xf32>
    %4 = arith.truncf %3 : vector<80x32xf32> to vector<80x32xbf16>
    %c0_4 = arith.constant 0 : index
    %c0_5 = arith.constant 0 : index
    %5 = vector.load %arg3[%c0_4, %c0_5] : memref<32x512xbf16, #tpu.memory_space<vmem>>, vector<32x512xbf16>
    %cst = arith.constant dense<0.000000e+00> : vector<80x512xf32>
    %6 = tpu.matmul %4, %5, %cst {dimension_numbers = #tpu.dot_dimension_numbers<[1], [0], [0], [1], [0, 0, 1, 1], [], []>} : vector<80x32xbf16>, vector<32x512xbf16>, vector<80x512xf32> -> vector<80x512xf32>
    %c0_6 = arith.constant 0 : index
    %c0_7 = arith.constant 0 : index
    %7 = vector.load %arg5[%c0_6, %c0_7] : memref<1x512xf32, #tpu.memory_space<vmem>>, vector<1x512xf32>
    %8 = vector.broadcast %7 : vector<1x512xf32> to vector<80x512xf32>
    %9 = arith.addf %6, %8 : vector<80x512xf32>
    %10 = vector.shape_cast %9 : vector<80x512xf32> to vector<10x8x512xf32>
    %c0_8 = arith.constant 0 : index
    %c0_9 = arith.constant 0 : index
    %c0_10 = arith.constant 0 : index
    %11 = vector.load %arg10[%c0_8, %c0_9, %c0_10] : memref<10x8x512xf32, #tpu.memory_space<vmem>>, vector<10x8x512xf32>
    tpu.vector_store %arg10[%c0_8, %c0_9, %c0_10], %10 {strides = array<i32>} : memref<10x8x512xf32, #tpu.memory_space<vmem>>, vector<10x8x512xf32>,
    %c0_11 = arith.constant 0 : index
    %c0_12 = arith.constant 0 : index
    %12 = vector.load %arg4[%c0_11, %c0_12] : memref<128x512xbf16, #tpu.memory_space<vmem>>, vector<128x512xbf16>
    %cst_13 = arith.constant 0.000000e+00 : f32
    %13 = vector.broadcast %cst_13 : f32 to vector<8x128xf32>
    %cst_14 = arith.constant 0.000000e+00 : f32
    %14 = vector.broadcast %cst_14 : f32 to vector<8x128xf32>
    %c0_i32_15 = arith.constant 0 : i32
    %15 = arith.index_cast %c0_i32_15 : i32 to index
    %c0_16 = arith.constant 0 : index
    %c0_17 = arith.constant 0 : index
    %16 = vector.load %arg10[%15, %c0_16, %c0_17] : memref<10x8x512xf32, #tpu.memory_space<vmem>>, vector<1x8x512xf32>
    %17 = vector.shape_cast %16 : vector<1x8x512xf32> to vector<8x512xf32>
    %18 = arith.truncf %13 : vector<8x128xf32> to vector<8x128xbf16>
    %cst_18 = arith.constant dense<0.000000e+00> : vector<8x512xf32>
    %19 = tpu.matmul %18, %12, %cst_18 {dimension_numbers = #tpu.dot_dimension_numbers<[1], [0], [0], [1], [0, 0, 1, 1], [], []>} : vector<8x128xbf16>, vector<128x512xbf16>, vector<8x512xf32> -> vector<8x512xf32>
    %20 = arith.addf %17, %19 : vector<8x512xf32>
    %21 = arith.truncf %20 : vector<8x512xf32> to vector<8x512xbf16>
    %22 = vector.extract_strided_slice %21 {offsets = [0, 0], sizes = [8, 384], strides = [1, 1]} : vector<8x512xbf16> to vector<8x384xbf16>
    %cst_19 = arith.constant 5.000000e-01 : bf16
    %23 = vector.broadcast %cst_19 : bf16 to vector<8x384xbf16>
    %24 = arith.mulf %23, %22 : vector<8x384xbf16>
    %25 = math.tanh %24 : vector<8x384xbf16>
    %cst_20 = arith.constant 5.000000e-01 : bf16
    %26 = vector.broadcast %cst_20 : bf16 to vector<8x384xbf16>
    %27 = arith.mulf %26, %25 : vector<8x384xbf16>
    %cst_21 = arith.constant 5.000000e-01 : bf16
    %28 = vector.broadcast %cst_21 : bf16 to vector<8x384xbf16>
    %29 = arith.addf %27, %28 : vector<8x384xbf16>
    %30 = arith.extf %29 : vector<8x384xbf16> to vector<8x384xf32>
    %31 = vector.extract_strided_slice %30 {offsets = [0, 0], sizes = [8, 128], strides = [1, 1]} : vector<8x384xf32> to vector<8x128xf32>
    %32 = vector.extract_strided_slice %30 {offsets = [0, 128], sizes = [8, 128], strides = [1, 1]} : vector<8x384xf32> to vector<8x128xf32>
    %33 = vector.extract_strided_slice %30 {offsets = [0, 256], sizes = [8, 128], strides = [1, 1]} : vector<8x384xf32> to vector<8x128xf32>
    %34 = vector.extract_strided_slice %21 {offsets = [0, 384], sizes = [8, 128], strides = [1, 1]} : vector<8x512xbf16> to vector<8x128xbf16>
    %35 = math.tanh %34 : vector<8x128xbf16>
    %36 = arith.extf %35 : vector<8x128xbf16> to vector<8x128xf32>
    %37 = arith.mulf %32, %14 : vector<8x128xf32>
    %38 = arith.mulf %31, %36 : vector<8x128xf32>
    %39 = arith.addf %37, %38 : vector<8x128xf32>
    %40 = arith.truncf %39 : vector<8x128xf32> to vector<8x128xbf16>
    %41 = math.tanh %40 : vector<8x128xbf16>
    %42 = arith.extf %41 : vector<8x128xbf16> to vector<8x128xf32>
    %43 = arith.mulf %33, %42 : vector<8x128xf32>
    %c1_i32_22 = arith.constant 1 : i32
    %44 = arith.index_cast %c1_i32_22 : i32 to index
    %c0_23 = arith.constant 0 : index
    %c0_24 = arith.constant 0 : index
    %45 = vector.load %arg10[%44, %c0_23, %c0_24] : memref<10x8x512xf32, #tpu.memory_space<vmem>>, vector<1x8x512xf32>
    %46 = vector.shape_cast %45 : vector<1x8x512xf32> to vector<8x512xf32>
    %47 = arith.truncf %43 : vector<8x128xf32> to vector<8x128xbf16>
    %cst_25 = arith.constant dense<0.000000e+00> : vector<8x512xf32>
    %48 = tpu.matmul %47, %12, %cst_25 {dimension_numbers = #tpu.dot_dimension_numbers<[1], [0], [0], [1], [0, 0, 1, 1], [], []>} : vector<8x128xbf16>, vector<128x512xbf16>, vector<8x512xf32> -> vector<8x512xf32>
    %49 = arith.addf %46, %48 : vector<8x512xf32>
    %50 = arith.truncf %49 : vector<8x512xf32> to vector<8x512xbf16>
    %51 = vector.extract_strided_slice %50 {offsets = [0, 0], sizes = [8, 384], strides = [1, 1]} : vector<8x512xbf16> to vector<8x384xbf16>
    %cst_26 = arith.constant 5.000000e-01 : bf16
    %52 = vector.broadcast %cst_26 : bf16 to vector<8x384xbf16>
    %53 = arith.mulf %52, %51 : vector<8x384xbf16>
    %54 = math.tanh %53 : vector<8x384xbf16>
    %cst_27 = arith.constant 5.000000e-01 : bf16
    %55 = vector.broadcast %cst_27 : bf16 to vector<8x384xbf16>
    %56 = arith.mulf %55, %54 : vector<8x384xbf16>
    %cst_28 = arith.constant 5.000000e-01 : bf16
    %57 = vector.broadcast %cst_28 : bf16 to vector<8x384xbf16>
    %58 = arith.addf %56, %57 : vector<8x384xbf16>
    %59 = arith.extf %58 : vector<8x384xbf16> to vector<8x384xf32>
    %60 = vector.extract_strided_slice %59 {offsets = [0, 0], sizes = [8, 128], strides = [1, 1]} : vector<8x384xf32> to vector<8x128xf32>
    %61 = vector.extract_strided_slice %59 {offsets = [0, 128], sizes = [8, 128], strides = [1, 1]} : vector<8x384xf32> to vector<8x128xf32>
    %62 = vector.extract_strided_slice %59 {offsets = [0, 256], sizes = [8, 128], strides = [1, 1]} : vector<8x384xf32> to vector<8x128xf32>
    %63 = vector.extract_strided_slice %50 {offsets = [0, 384], sizes = [8, 128], strides = [1, 1]} : vector<8x512xbf16> to vector<8x128xbf16>
    %64 = math.tanh %63 : vector<8x128xbf16>
    %65 = arith.extf %64 : vector<8x128xbf16> to vector<8x128xf32>
    %66 = arith.mulf %61, %39 : vector<8x128xf32>
    %67 = arith.mulf %60, %65 : vector<8x128xf32>
    %68 = arith.addf %66, %67 : vector<8x128xf32>
    %69 = arith.truncf %68 : vector<8x128xf32> to vector<8x128xbf16>
    %70 = math.tanh %69 : vector<8x128xbf16>
    %71 = arith.extf %70 : vector<8x128xbf16> to vector<8x128xf32>
    %72 = arith.mulf %62, %71 : vector<8x128xf32>
    %c2_i32 = arith.constant 2 : i32
    %73 = arith.index_cast %c2_i32 : i32 to index
    %c0_29 = arith.constant 0 : index
    %c0_30 = arith.constant 0 : index
    %74 = vector.load %arg10[%73, %c0_29, %c0_30] : memref<10x8x512xf32, #tpu.memory_space<vmem>>, vector<1x8x512xf32>
    %75 = vector.shape_cast %74 : vector<1x8x512xf32> to vector<8x512xf32>
    %76 = arith.truncf %72 : vector<8x128xf32> to vector<8x128xbf16>
    %cst_31 = arith.constant dense<0.000000e+00> : vector<8x512xf32>
    %77 = tpu.matmul %76, %12, %cst_31 {dimension_numbers = #tpu.dot_dimension_numbers<[1], [0], [0], [1], [0, 0, 1, 1], [], []>} : vector<8x128xbf16>, vector<128x512xbf16>, vector<8x512xf32> -> vector<8x512xf32>
    %78 = arith.addf %75, %77 : vector<8x512xf32>
    %79 = arith.truncf %78 : vector<8x512xf32> to vector<8x512xbf16>
    %80 = vector.extract_strided_slice %79 {offsets = [0, 0], sizes = [8, 384], strides = [1, 1]} : vector<8x512xbf16> to vector<8x384xbf16>
    %cst_32 = arith.constant 5.000000e-01 : bf16
    %81 = vector.broadcast %cst_32 : bf16 to vector<8x384xbf16>
    %82 = arith.mulf %81, %80 : vector<8x384xbf16>
    %83 = math.tanh %82 : vector<8x384xbf16>
    %cst_33 = arith.constant 5.000000e-01 : bf16
    %84 = vector.broadcast %cst_33 : bf16 to vector<8x384xbf16>
    %85 = arith.mulf %84, %83 : vector<8x384xbf16>
    %cst_34 = arith.constant 5.000000e-01 : bf16
    %86 = vector.broadcast %cst_34 : bf16 to vector<8x384xbf16>
    %87 = arith.addf %85, %86 : vector<8x384xbf16>
    %88 = arith.extf %87 : vector<8x384xbf16> to vector<8x384xf32>
    %89 = vector.extract_strided_slice %88 {offsets = [0, 0], sizes = [8, 128], strides = [1, 1]} : vector<8x384xf32> to vector<8x128xf32>
    %90 = vector.extract_strided_slice %88 {offsets = [0, 128], sizes = [8, 128], strides = [1, 1]} : vector<8x384xf32> to vector<8x128xf32>
    %91 = vector.extract_strided_slice %88 {offsets = [0, 256], sizes = [8, 128], strides = [1, 1]} : vector<8x384xf32> to vector<8x128xf32>
    %92 = vector.extract_strided_slice %79 {offsets = [0, 384], sizes = [8, 128], strides = [1, 1]} : vector<8x512xbf16> to vector<8x128xbf16>
    %93 = math.tanh %92 : vector<8x128xbf16>
    %94 = arith.extf %93 : vector<8x128xbf16> to vector<8x128xf32>
    %95 = arith.mulf %90, %68 : vector<8x128xf32>
    %96 = arith.mulf %89, %94 : vector<8x128xf32>
    %97 = arith.addf %95, %96 : vector<8x128xf32>
    %98 = arith.truncf %97 : vector<8x128xf32> to vector<8x128xbf16>
    %99 = math.tanh %98 : vector<8x128xbf16>
    %100 = arith.extf %99 : vector<8x128xbf16> to vector<8x128xf32>
    %101 = arith.mulf %91, %100 : vector<8x128xf32>
    %c3_i32 = arith.constant 3 : i32
    %102 = arith.index_cast %c3_i32 : i32 to index
    %c0_35 = arith.constant 0 : index
    %c0_36 = arith.constant 0 : index
    %103 = vector.load %arg10[%102, %c0_35, %c0_36] : memref<10x8x512xf32, #tpu.memory_space<vmem>>, vector<1x8x512xf32>
    %104 = vector.shape_cast %103 : vector<1x8x512xf32> to vector<8x512xf32>
    %105 = arith.truncf %101 : vector<8x128xf32> to vector<8x128xbf16>
    %cst_37 = arith.constant dense<0.000000e+00> : vector<8x512xf32>
    %106 = tpu.matmul %105, %12, %cst_37 {dimension_numbers = #tpu.dot_dimension_numbers<[1], [0], [0], [1], [0, 0, 1, 1], [], []>} : vector<8x128xbf16>, vector<128x512xbf16>, vector<8x512xf32> -> vector<8x512xf32>
    %107 = arith.addf %104, %106 : vector<8x512xf32>
    %108 = arith.truncf %107 : vector<8x512xf32> to vector<8x512xbf16>
    %109 = vector.extract_strided_slice %108 {offsets = [0, 0], sizes = [8, 384], strides = [1, 1]} : vector<8x512xbf16> to vector<8x384xbf16>
    %cst_38 = arith.constant 5.000000e-01 : bf16
    %110 = vector.broadcast %cst_38 : bf16 to vector<8x384xbf16>
    %111 = arith.mulf %110, %109 : vector<8x384xbf16>
    %112 = math.tanh %111 : vector<8x384xbf16>
    %cst_39 = arith.constant 5.000000e-01 : bf16
    %113 = vector.broadcast %cst_39 : bf16 to vector<8x384xbf16>
    %114 = arith.mulf %113, %112 : vector<8x384xbf16>
    %cst_40 = arith.constant 5.000000e-01 : bf16
    %115 = vector.broadcast %cst_40 : bf16 to vector<8x384xbf16>
    %116 = arith.addf %114, %115 : vector<8x384xbf16>
    %117 = arith.extf %116 : vector<8x384xbf16> to vector<8x384xf32>
    %118 = vector.extract_strided_slice %117 {offsets = [0, 0], sizes = [8, 128], strides = [1, 1]} : vector<8x384xf32> to vector<8x128xf32>
    %119 = vector.extract_strided_slice %117 {offsets = [0, 128], sizes = [8, 128], strides = [1, 1]} : vector<8x384xf32> to vector<8x128xf32>
    %120 = vector.extract_strided_slice %117 {offsets = [0, 256], sizes = [8, 128], strides = [1, 1]} : vector<8x384xf32> to vector<8x128xf32>
    %121 = vector.extract_strided_slice %108 {offsets = [0, 384], sizes = [8, 128], strides = [1, 1]} : vector<8x512xbf16> to vector<8x128xbf16>
    %122 = math.tanh %121 : vector<8x128xbf16>
    %123 = arith.extf %122 : vector<8x128xbf16> to vector<8x128xf32>
    %124 = arith.mulf %119, %97 : vector<8x128xf32>
    %125 = arith.mulf %118, %123 : vector<8x128xf32>
    %126 = arith.addf %124, %125 : vector<8x128xf32>
    %127 = arith.truncf %126 : vector<8x128xf32> to vector<8x128xbf16>
    %128 = math.tanh %127 : vector<8x128xbf16>
    %129 = arith.extf %128 : vector<8x128xbf16> to vector<8x128xf32>
    %130 = arith.mulf %120, %129 : vector<8x128xf32>
    %c4_i32 = arith.constant 4 : i32
    %131 = arith.index_cast %c4_i32 : i32 to index
    %c0_41 = arith.constant 0 : index
    %c0_42 = arith.constant 0 : index
    %132 = vector.load %arg10[%131, %c0_41, %c0_42] : memref<10x8x512xf32, #tpu.memory_space<vmem>>, vector<1x8x512xf32>
    %133 = vector.shape_cast %132 : vector<1x8x512xf32> to vector<8x512xf32>
    %134 = arith.truncf %130 : vector<8x128xf32> to vector<8x128xbf16>
    %cst_43 = arith.constant dense<0.000000e+00> : vector<8x512xf32>
    %135 = tpu.matmul %134, %12, %cst_43 {dimension_numbers = #tpu.dot_dimension_numbers<[1], [0], [0], [1], [0, 0, 1, 1], [], []>} : vector<8x128xbf16>, vector<128x512xbf16>, vector<8x512xf32> -> vector<8x512xf32>
    %136 = arith.addf %133, %135 : vector<8x512xf32>
    %137 = arith.truncf %136 : vector<8x512xf32> to vector<8x512xbf16>
    %138 = vector.extract_strided_slice %137 {offsets = [0, 0], sizes = [8, 384], strides = [1, 1]} : vector<8x512xbf16> to vector<8x384xbf16>
    %cst_44 = arith.constant 5.000000e-01 : bf16
    %139 = vector.broadcast %cst_44 : bf16 to vector<8x384xbf16>
    %140 = arith.mulf %139, %138 : vector<8x384xbf16>
    %141 = math.tanh %140 : vector<8x384xbf16>
    %cst_45 = arith.constant 5.000000e-01 : bf16
    %142 = vector.broadcast %cst_45 : bf16 to vector<8x384xbf16>
    %143 = arith.mulf %142, %141 : vector<8x384xbf16>
    %cst_46 = arith.constant 5.000000e-01 : bf16
    %144 = vector.broadcast %cst_46 : bf16 to vector<8x384xbf16>
    %145 = arith.addf %143, %144 : vector<8x384xbf16>
    %146 = arith.extf %145 : vector<8x384xbf16> to vector<8x384xf32>
    %147 = vector.extract_strided_slice %146 {offsets = [0, 0], sizes = [8, 128], strides = [1, 1]} : vector<8x384xf32> to vector<8x128xf32>
    %148 = vector.extract_strided_slice %146 {offsets = [0, 128], sizes = [8, 128], strides = [1, 1]} : vector<8x384xf32> to vector<8x128xf32>
    %149 = vector.extract_strided_slice %146 {offsets = [0, 256], sizes = [8, 128], strides = [1, 1]} : vector<8x384xf32> to vector<8x128xf32>
    %150 = vector.extract_strided_slice %137 {offsets = [0, 384], sizes = [8, 128], strides = [1, 1]} : vector<8x512xbf16> to vector<8x128xbf16>
    %151 = math.tanh %150 : vector<8x128xbf16>
    %152 = arith.extf %151 : vector<8x128xbf16> to vector<8x128xf32>
    %153 = arith.mulf %148, %126 : vector<8x128xf32>
    %154 = arith.mulf %147, %152 : vector<8x128xf32>
    %155 = arith.addf %153, %154 : vector<8x128xf32>
    %156 = arith.truncf %155 : vector<8x128xf32> to vector<8x128xbf16>
    %157 = math.tanh %156 : vector<8x128xbf16>
    %158 = arith.extf %157 : vector<8x128xbf16> to vector<8x128xf32>
    %159 = arith.mulf %149, %158 : vector<8x128xf32>
    %c5_i32 = arith.constant 5 : i32
    %160 = arith.index_cast %c5_i32 : i32 to index
    %c0_47 = arith.constant 0 : index
    %c0_48 = arith.constant 0 : index
    %161 = vector.load %arg10[%160, %c0_47, %c0_48] : memref<10x8x512xf32, #tpu.memory_space<vmem>>, vector<1x8x512xf32>
    %162 = vector.shape_cast %161 : vector<1x8x512xf32> to vector<8x512xf32>
    %163 = arith.truncf %159 : vector<8x128xf32> to vector<8x128xbf16>
    %cst_49 = arith.constant dense<0.000000e+00> : vector<8x512xf32>
    %164 = tpu.matmul %163, %12, %cst_49 {dimension_numbers = #tpu.dot_dimension_numbers<[1], [0], [0], [1], [0, 0, 1, 1], [], []>} : vector<8x128xbf16>, vector<128x512xbf16>, vector<8x512xf32> -> vector<8x512xf32>
    %165 = arith.addf %162, %164 : vector<8x512xf32>
    %166 = arith.truncf %165 : vector<8x512xf32> to vector<8x512xbf16>
    %167 = vector.extract_strided_slice %166 {offsets = [0, 0], sizes = [8, 384], strides = [1, 1]} : vector<8x512xbf16> to vector<8x384xbf16>
    %cst_50 = arith.constant 5.000000e-01 : bf16
    %168 = vector.broadcast %cst_50 : bf16 to vector<8x384xbf16>
    %169 = arith.mulf %168, %167 : vector<8x384xbf16>
    %170 = math.tanh %169 : vector<8x384xbf16>
    %cst_51 = arith.constant 5.000000e-01 : bf16
    %171 = vector.broadcast %cst_51 : bf16 to vector<8x384xbf16>
    %172 = arith.mulf %171, %170 : vector<8x384xbf16>
    %cst_52 = arith.constant 5.000000e-01 : bf16
    %173 = vector.broadcast %cst_52 : bf16 to vector<8x384xbf16>
    %174 = arith.addf %172, %173 : vector<8x384xbf16>
    %175 = arith.extf %174 : vector<8x384xbf16> to vector<8x384xf32>
    %176 = vector.extract_strided_slice %175 {offsets = [0, 0], sizes = [8, 128], strides = [1, 1]} : vector<8x384xf32> to vector<8x128xf32>
    %177 = vector.extract_strided_slice %175 {offsets = [0, 128], sizes = [8, 128], strides = [1, 1]} : vector<8x384xf32> to vector<8x128xf32>
    %178 = vector.extract_strided_slice %175 {offsets = [0, 256], sizes = [8, 128], strides = [1, 1]} : vector<8x384xf32> to vector<8x128xf32>
    %179 = vector.extract_strided_slice %166 {offsets = [0, 384], sizes = [8, 128], strides = [1, 1]} : vector<8x512xbf16> to vector<8x128xbf16>
    %180 = math.tanh %179 : vector<8x128xbf16>
    %181 = arith.extf %180 : vector<8x128xbf16> to vector<8x128xf32>
    %182 = arith.mulf %177, %155 : vector<8x128xf32>
    %183 = arith.mulf %176, %181 : vector<8x128xf32>
    %184 = arith.addf %182, %183 : vector<8x128xf32>
    %185 = arith.truncf %184 : vector<8x128xf32> to vector<8x128xbf16>
    %186 = math.tanh %185 : vector<8x128xbf16>
    %187 = arith.extf %186 : vector<8x128xbf16> to vector<8x128xf32>
    %188 = arith.mulf %178, %187 : vector<8x128xf32>
    %c6_i32 = arith.constant 6 : i32
    %189 = arith.index_cast %c6_i32 : i32 to index
    %c0_53 = arith.constant 0 : index
    %c0_54 = arith.constant 0 : index
    %190 = vector.load %arg10[%189, %c0_53, %c0_54] : memref<10x8x512xf32, #tpu.memory_space<vmem>>, vector<1x8x512xf32>
    %191 = vector.shape_cast %190 : vector<1x8x512xf32> to vector<8x512xf32>
    %192 = arith.truncf %188 : vector<8x128xf32> to vector<8x128xbf16>
    %cst_55 = arith.constant dense<0.000000e+00> : vector<8x512xf32>
    %193 = tpu.matmul %192, %12, %cst_55 {dimension_numbers = #tpu.dot_dimension_numbers<[1], [0], [0], [1], [0, 0, 1, 1], [], []>} : vector<8x128xbf16>, vector<128x512xbf16>, vector<8x512xf32> -> vector<8x512xf32>
    %194 = arith.addf %191, %193 : vector<8x512xf32>
    %195 = arith.truncf %194 : vector<8x512xf32> to vector<8x512xbf16>
    %196 = vector.extract_strided_slice %195 {offsets = [0, 0], sizes = [8, 384], strides = [1, 1]} : vector<8x512xbf16> to vector<8x384xbf16>
    %cst_56 = arith.constant 5.000000e-01 : bf16
    %197 = vector.broadcast %cst_56 : bf16 to vector<8x384xbf16>
    %198 = arith.mulf %197, %196 : vector<8x384xbf16>
    %199 = math.tanh %198 : vector<8x384xbf16>
    %cst_57 = arith.constant 5.000000e-01 : bf16
    %200 = vector.broadcast %cst_57 : bf16 to vector<8x384xbf16>
    %201 = arith.mulf %200, %199 : vector<8x384xbf16>
    %cst_58 = arith.constant 5.000000e-01 : bf16
    %202 = vector.broadcast %cst_58 : bf16 to vector<8x384xbf16>
    %203 = arith.addf %201, %202 : vector<8x384xbf16>
    %204 = arith.extf %203 : vector<8x384xbf16> to vector<8x384xf32>
    %205 = vector.extract_strided_slice %204 {offsets = [0, 0], sizes = [8, 128], strides = [1, 1]} : vector<8x384xf32> to vector<8x128xf32>
    %206 = vector.extract_strided_slice %204 {offsets = [0, 128], sizes = [8, 128], strides = [1, 1]} : vector<8x384xf32> to vector<8x128xf32>
    %207 = vector.extract_strided_slice %204 {offsets = [0, 256], sizes = [8, 128], strides = [1, 1]} : vector<8x384xf32> to vector<8x128xf32>
    %208 = vector.extract_strided_slice %195 {offsets = [0, 384], sizes = [8, 128], strides = [1, 1]} : vector<8x512xbf16> to vector<8x128xbf16>
    %209 = math.tanh %208 : vector<8x128xbf16>
    %210 = arith.extf %209 : vector<8x128xbf16> to vector<8x128xf32>
    %211 = arith.mulf %206, %184 : vector<8x128xf32>
    %212 = arith.mulf %205, %210 : vector<8x128xf32>
    %213 = arith.addf %211, %212 : vector<8x128xf32>
    %214 = arith.truncf %213 : vector<8x128xf32> to vector<8x128xbf16>
    %215 = math.tanh %214 : vector<8x128xbf16>
    %216 = arith.extf %215 : vector<8x128xbf16> to vector<8x128xf32>
    %217 = arith.mulf %207, %216 : vector<8x128xf32>
    %c7_i32 = arith.constant 7 : i32
    %218 = arith.index_cast %c7_i32 : i32 to index
    %c0_59 = arith.constant 0 : index
    %c0_60 = arith.constant 0 : index
    %219 = vector.load %arg10[%218, %c0_59, %c0_60] : memref<10x8x512xf32, #tpu.memory_space<vmem>>, vector<1x8x512xf32>
    %220 = vector.shape_cast %219 : vector<1x8x512xf32> to vector<8x512xf32>
    %221 = arith.truncf %217 : vector<8x128xf32> to vector<8x128xbf16>
    %cst_61 = arith.constant dense<0.000000e+00> : vector<8x512xf32>
    %222 = tpu.matmul %221, %12, %cst_61 {dimension_numbers = #tpu.dot_dimension_numbers<[1], [0], [0], [1], [0, 0, 1, 1], [], []>} : vector<8x128xbf16>, vector<128x512xbf16>, vector<8x512xf32> -> vector<8x512xf32>
    %223 = arith.addf %220, %222 : vector<8x512xf32>
    %224 = arith.truncf %223 : vector<8x512xf32> to vector<8x512xbf16>
    %225 = vector.extract_strided_slice %224 {offsets = [0, 0], sizes = [8, 384], strides = [1, 1]} : vector<8x512xbf16> to vector<8x384xbf16>
    %cst_62 = arith.constant 5.000000e-01 : bf16
    %226 = vector.broadcast %cst_62 : bf16 to vector<8x384xbf16>
    %227 = arith.mulf %226, %225 : vector<8x384xbf16>
    %228 = math.tanh %227 : vector<8x384xbf16>
    %cst_63 = arith.constant 5.000000e-01 : bf16
    %229 = vector.broadcast %cst_63 : bf16 to vector<8x384xbf16>
    %230 = arith.mulf %229, %228 : vector<8x384xbf16>
    %cst_64 = arith.constant 5.000000e-01 : bf16
    %231 = vector.broadcast %cst_64 : bf16 to vector<8x384xbf16>
    %232 = arith.addf %230, %231 : vector<8x384xbf16>
    %233 = arith.extf %232 : vector<8x384xbf16> to vector<8x384xf32>
    %234 = vector.extract_strided_slice %233 {offsets = [0, 0], sizes = [8, 128], strides = [1, 1]} : vector<8x384xf32> to vector<8x128xf32>
    %235 = vector.extract_strided_slice %233 {offsets = [0, 128], sizes = [8, 128], strides = [1, 1]} : vector<8x384xf32> to vector<8x128xf32>
    %236 = vector.extract_strided_slice %233 {offsets = [0, 256], sizes = [8, 128], strides = [1, 1]} : vector<8x384xf32> to vector<8x128xf32>
    %237 = vector.extract_strided_slice %224 {offsets = [0, 384], sizes = [8, 128], strides = [1, 1]} : vector<8x512xbf16> to vector<8x128xbf16>
    %238 = math.tanh %237 : vector<8x128xbf16>
    %239 = arith.extf %238 : vector<8x128xbf16> to vector<8x128xf32>
    %240 = arith.mulf %235, %213 : vector<8x128xf32>
    %241 = arith.mulf %234, %239 : vector<8x128xf32>
    %242 = arith.addf %240, %241 : vector<8x128xf32>
    %243 = arith.truncf %242 : vector<8x128xf32> to vector<8x128xbf16>
    %244 = math.tanh %243 : vector<8x128xbf16>
    %245 = arith.extf %244 : vector<8x128xbf16> to vector<8x128xf32>
    %246 = arith.mulf %236, %245 : vector<8x128xf32>
    %c8_i32_65 = arith.constant 8 : i32
    %247 = arith.index_cast %c8_i32_65 : i32 to index
    %c0_66 = arith.constant 0 : index
    %c0_67 = arith.constant 0 : index
    %248 = vector.load %arg10[%247, %c0_66, %c0_67] : memref<10x8x512xf32, #tpu.memory_space<vmem>>, vector<1x8x512xf32>
    %249 = vector.shape_cast %248 : vector<1x8x512xf32> to vector<8x512xf32>
    %250 = arith.truncf %246 : vector<8x128xf32> to vector<8x128xbf16>
    %cst_68 = arith.constant dense<0.000000e+00> : vector<8x512xf32>
    %251 = tpu.matmul %250, %12, %cst_68 {dimension_numbers = #tpu.dot_dimension_numbers<[1], [0], [0], [1], [0, 0, 1, 1], [], []>} : vector<8x128xbf16>, vector<128x512xbf16>, vector<8x512xf32> -> vector<8x512xf32>
    %252 = arith.addf %249, %251 : vector<8x512xf32>
    %253 = arith.truncf %252 : vector<8x512xf32> to vector<8x512xbf16>
    %254 = vector.extract_strided_slice %253 {offsets = [0, 0], sizes = [8, 384], strides = [1, 1]} : vector<8x512xbf16> to vector<8x384xbf16>
    %cst_69 = arith.constant 5.000000e-01 : bf16
    %255 = vector.broadcast %cst_69 : bf16 to vector<8x384xbf16>
    %256 = arith.mulf %255, %254 : vector<8x384xbf16>
    %257 = math.tanh %256 : vector<8x384xbf16>
    %cst_70 = arith.constant 5.000000e-01 : bf16
    %258 = vector.broadcast %cst_70 : bf16 to vector<8x384xbf16>
    %259 = arith.mulf %258, %257 : vector<8x384xbf16>
    %cst_71 = arith.constant 5.000000e-01 : bf16
    %260 = vector.broadcast %cst_71 : bf16 to vector<8x384xbf16>
    %261 = arith.addf %259, %260 : vector<8x384xbf16>
    %262 = arith.extf %261 : vector<8x384xbf16> to vector<8x384xf32>
    %263 = vector.extract_strided_slice %262 {offsets = [0, 0], sizes = [8, 128], strides = [1, 1]} : vector<8x384xf32> to vector<8x128xf32>
    %264 = vector.extract_strided_slice %262 {offsets = [0, 128], sizes = [8, 128], strides = [1, 1]} : vector<8x384xf32> to vector<8x128xf32>
    %265 = vector.extract_strided_slice %262 {offsets = [0, 256], sizes = [8, 128], strides = [1, 1]} : vector<8x384xf32> to vector<8x128xf32>
    %266 = vector.extract_strided_slice %253 {offsets = [0, 384], sizes = [8, 128], strides = [1, 1]} : vector<8x512xbf16> to vector<8x128xbf16>
    %267 = math.tanh %266 : vector<8x128xbf16>
    %268 = arith.extf %267 : vector<8x128xbf16> to vector<8x128xf32>
    %269 = arith.mulf %264, %242 : vector<8x128xf32>
    %270 = arith.mulf %263, %268 : vector<8x128xf32>
    %271 = arith.addf %269, %270 : vector<8x128xf32>
    %272 = arith.truncf %271 : vector<8x128xf32> to vector<8x128xbf16>
    %273 = math.tanh %272 : vector<8x128xbf16>
    %274 = arith.extf %273 : vector<8x128xbf16> to vector<8x128xf32>
    %275 = arith.mulf %265, %274 : vector<8x128xf32>
    %c9_i32 = arith.constant 9 : i32
    %276 = arith.index_cast %c9_i32 : i32 to index
    %c0_72 = arith.constant 0 : index
    %c0_73 = arith.constant 0 : index
    %277 = vector.load %arg10[%276, %c0_72, %c0_73] : memref<10x8x512xf32, #tpu.memory_space<vmem>>, vector<1x8x512xf32>
    %278 = vector.shape_cast %277 : vector<1x8x512xf32> to vector<8x512xf32>
    %279 = arith.truncf %275 : vector<8x128xf32> to vector<8x128xbf16>
    %cst_74 = arith.constant dense<0.000000e+00> : vector<8x512xf32>
    %280 = tpu.matmul %279, %12, %cst_74 {dimension_numbers = #tpu.dot_dimension_numbers<[1], [0], [0], [1], [0, 0, 1, 1], [], []>} : vector<8x128xbf16>, vector<128x512xbf16>, vector<8x512xf32> -> vector<8x512xf32>
    %281 = arith.addf %278, %280 : vector<8x512xf32>
    %282 = arith.truncf %281 : vector<8x512xf32> to vector<8x512xbf16>
    %283 = vector.extract_strided_slice %282 {offsets = [0, 0], sizes = [8, 384], strides = [1, 1]} : vector<8x512xbf16> to vector<8x384xbf16>
    %cst_75 = arith.constant 5.000000e-01 : bf16
    %284 = vector.broadcast %cst_75 : bf16 to vector<8x384xbf16>
    %285 = arith.mulf %284, %283 : vector<8x384xbf16>
    %286 = math.tanh %285 : vector<8x384xbf16>
    %cst_76 = arith.constant 5.000000e-01 : bf16
    %287 = vector.broadcast %cst_76 : bf16 to vector<8x384xbf16>
    %288 = arith.mulf %287, %286 : vector<8x384xbf16>
    %cst_77 = arith.constant 5.000000e-01 : bf16
    %289 = vector.broadcast %cst_77 : bf16 to vector<8x384xbf16>
    %290 = arith.addf %288, %289 : vector<8x384xbf16>
    %291 = arith.extf %290 : vector<8x384xbf16> to vector<8x384xf32>
    %292 = vector.extract_strided_slice %291 {offsets = [0, 0], sizes = [8, 128], strides = [1, 1]} : vector<8x384xf32> to vector<8x128xf32>
    %293 = vector.extract_strided_slice %291 {offsets = [0, 128], sizes = [8, 128], strides = [1, 1]} : vector<8x384xf32> to vector<8x128xf32>
    %294 = vector.extract_strided_slice %291 {offsets = [0, 256], sizes = [8, 128], strides = [1, 1]} : vector<8x384xf32> to vector<8x128xf32>
    %295 = vector.extract_strided_slice %282 {offsets = [0, 384], sizes = [8, 128], strides = [1, 1]} : vector<8x512xbf16> to vector<8x128xbf16>
    %296 = math.tanh %295 : vector<8x128xbf16>
    %297 = arith.extf %296 : vector<8x128xbf16> to vector<8x128xf32>
    %298 = arith.mulf %293, %271 : vector<8x128xf32>
    %299 = arith.mulf %292, %297 : vector<8x128xf32>
    %300 = arith.addf %298, %299 : vector<8x128xf32>
    %301 = arith.truncf %300 : vector<8x128xf32> to vector<8x128xbf16>
    %302 = math.tanh %301 : vector<8x128xbf16>
    %303 = arith.extf %302 : vector<8x128xbf16> to vector<8x128xf32>
    %304 = arith.mulf %294, %303 : vector<8x128xf32>
    %c10_i32_78 = arith.constant 10 : i32
    %c72 = arith.constant 72 : index
    %c0_79 = arith.constant 0 : index
    %305 = vector.load %arg9[%c72, %c0_79] : memref<80x32xf32, #tpu.memory_space<vmem>>, vector<8x32xf32>
    %306 = arith.truncf %305 : vector<8x32xf32> to vector<8x32xbf16>
    %c0_80 = arith.constant 0 : index
    %c0_81 = arith.constant 0 : index
    %307 = vector.load %arg6[%c0_80, %c0_81] : memref<32x512xbf16, #tpu.memory_space<vmem>>, vector<32x512xbf16>
    %cst_82 = arith.constant dense<0.000000e+00> : vector<8x512xf32>
    %308 = tpu.matmul %306, %307, %cst_82 {dimension_numbers = #tpu.dot_dimension_numbers<[1], [0], [0], [1], [0, 0, 1, 1], [], []>} : vector<8x32xbf16>, vector<32x512xbf16>, vector<8x512xf32> -> vector<8x512xf32>
    %c0_83 = arith.constant 0 : index
    %c0_84 = arith.constant 0 : index
    %309 = vector.load %arg7[%c0_83, %c0_84] : memref<1x512xf32, #tpu.memory_space<vmem>>, vector<1x512xf32>
    %310 = vector.broadcast %309 : vector<1x512xf32> to vector<8x512xf32>
    %311 = arith.addf %308, %310 : vector<8x512xf32>
    %312 = arith.truncf %311 : vector<8x512xf32> to vector<8x512xbf16>
    %313 = vector.extract_strided_slice %312 {offsets = [0, 0], sizes = [8, 384], strides = [1, 1]} : vector<8x512xbf16> to vector<8x384xbf16>
    %cst_85 = arith.constant 5.000000e-01 : bf16
    %314 = vector.broadcast %cst_85 : bf16 to vector<8x384xbf16>
    %315 = arith.mulf %314, %313 : vector<8x384xbf16>
    %316 = math.tanh %315 : vector<8x384xbf16>
    %cst_86 = arith.constant 5.000000e-01 : bf16
    %317 = vector.broadcast %cst_86 : bf16 to vector<8x384xbf16>
    %318 = arith.mulf %317, %316 : vector<8x384xbf16>
    %cst_87 = arith.constant 5.000000e-01 : bf16
    %319 = vector.broadcast %cst_87 : bf16 to vector<8x384xbf16>
    %320 = arith.addf %318, %319 : vector<8x384xbf16>
    %321 = arith.extf %320 : vector<8x384xbf16> to vector<8x384xf32>
    %322 = vector.extract_strided_slice %321 {offsets = [0, 0], sizes = [8, 128], strides = [1, 1]} : vector<8x384xf32> to vector<8x128xf32>
    %323 = vector.extract_strided_slice %321 {offsets = [0, 128], sizes = [8, 128], strides = [1, 1]} : vector<8x384xf32> to vector<8x128xf32>
    %324 = vector.extract_strided_slice %321 {offsets = [0, 256], sizes = [8, 128], strides = [1, 1]} : vector<8x384xf32> to vector<8x128xf32>
    %325 = vector.extract_strided_slice %312 {offsets = [0, 384], sizes = [8, 128], strides = [1, 1]} : vector<8x512xbf16> to vector<8x128xbf16>
    %326 = math.tanh %325 : vector<8x128xbf16>
    %327 = arith.extf %326 : vector<8x128xbf16> to vector<8x128xf32>
    %328 = arith.mulf %323, %14 : vector<8x128xf32>
    %329 = arith.mulf %322, %327 : vector<8x128xf32>
    %330 = arith.addf %328, %329 : vector<8x128xf32>
    %331 = arith.truncf %330 : vector<8x128xf32> to vector<8x128xbf16>
    %332 = math.tanh %331 : vector<8x128xbf16>
    %333 = arith.extf %332 : vector<8x128xbf16> to vector<8x128xf32>
    %334 = arith.mulf %324, %333 : vector<8x128xf32>
    %c0_88 = arith.constant 0 : index
    %c0_89 = arith.constant 0 : index
    %335 = vector.load %arg8[%c0_88, %c0_89] : memref<8x256xf32, #tpu.memory_space<vmem>>, vector<8x128xf32>
    tpu.vector_store %arg8[%c0_88, %c0_89], %304 {strides = array<i32>} : memref<8x256xf32, #tpu.memory_space<vmem>>, vector<8x128xf32>,
    %c0_90 = arith.constant 0 : index
    %c128 = arith.constant 128 : index
    %336 = vector.load %arg8[%c0_90, %c128] : memref<8x256xf32, #tpu.memory_space<vmem>>, vector<8x128xf32>
    tpu.vector_store %arg8[%c0_90, %c128], %334 {strides = array<i32>} : memref<8x256xf32, #tpu.memory_space<vmem>>, vector<8x128xf32>,
    return
  }
  func.func @transform_1(%arg0: i32, %arg1: memref<80xi32, #tpu.memory_space<smem>>) -> (i32, i32) {
    %c0_i32 = arith.constant 0 : i32
    %c0_i32_0 = arith.constant 0 : i32
    %c0_i32_1 = arith.constant 0 : i32
    return %c0_i32, %c0_i32_0 : i32, i32
  }
  func.func @transform_2(%arg0: i32, %arg1: memref<80xi32, #tpu.memory_space<smem>>) -> (i32, i32) {
    %c0_i32 = arith.constant 0 : i32
    %c0_i32_0 = arith.constant 0 : i32
    %c0_i32_1 = arith.constant 0 : i32
    return %c0_i32, %c0_i32_0 : i32, i32
  }
  func.func @transform_3(%arg0: i32, %arg1: memref<80xi32, #tpu.memory_space<smem>>) -> (i32, i32) {
    %c0_i32 = arith.constant 0 : i32
    %c0_i32_0 = arith.constant 0 : i32
    %c0_i32_1 = arith.constant 0 : i32
    return %c0_i32, %c0_i32_0 : i32, i32
  }
  func.func @transform_4(%arg0: i32, %arg1: memref<80xi32, #tpu.memory_space<smem>>) -> (i32, i32) {
    %c0_i32 = arith.constant 0 : i32
    %c0_i32_0 = arith.constant 0 : i32
    %c0_i32_1 = arith.constant 0 : i32
    return %c0_i32, %c0_i32_0 : i32, i32
  }
  func.func @transform_5(%arg0: i32, %arg1: memref<80xi32, #tpu.memory_space<smem>>) -> (i32, i32) {
    %c0_i32 = arith.constant 0 : i32
    %c0_i32_0 = arith.constant 0 : i32
    %c0_i32_1 = arith.constant 0 : i32
    return %c0_i32, %c0_i32_0 : i32, i32
  }
  func.func @transform_6(%arg0: i32, %arg1: memref<80xi32, #tpu.memory_space<smem>>) -> (i32, i32) {
    %c0_i32 = arith.constant 0 : i32
    %c0_i32_0 = arith.constant 0 : i32
    return %arg0, %c0_i32 : i32, i32
  }
}

</mosaic_0001>

<bundles_post_ra>
// kernel: lstm_aggregator_forward.1
= control target key start
LH: loop header
LB: loop body
LE: loop exit
PB: predicated region body
PF: predicated region fallthrough
CT: control target
= control target key end

     0   :  { %s2390_s27 = smov [#allocation6]   ;;  %s3161_s0 = inlined_call_operand.vmem [shape: s32[80], index: 0, kind: input, shape index: {}]   ;;  %s3162_s1 = inlined_call_operand.vmem [shape: f32[20,32], index: 1, kind: input, shape index: {}]   ;;  %s3163_s2 = inlined_call_operand.vmem [shape: bf16[32,512], index: 2, kind: input, shape index: {}]   ;;  %s3164_s3 = inlined_call_operand.hbm [shape: bf16[128,512], index: 3, kind: input, shape index: {}]   ;;  %s3165_s4 = inlined_call_operand.vmem [shape: f32[1,512], index: 4, kind: input, shape index: {}]   ;;  %s3166_s5 = inlined_call_operand.vmem [shape: bf16[32,512], index: 5, kind: input, shape index: {}]   ;;  %s3167_s6 = inlined_call_operand.vmem [shape: f32[1,512], index: 6, kind: input, shape index: {}]   ;;  %s3168_s7 = inlined_call_operand.vmem [shape: f32[8,256], index: 7, kind: output, shape index: {}]  }
   0x1   :  { %s13_s26 = sshll.u32 %s3161_s0, 4  ;;  %s14_s26 = int_to_ptr.vmem [resolvable:$true] %s13_s26 }
   0x2   :  { %16 = dma.vmem_to_smem %s14_s26, 16, %s2390_s27, [#allocation5] }
   0x3   :  { %2372 = dma.done.wait [#allocation5], 16 }
   0x4   :  { %2373 = vsyncadd [#allocation5], 4294967280 }
   0x5   :  { %19 = sfence }
   0x6   :  { %20 = vsyncpa [#allocation8], 0  ;;  %s27_s30 = sshll.u32 %s3164_s3, 4  ;;  %s2391_s8 = smov [#allocation7]   ;;  %s28_s30 = int_to_ptr.hbm [resolvable:$true] %s27_s30 }
   0x7   :  { %s29_s9 = sshll.u32 %s2391_s8, 4  ;;  %s2392_s10 = smov 256   ;;  %s30_s9 = int_to_ptr.vmem [resolvable:$true] %s29_s9 }
   0x8   :  { %s2393_s11 = smov 16  }
   0x9   :  { %35 = dma.hbm_to_vmem [thread:$0]  %s28_s30, 4096, %s30_s9, [#allocation8], %s2392_s10, %s2392_s10, %s2393_s11  }
   0xa   :  { %2374 = dma.done.wait [#allocation8], 4096  }
   0xb   :  { %2375 = vsyncadd [#allocation8], 4294963200  ;;  %s2378_s0 = smov 0  }
   0xc LB: > { %s2382_s12 = smov 0   ;;  %s2380_s0 = sphi %s2378_s0, %s53_s0  }
   0xd LB: >> { %s1919_s13 = sshll.u32 %s2380_s0, 3  ;;  %s2384_s12 = sphi %s2382_s12, %s59_s12  }
   0xe   : >> { %s62_s14 = sadd.s32 %s2384_s12, %s1919_s13 }
   0xf   : >> { %s63_s3 = sld [smem:[#allocation6 + %s62_s14]]  ;;  %s66_s18 = scalar_lea.vmem [#allocation2], %s62_s14 }
  0x15   : >> { %s65_s17 = scalar_lea.vmem %s3162_s1, %s63_s3 }
  0x16   : >> { %v81_v0 = vld [vmem:[%s65_s17] sm:$0x1] }
  0x17   : >> { %82 = vst [vmem:[%s66_s18] sm:$0x1] %v81_v0 }
  0x18   : >> { %100 = vsyncadd [#allocation4], 16  ;;  %s59_s12 = sadd.s32 1, %s2384_s12  }
  0x19   : >> { %p56_p0 = scmp.ge.s32.totalorder %s59_s12, 8  }
  0x1a   : > { %s53_s0 = sadd.s32 (%p56_p0), 1, %s2380_s0  }
  0x1b   : > { %58 = sbr.rel (!%p56_p0) target bundleno = 13 (0xd), region = 110  ;;  %p50_p1 = scmp.ge.s32.totalorder (%p56_p0), %s53_s0, 10  }
  0x20   :  { %52 = sbr.rel (!%p50_p1) target bundleno = 12 (0xc), region = 121  ;;  %s2386_s19 = smov (%p50_p1), 0  }
  0x25 LB: > { %2376 = dma.done.wait [#allocation4], 16  ;;  %s2388_s19 = sphi %s2386_s19, %s106_s19  }
  0x26   : > { %2377 = vsyncadd [#allocation4], 4294967280  ;;  %s106_s19 = sadd.s32 1, %s2388_s19  }
  0x27   : > { %p103_p2 = scmp.ge.s32.totalorder %s106_s19, 80  }
  0x28   :  { %v1938_v1 = vld [vmem:[%s3163_s2 + $0x20] sm:$0xf] (%p103_p2)  ;;  %v2143_v2 = vld [vmem:[%s3163_s2 + $0x2c] sm:$0xf0] (%p103_p2)  ;;  %v2141_v3 = vld [vmem:[%s3163_s2 + $0x24] sm:$0xf] (%p103_p2) }
  0x29   :  { %105 = sbr.rel (!%p103_p2) target bundleno = 37 (0x25), region = 132  ;;  %v1939_v4 = vor.u32 (%p103_p2), %v2143_v2, %v1938_v1  ;;  %v1940_v5 = vld [vmem:[%s3163_s2 + $0x30] sm:$0xf0] (%p103_p2)  ;;  %v1946_v6 = vld [vmem:[%s3163_s2 + $0x28] sm:$0xf] (%p103_p2)  ;;  %v110_v24 = vld [vmem:[#allocation2] sm:$0xff] (%p103_p2) }
  0x2a   :  { %v2144_v7 = vld [vmem:[%s3163_s2 + $0x34] sm:$0xf0] (%p103_p2)  ;;  %v1943_v8 = vor.u32 (%p103_p2), %v2141_v3, %v1940_v5  ;;  %v2142_v10 = vld [vmem:[%s3163_s2 + $0x2c] sm:$0xf] (%p103_p2)  ;;  %v1948_v11 = vld [vmem:[%s3163_s2 + $0x38] sm:$0xf0] (%p103_p2) }
  0x2b   :  { %v1947_v9 = vor.u32 (%p103_p2), %v2144_v7, %v1946_v6  ;;  %v1922_v12 = vld [vmem:[%s3163_s2] sm:$0xf] (%p103_p2)  ;;  %205 = vmatpush.bf16.msra.mxu0 (%p103_p2), %v1939_v4  ;;  %v1951_v13 = vor.u32 (%p103_p2), %v2142_v10, %v1948_v11  ;;  %v2139_v14 = vld [vmem:[%s3163_s2 + $0xc] sm:$0xf0] (%p103_p2)  ;;  %v2137_v15 = vld [vmem:[%s3163_s2 + $0x4] sm:$0xf] (%p103_p2) }
  0x2c   :  { %v1924_v16 = vld [vmem:[%s3163_s2 + $0x10] sm:$0xf0] (%p103_p2)  ;;  %239 = vmatpush.bf16.msra.mxu1 (%p103_p2), %v1943_v8  ;;  %v1923_v17 = vor.u32 (%p103_p2), %v2139_v14, %v1922_v12  ;;  %v1930_v19 = vld [vmem:[%s3163_s2 + $0x8] sm:$0xf] (%p103_p2)  ;;  %v2140_v20 = vld [vmem:[%s3163_s2 + $0x14] sm:$0xf0] (%p103_p2) }
  0x2d   :  { %273 = vmatpush.bf16.msra.mxu2 (%p103_p2), %v1947_v9  ;;  %v1927_v18 = vor.u32 (%p103_p2), %v2137_v15, %v1924_v16  ;;  %v2138_v21 = vld [vmem:[%s3163_s2 + $0xc] sm:$0xf] (%p103_p2)  ;;  %307 = vmatpush.bf16.msra.mxu3 (%p103_p2), %v1951_v13  ;;  %v1931_v22 = vor.u32 (%p103_p2), %v2140_v20, %v1930_v19  ;;  %v1932_v23 = vld [vmem:[%s3163_s2 + $0x18] sm:$0xf0] (%p103_p2)  ;;  %vm183_vm0 = vcmask (%p103_p2), 261120   ;;  %v112_v3 = vld [vmem:[#allocation2 + $0x10] sm:$0xff] (%p103_p2) }
  0x2e   :  { %v111_v25 = vld [vmem:[#allocation2 + $0x8] sm:$0xff]  ;;  %v1935_v26 = vor.u32 %v2138_v21, %v1932_v23  ;;  %v2086_v28 = vld [vmem:[#allocation7 + $0xe0] sm:$0xf]  ;;  %v2175_v29 = vld [vmem:[#allocation7 + $0xec] sm:$0xf0] }
  0x2f   :  { %v120_v27 = vpack.c.bf16 %v111_v25, %v110_v24  ;;  %v2173_v30 = vld [vmem:[#allocation7 + $0xe4] sm:$0xf]  ;;  %206 = vmatpush.bf16.msra.mxu0 %v1923_v17  ;;  %v2492_v31 = vor.u32 %v2175_v29, %v2086_v28  ;;  %v2088_v32 = vld [vmem:[#allocation7 + $0xf0] sm:$0xf0]  ;;  %v2070_v33 = vld [vmem:[#allocation7 + $0xc0] sm:$0xf] }
  0x30   :  { %v2171_v34 = vld [vmem:[#allocation7 + $0xcc] sm:$0xf0]  ;;  %240 = vmatpush.bf16.msra.mxu1 %v1927_v18  ;;  %v2494_v35 = vor.u32 %v2173_v30, %v2088_v32  ;;  %v2169_v36 = vld [vmem:[#allocation7 + $0xc4] sm:$0xf]  ;;  %v2072_v37 = vld [vmem:[#allocation7 + $0xd0] sm:$0xf0] }
  0x31   :  { %274 = vmatpush.bf16.msra.mxu2 %v1931_v22  ;;  %v2094_v38 = vld [vmem:[#allocation7 + $0xe8] sm:$0xf]  ;;  %308 = vmatpush.bf16.msra.mxu3 %v1935_v26  ;;  %v2497_v39 = vor.u32 %v2171_v34, %v2070_v33  ;;  %v2176_v40 = vld [vmem:[#allocation7 + $0xf4] sm:$0xf0]  ;;  %v2174_v41 = vld [vmem:[#allocation7 + $0xec] sm:$0xf]  ;;  %v2501_v43 = vor.u32 %v2169_v36, %v2072_v37 }
  0x32   :  { %v2096_v42 = vld [vmem:[#allocation7 + $0xf8] sm:$0xf0]  ;;  %1952 = vmatmul.msk.bf16.vlgmr.msra.gmra.mxu0 %vm183_vm0, %v120_v27  ;;  %v2503_v44 = vor.u32 %v2176_v40, %v2094_v38  ;;  %v2054_v46 = vld [vmem:[#allocation7 + $0xa0] sm:$0xf]  ;;  %v2167_v47 = vld [vmem:[#allocation7 + $0xac] sm:$0xf0] }
  0x33   :  { %571 = vmatpush.bf16.msrb.mxu0 %v2492_v31  ;;  %v2505_v45 = vor.u32 %v2174_v41, %v2096_v42  ;;  %1957 = vmatmul.msk.bf16.vlgmr.msra.gmra.mxu1 %vm183_vm0, %v120_v27  ;;  %v2165_v48 = vld [vmem:[#allocation7 + $0xa4] sm:$0xf]  ;;  %v2056_v49 = vld [vmem:[#allocation7 + $0xb0] sm:$0xf0]  ;;  %v2078_v50 = vld [vmem:[#allocation7 + $0xc8] sm:$0xf]  ;;  %v2513_v53 = vor.u32 %v2167_v47, %v2054_v46 }
  0x34   :  { %584 = vmatpush.bf16.msrb.mxu1 %v2494_v35  ;;  %1962 = vmatmul.msk.bf16.vlgmr.msra.gmra.mxu2 %vm183_vm0, %v120_v27  ;;  %v2172_v51 = vld [vmem:[#allocation7 + $0xd4] sm:$0xf0]  ;;  %v2170_v52 = vld [vmem:[#allocation7 + $0xcc] sm:$0xf]  ;;  %v2080_v55 = vld [vmem:[#allocation7 + $0xd8] sm:$0xf0]  ;;  %v2518_v58 = vor.u32 %v2165_v48, %v2056_v49 }
  0x35   :  { %1967 = vmatmul.msk.bf16.vlgmr.msra.gmra.mxu3 %vm183_vm0, %v120_v27  ;;  %597 = vmatpush.bf16.msrb.mxu2 %v2503_v44  ;;  %v2515_v54 = vor.u32 %v2172_v51, %v2078_v50  ;;  %v2038_v56 = vld [vmem:[#allocation7 + $0x80] sm:$0xf]  ;;  %v2163_v57 = vld [vmem:[#allocation7 + $0x8c] sm:$0xf0]  ;;  %v2520_v59 = vor.u32 %v2170_v52, %v2080_v55  ;;  %v2161_v60 = vld [vmem:[#allocation7 + $0x84] sm:$0xf] }
  0x36   :  { %610 = vmatpush.bf16.msrb.mxu3 %v2505_v45  ;;  %v2040_v61 = vld [vmem:[#allocation7 + $0x90] sm:$0xf0]  ;;  %v2062_v62 = vld [vmem:[#allocation7 + $0xa8] sm:$0xf]  ;;  %v2168_v63 = vld [vmem:[#allocation7 + $0xb4] sm:$0xf0]  ;;  %v2527_v5 = vor.u32 %v2163_v57, %v2038_v56 }
  0x37   :  { %572 = vmatpush.bf16.msrb.mxu0 %v2497_v39  ;;  %v2166_v0 = vld [vmem:[#allocation7 + $0xac] sm:$0xf]  ;;  %v2064_v1 = vld [vmem:[#allocation7 + $0xb8] sm:$0xf0]  ;;  %v2523_v2 = vor.u32 %v2168_v63, %v2062_v62  ;;  %v2022_v7 = vld [vmem:[#allocation7 + $0x60] sm:$0xf]  ;;  %v2532_v9 = vor.u32 %v2161_v60, %v2040_v61 }
  0x38   :  { %585 = vmatpush.bf16.msrb.mxu1 %v2501_v43  ;;  %v113_v4 = vld [vmem:[#allocation2 + $0x18] sm:$0xff]  ;;  %v2529_v6 = vor.u32 %v2166_v0, %v2064_v1  ;;  %v2159_v8 = vld [vmem:[#allocation7 + $0x6c] sm:$0xf0]  ;;  %v2164_v11 = vld [vmem:[#allocation7 + $0x94] sm:$0xf0] }
  0x39   :  { %598 = vmatpush.bf16.msrb.mxu2 %v2515_v54  ;;  %v2046_v10 = vld [vmem:[#allocation7 + $0x88] sm:$0xf]  ;;  %v2162_v12 = vld [vmem:[#allocation7 + $0x8c] sm:$0xf]  ;;  %v2157_v13 = vld [vmem:[#allocation7 + $0x64] sm:$0xf]  ;;  %v2539_v17 = vor.u32 %v2159_v8, %v2022_v7  ;;  %v121_v19 = vpack.c.bf16 %v113_v4, %v112_v3 }
  0x3a   :  { %611 = vmatpush.bf16.msrb.mxu3 %v2520_v59  ;;  %v2024_v14 = vld [vmem:[#allocation7 + $0x70] sm:$0xf0]  ;;  %v2048_v15 = vld [vmem:[#allocation7 + $0x98] sm:$0xf0]  ;;  %v2535_v16 = vor.u32 %v2164_v11, %v2046_v10  ;;  %v2006_v21 = vld [vmem:[#allocation7 + $0x40] sm:$0xf] }
  0x3b   :  { %573 = vmatpush.bf16.msrb.mxu0 %v2513_v53  ;;  %v2541_v18 = vor.u32 %v2162_v12, %v2048_v15  ;;  %v2544_v20 = vor.u32 %v2157_v13, %v2024_v14  ;;  %v2155_v22 = vld [vmem:[#allocation7 + $0x4c] sm:$0xf0]  ;;  %v2153_v23 = vld [vmem:[#allocation7 + $0x44] sm:$0xf]  ;;  %v2008_v25 = vld [vmem:[#allocation7 + $0x50] sm:$0xf0] }
  0x3c   :  { %586 = vmatpush.bf16.msrb.mxu1 %v2518_v58  ;;  %v2554_v24 = vor.u32 %v2155_v22, %v2006_v21  ;;  %v2030_v26 = vld [vmem:[#allocation7 + $0x68] sm:$0xf]  ;;  %v2160_v27 = vld [vmem:[#allocation7 + $0x74] sm:$0xf0]  ;;  %v2556_v28 = vor.u32 %v2153_v23, %v2008_v25  ;;  %v2158_v30 = vld [vmem:[#allocation7 + $0x6c] sm:$0xf] }
  0x3d   :  { %599 = vmatpush.bf16.msrb.mxu2 %v2523_v2  ;;  %v2558_v29 = vor.u32 %v2160_v27, %v2030_v26  ;;  %v2032_v32 = vld [vmem:[#allocation7 + $0x78] sm:$0xf0]  ;;  %v1990_v33 = vld [vmem:[#allocation7 + $0x20] sm:$0xf]  ;;  %v2151_v36 = vld [vmem:[#allocation7 + $0x2c] sm:$0xf0] }
  0x3e   :  { %612 = vmatpush.bf16.msrb.mxu3 %v2529_v6  ;;  %v2561_v34 = vor.u32 %v2158_v30, %v2032_v32  ;;  %v2149_v37 = vld [vmem:[#allocation7 + $0x24] sm:$0xf]  ;;  %v1992_v38 = vld [vmem:[#allocation7 + $0x30] sm:$0xf0]  ;;  %v2565_v40 = vor.u32 %v2151_v36, %v1990_v33  ;;  %v2014_v42 = vld [vmem:[#allocation7 + $0x48] sm:$0xf] }
  0x3f   :  { %574 = vmatpush.bf16.msrb.mxu0 %v2527_v5  ;;  %v2567_v41 = vor.u32 %v2149_v37, %v1992_v38  ;;  %v2156_v46 = vld [vmem:[#allocation7 + $0x54] sm:$0xf0]  ;;  %v2154_v47 = vld [vmem:[#allocation7 + $0x4c] sm:$0xf]  ;;  %v2016_v49 = vld [vmem:[#allocation7 + $0x58] sm:$0xf0] }
  0x40   :  { %587 = vmatpush.bf16.msrb.mxu1 %v2532_v9  ;;  %v2570_v48 = vor.u32 %v2156_v46, %v2014_v42  ;;  %v2572_v50 = vor.u32 %v2154_v47, %v2016_v49  ;;  %v114_v51 = vld [vmem:[#allocation2 + $0x20] sm:$0xff]  ;;  %v115_v52 = vld [vmem:[#allocation2 + $0x28] sm:$0xff]  ;;  %v1974_v56 = vld [vmem:[#allocation7] sm:$0xf]  ;;  %v2394_v27 = vmov 0  }
  0x41   :  { %600 = vmatpush.bf16.msrb.mxu2 %v2535_v16  ;;  %v122_v55 = vpack.c.bf16 %v115_v52, %v114_v51  ;;  %v2147_v57 = vld [vmem:[#allocation7 + $0xc] sm:$0xf0]  ;;  %v2145_v60 = vld [vmem:[#allocation7 + $0x4] sm:$0xf]  ;;  %v1976_v62 = vld [vmem:[#allocation7 + $0x10] sm:$0xf0] }
  0x42   :  { %613 = vmatpush.bf16.msrb.mxu3 %v2541_v18  ;;  %1953 = vmatmul.msk.bf16.gmra.mxu0 %vm183_vm0, %v121_v19  ;;  %v2582_v61 = vor.u32 %v2147_v57, %v1974_v56  ;;  %v1998_v63 = vld [vmem:[#allocation7 + $0x28] sm:$0xf]  ;;  %v2152_v0 = vld [vmem:[#allocation7 + $0x34] sm:$0xf0]  ;;  %v2584_v1 = vor.u32 %v2145_v60, %v1976_v62  ;;  %v2150_v4 = vld [vmem:[#allocation7 + $0x2c] sm:$0xf] }
  0x43   :  { %575 = vmatpush.bf16.msrb.mxu0 %v2539_v17  ;;  %1958 = vmatmul.msk.bf16.gmra.mxu1 %vm183_vm0, %v121_v19  ;;  %v2586_v3 = vor.u32 %v2152_v0, %v1998_v63  ;;  %v2000_v7 = vld [vmem:[#allocation7 + $0x38] sm:$0xf0]  ;;  %v1982_v8 = vld [vmem:[#allocation7 + $0x8] sm:$0xf]  ;;  %v2148_v11 = vld [vmem:[#allocation7 + $0x14] sm:$0xf0] }
  0x44   :  { %588 = vmatpush.bf16.msrb.mxu1 %v2544_v20  ;;  %1963 = vmatmul.msk.bf16.gmra.mxu2 %vm183_vm0, %v121_v19  ;;  %v2589_v10 = vor.u32 %v2150_v4, %v2000_v7  ;;  %v2146_v12 = vld [vmem:[#allocation7 + $0xc] sm:$0xf]  ;;  %v1984_v13 = vld [vmem:[#allocation7 + $0x18] sm:$0xf0]  ;;  %v2593_v14 = vor.u32 %v2148_v11, %v1982_v8  ;;  %v118_v23 = vld [vmem:[#allocation2 + $0x40] sm:$0xff] }
  0x45   :  { %1968 = vmatmul.msk.bf16.gmra.mxu3 %vm183_vm0, %v121_v19  ;;  %601 = vmatpush.bf16.msrb.mxu2 %v2558_v29  ;;  %v2596_v15 = vor.u32 %v2146_v12, %v1984_v13  ;;  %v116_v19 = vld [vmem:[#allocation2 + $0x30] sm:$0xff]  ;;  %v117_v21 = vld [vmem:[#allocation2 + $0x38] sm:$0xff]  ;;  %v119_v25 = vld [vmem:[#allocation2 + $0x48] sm:$0xff] }
  0x46   :  { %614 = vmatpush.bf16.msrb.mxu3 %v2561_v34  ;;  %v123_v22 = vpack.c.bf16 %v117_v21, %v116_v19  ;;  %v124_v26 = vpack.c.bf16 %v119_v25, %v118_v23 }
  0x47   :  { %576 = vmatpush.bf16.msrb.mxu0 %v2554_v24 }
  0x48   :  { %589 = vmatpush.bf16.msrb.mxu1 %v2556_v28 }
  0x49   :  { %602 = vmatpush.bf16.msrb.mxu2 %v2570_v48 }
  0x4a   :  { %615 = vmatpush.bf16.msrb.mxu3 %v2572_v50 }
  0x4b   :  { %577 = vmatpush.bf16.msrb.mxu0 %v2565_v40 }
  0x4c   :  { %590 = vmatpush.bf16.msrb.mxu1 %v2567_v41 }
  0x4d   :  { %603 = vmatpush.bf16.msrb.mxu2 %v2586_v3 }
  0x4e   :  { %616 = vmatpush.bf16.msrb.mxu3 %v2589_v10 }
  0x4f   :  { %578 = vmatpush.bf16.msrb.mxu0 %v2582_v61 }
  0x50   :  { %591 = vmatpush.bf16.msrb.mxu1 %v2584_v1 }
  0x51   :  { %604 = vmatpush.bf16.msrb.mxu2 %v2593_v14 }
  0x52   :  { %1954 = vmatmul.msk.bf16.gmra.mxu0 %vm183_vm0, %v122_v55  ;;  %617 = vmatpush.bf16.msrb.mxu3 %v2596_v15 }
  0x53   :  { %1959 = vmatmul.msk.bf16.gmra.mxu1 %vm183_vm0, %v122_v55  ;;  %686 = vmatpush.bf16.msra.mxu0 %v2492_v31 }
  0x54   :  { %1964 = vmatmul.msk.bf16.gmra.mxu2 %vm183_vm0, %v122_v55  ;;  %699 = vmatpush.bf16.msra.mxu1 %v2494_v35 }
  0x55   :  { %1969 = vmatmul.msk.bf16.gmra.mxu3 %vm183_vm0, %v122_v55  ;;  %712 = vmatpush.bf16.msra.mxu2 %v2503_v44 }
  0x56   :  { %725 = vmatpush.bf16.msra.mxu3 %v2505_v45 }
  0x57   :  { %687 = vmatpush.bf16.msra.mxu0 %v2497_v39 }
  0x58   :  { %700 = vmatpush.bf16.msra.mxu1 %v2501_v43 }
  0x59   :  { %713 = vmatpush.bf16.msra.mxu2 %v2515_v54 }
  0x5a   :  { %726 = vmatpush.bf16.msra.mxu3 %v2520_v59 }
  0x5b   :  { %688 = vmatpush.bf16.msra.mxu0 %v2513_v53 }
  0x5c   :  { %701 = vmatpush.bf16.msra.mxu1 %v2518_v58 }
  0x5d   :  { %714 = vmatpush.bf16.msra.mxu2 %v2523_v2 }
  0x5e   :  { %727 = vmatpush.bf16.msra.mxu3 %v2529_v6 }
  0x5f   :  { %689 = vmatpush.bf16.msra.mxu0 %v2527_v5 }
  0x60   :  { %702 = vmatpush.bf16.msra.mxu1 %v2532_v9 }
  0x61   :  { %715 = vmatpush.bf16.msra.mxu2 %v2535_v16 }
  0x62   :  { %1955 = vmatmul.msk.bf16.gmra.mxu0 %vm183_vm0, %v123_v22  ;;  %728 = vmatpush.bf16.msra.mxu3 %v2541_v18 }
  0x63   :  { %1960 = vmatmul.msk.bf16.gmra.mxu1 %vm183_vm0, %v123_v22  ;;  %690 = vmatpush.bf16.msra.mxu0 %v2539_v17 }
  0x64   :  { %1965 = vmatmul.msk.bf16.gmra.mxu2 %vm183_vm0, %v123_v22  ;;  %703 = vmatpush.bf16.msra.mxu1 %v2544_v20 }
  0x65   :  { %1970 = vmatmul.msk.bf16.gmra.mxu3 %vm183_vm0, %v123_v22  ;;  %716 = vmatpush.bf16.msra.mxu2 %v2558_v29 }
  0x66   :  { %729 = vmatpush.bf16.msra.mxu3 %v2561_v34 }
  0x67   :  { %691 = vmatpush.bf16.msra.mxu0 %v2554_v24 }
  0x68   :  { %704 = vmatpush.bf16.msra.mxu1 %v2556_v28 }
  0x69   :  { %717 = vmatpush.bf16.msra.mxu2 %v2570_v48 }
  0x6a   :  { %730 = vmatpush.bf16.msra.mxu3 %v2572_v50 }
  0x6b   :  { %692 = vmatpush.bf16.msra.mxu0 %v2565_v40 }
  0x6c   :  { %705 = vmatpush.bf16.msra.mxu1 %v2567_v41 }
  0x6d   :  { %718 = vmatpush.bf16.msra.mxu2 %v2586_v3 }
  0x6e   :  { %731 = vmatpush.bf16.msra.mxu3 %v2589_v10 }
  0x6f   :  { %693 = vmatpush.bf16.msra.mxu0 %v2582_v61 }
  0x70   :  { %706 = vmatpush.bf16.msra.mxu1 %v2584_v1 }
  0x71   :  { %719 = vmatpush.bf16.msra.mxu2 %v2593_v14 }
  0x72   :  { %1956 = vmatmul.msk.bf16.gmra.mxu0 %vm183_vm0, %v124_v26  ;;  %732 = vmatpush.bf16.msra.mxu3 %v2596_v15 }
  0x73   :  { %1961 = vmatmul.msk.bf16.gmra.mxu1 %vm183_vm0, %v124_v26 }
  0x74   :  { %1966 = vmatmul.msk.bf16.gmra.mxu2 %vm183_vm0, %v124_v26 }
  0x75   :  { %1971 = vmatmul.msk.bf16.gmra.mxu3 %vm183_vm0, %v124_v26 }
  0x82   :  { %579 = vmatmul.bf16.vlgmr.msrb.gmra.mxu0 %v2394_v27 }
  0x83   :  { %592 = vmatmul.bf16.vlgmr.msrb.gmra.mxu1 %v2394_v27  ;;  %801 = vmatpush.bf16.msrb.mxu0 %v2492_v31 }
  0x84   :  { %605 = vmatmul.bf16.vlgmr.msrb.gmra.mxu2 %v2394_v27  ;;  %814 = vmatpush.bf16.msrb.mxu1 %v2494_v35 }
  0x85   :  { %618 = vmatmul.bf16.vlgmr.msrb.gmra.mxu3 %v2394_v27  ;;  %827 = vmatpush.bf16.msrb.mxu2 %v2503_v44 }
  0x86   :  { %840 = vmatpush.bf16.msrb.mxu3 %v2505_v45 }
  0x87   :  { %802 = vmatpush.bf16.msrb.mxu0 %v2497_v39 }
  0x88   :  { %815 = vmatpush.bf16.msrb.mxu1 %v2501_v43 }
  0x89   :  { %828 = vmatpush.bf16.msrb.mxu2 %v2515_v54 }
  0x8a   :  { %841 = vmatpush.bf16.msrb.mxu3 %v2520_v59 }
  0x8b   :  { %803 = vmatpush.bf16.msrb.mxu0 %v2513_v53 }
  0x8c   :  { %816 = vmatpush.bf16.msrb.mxu1 %v2518_v58 }
  0x8d   :  { %829 = vmatpush.bf16.msrb.mxu2 %v2523_v2 }
  0x8e   :  { %842 = vmatpush.bf16.msrb.mxu3 %v2529_v6 }
  0x8f   :  { %804 = vmatpush.bf16.msrb.mxu0 %v2527_v5 }
  0x90   :  { %817 = vmatpush.bf16.msrb.mxu1 %v2532_v9 }
  0x91   :  { %830 = vmatpush.bf16.msrb.mxu2 %v2535_v16 }
  0x92   :  { %843 = vmatpush.bf16.msrb.mxu3 %v2541_v18 }
  0x93   :  { %805 = vmatpush.bf16.msrb.mxu0 %v2539_v17 }
  0x94   :  { %818 = vmatpush.bf16.msrb.mxu1 %v2544_v20 }
  0x95   :  { %831 = vmatpush.bf16.msrb.mxu2 %v2558_v29 }
  0x96   :  { %844 = vmatpush.bf16.msrb.mxu3 %v2561_v34 }
  0x97   :  { %806 = vmatpush.bf16.msrb.mxu0 %v2554_v24 }
  0x98   :  { %819 = vmatpush.bf16.msrb.mxu1 %v2556_v28 }
  0x99   :  { %832 = vmatpush.bf16.msrb.mxu2 %v2570_v48 }
  0x9a   :  { %845 = vmatpush.bf16.msrb.mxu3 %v2572_v50 }
  0x9b   :  { %807 = vmatpush.bf16.msrb.mxu0 %v2565_v40 }
  0x9c   :  { %820 = vmatpush.bf16.msrb.mxu1 %v2567_v41 }
  0x9d   :  { %833 = vmatpush.bf16.msrb.mxu2 %v2586_v3 }
  0x9e   :  { %846 = vmatpush.bf16.msrb.mxu3 %v2589_v10 }
  0x9f   :  { %808 = vmatpush.bf16.msrb.mxu0 %v2582_v61 }
  0xa0   :  { %821 = vmatpush.bf16.msrb.mxu1 %v2584_v1 }
  0xa1   :  { %834 = vmatpush.bf16.msrb.mxu2 %v2593_v14 }
  0xa2   :  { %847 = vmatpush.bf16.msrb.mxu3 %v2596_v15 }
  0xaf   :  { %v208_v30 = vpop.f32.mrf.mxu0 }
  0xb0   :  { %v242_v32 = vpop.f32.mrf.mxu1 }
  0xb7   :  { %v276_v33 = vpop.f32.mrf.mxu2  ;;  %v2672_v37 = vpop.f32.mrf.mxu0 }
  0xb8   :  { %v310_v36 = vpop.f32.mrf.mxu3  ;;  %v2674_v38 = vpop.f32.mrf.mxu1 }
  0xbf   :  { %v2676_v42 = vpop.f32.mrf.mxu2  ;;  %v2680_v47 = vpop.f32.mrf.mxu0 }
  0xc0   :  { %v2678_v46 = vpop.f32.mrf.mxu3  ;;  %v2682_v49 = vpop.f32.mrf.mxu1 }
  0xc1   :  { %3169 = vst [vmem:[#allocation13_spill] sm:$0xff] %v2682_v49 }
  0xc7   :  { %v2684_v51 = vpop.f32.mrf.mxu2  ;;  %v2688_v55 = vpop.f32.mrf.mxu0 }
  0xc8   :  { %3170 = vst [vmem:[#allocation14_spill] sm:$0xff] %v2684_v51  ;;  %v2686_v52 = vpop.f32.mrf.mxu3  ;;  %v2690_v56 = vpop.f32.mrf.mxu1 }
  0xc9   :  { %3171 = vst [vmem:[#allocation15_spill] sm:$0xff] %v2686_v52 }
  0xca   :  { %3172 = vst [vmem:[#allocation16_spill] sm:$0xff] %v2688_v55 }
  0xcb   :  { %3173 = vst [vmem:[#allocation17_spill] sm:$0xff] %v2690_v56 }
  0xcf   :  { %v2692_v57 = vpop.f32.mrf.mxu2  ;;  %v2696_v62 = vpop.f32.mrf.mxu0 }
  0xd0   :  { %3174 = vst [vmem:[#allocation18_spill] sm:$0xff] %v2692_v57  ;;  %v2694_v60 = vpop.f32.mrf.mxu3  ;;  %v2698_v63 = vpop.f32.mrf.mxu1 }
  0xd1   :  { %3175 = vst [vmem:[#allocation19_spill] sm:$0xff] %v2694_v60 }
  0xd2   :  { %3176 = vst [vmem:[#allocation20_spill] sm:$0xff] %v2696_v62 }
  0xd3   :  { %3177 = vst [vmem:[#allocation21_spill] sm:$0xff] %v2698_v63 }
  0xd7   :  { %v2700_v0 = vpop.f32.mrf.mxu2  ;;  %v2704_v7 = vpop.f32.mrf.mxu0 }
  0xd8   :  { %3178 = vst [vmem:[#allocation22_spill] sm:$0xff] %v2700_v0  ;;  %v2702_v4 = vpop.f32.mrf.mxu3  ;;  %v2706_v8 = vpop.f32.mrf.mxu1 }
  0xd9   :  { %3179 = vst [vmem:[#allocation23_spill] sm:$0xff] %v2702_v4 }
  0xda   :  { %3180 = vst [vmem:[#allocation24_spill] sm:$0xff] %v2704_v7 }
  0xdb   :  { %3181 = vst [vmem:[#allocation25_spill] sm:$0xff] %v2706_v8 }
  0xdf   :  { %v2708_v11 = vpop.f32.mrf.mxu2  ;;  %v2712_v13 = vpop.f32.mrf.mxu0 }
  0xe0   :  { %3182 = vst [vmem:[#allocation26_spill] sm:$0xff] %v2708_v11  ;;  %v2710_v12 = vpop.f32.mrf.mxu3  ;;  %v2714_v19 = vpop.f32.mrf.mxu1 }
  0xe1   :  { %3183 = vst [vmem:[#allocation27_spill] sm:$0xff] %v2710_v12 }
  0xe2   :  { %3184 = vst [vmem:[#allocation28_spill] sm:$0xff] %v2712_v13 }
  0xe3   :  { %3185 = vst [vmem:[#allocation29_spill] sm:$0xff] %v2714_v19 }
  0xe7   :  { %v2716_v21 = vpop.f32.mrf.mxu2  ;;  %v2720_v23 = vpop.f32.mrf.mxu0 }
  0xe8   :  { %3186 = vst [vmem:[#allocation30_spill] sm:$0xff] %v2716_v21  ;;  %v2718_v22 = vpop.f32.mrf.mxu3  ;;  %v2722_v25 = vpop.f32.mrf.mxu1  ;;  %v133_v21 = vld [vmem:[%s3165_s4] sm:$0xf] }
  0xe9   :  { %3187 = vst [vmem:[#allocation31_spill] sm:$0xff] %v2718_v22  ;;  %v2755_v0 = vperm.slane %v133_v21, 3 }
  0xea   :  { %3188 = vst [vmem:[#allocation32_spill] sm:$0xff] %v2720_v23 }
  0xeb   :  { %3189 = vst [vmem:[#allocation33_spill] sm:$0xff] %v2722_v25  ;;  %v2743_v25 = vperm.slane %v133_v21, 0 }
  0xef   :  { %v2724_v26 = vpop.f32.mrf.mxu2  ;;  %v2728_v8 = vpop.f32.mrf.mxu0 }
  0xf0   :  { %3190 = vst [vmem:[#allocation34_spill] sm:$0xff] %v2724_v26  ;;  %v2726_v27 = vpop.f32.mrf.mxu3  ;;  %v2730_v11 = vpop.f32.mrf.mxu1  ;;  %v2745_v26 = vperm.slane %v133_v21, 1 }
  0xf1   :  { %3191 = vst [vmem:[#allocation35_spill] sm:$0xff] %v2726_v27 }
  0xf2   :  { %3192 = vst [vmem:[#allocation36_spill] sm:$0xff] %v2728_v8  ;;  %v209_v8 = vadd.f32 %v208_v30, %v2743_v25  ;;  %v311_v30 = vadd.f32 %v310_v36, %v2755_v0 }
  0xf3   :  { %3193 = vst [vmem:[#allocation37_spill] sm:$0xff] %v2730_v11 }
  0xf7   :  { %v2732_v12 = vpop.f32.mrf.mxu2  ;;  %v2739_v22 = vpop.f32.mrf.mxu0 }
  0xf8   :  { %3194 = vst [vmem:[#allocation38_spill] sm:$0xff] %v2732_v12  ;;  %v2737_v19 = vpop.f32.mrf.mxu3  ;;  %v2741_v23 = vpop.f32.mrf.mxu1  ;;  %v243_v12 = vadd.f32 %v242_v32, %v2745_v26 }
  0xf9   :  { %3195 = vst [vmem:[#allocation39_spill] sm:$0xff] %v2737_v19  ;;  %v2753_v19 = vperm.slane %v133_v21, 2 }
  0xfa   :  { %3196 = vst [vmem:[#allocation40_spill] sm:$0xff] %v2739_v22 }
  0xfb   :  { %3197 = vst [vmem:[#allocation41_spill] sm:$0xff] %v2741_v23  ;;  %v277_v63 = vadd.f32 %v276_v33, %v2753_v19 }
  0xff   :  { %v2748_v27 = vpop.f32.mrf.mxu2  ;;  %v580_v13 = vpop.f32.mrf.mxu0 }
 0x100   :  { %3198 = vst [vmem:[#allocation42_spill] sm:$0xff] %v2748_v27  ;;  %v2751_v11 = vpop.f32.mrf.mxu3  ;;  %v623_v7 = vadd.f32 %v580_v13, %v209_v8  ;;  %v593_v4 = vpop.f32.mrf.mxu1 }
 0x101   :  { %3199 = vst [vmem:[#allocation43_spill] sm:$0xff] %v2751_v11  ;;  %v624_v22 = vadd.f32 %v593_v4, %v243_v12 }
 0x103   :  { %v627_v23 = vpack.c.bf16 %v624_v22, %v623_v7 }
 0x105   :  { %v629_v62 = vunpack.c.l.bf16 %v627_v23  ;;  %v630_v60 = vunpack.c.h.bf16 %v627_v23 }
 0x107   :  { %v606_v27 = vpop.f32.mrf.mxu2  ;;  %v632_v57 = vmul.f32 0.5, %v629_v62  ;;  %v633_v32 = vmul.f32 0.5, %v630_v60  ;;  %v582_v55 = vpop.f32.mrf.mxu0 }
 0x108   :  { %v625_v56 = vadd.f32 %v606_v27, %v277_v63  ;;  %v619_v11 = vpop.f32.mrf.mxu3  ;;  %v595_v13 = vpop.f32.mrf.mxu1 }
 0x109   :  { %v626_v8 = vadd.f32 %v619_v11, %v311_v30  ;;  %v635_v52 = vpack.c.bf16 %v633_v32, %v632_v57 }
 0x10b   :  { %v628_v51 = vpack.c.bf16 %v626_v8, %v625_v56  ;;  %v637_v4 = vunpack.c.l.bf16 %v635_v52  ;;  %v638_v12 = vunpack.c.h.bf16 %v635_v52 }
 0x10d   :  { %v631_v21 = vunpack.c.l.bf16 %v628_v51  ;;  %2214 = vtanh.f32 %v637_v4  ;;  %v665_v7 = vrot.slane %v628_v51, 4 }
 0x10e   :  { %2216 = vtanh.f32 %v638_v12 }
 0x10f   :  { %v634_v33 = vmul.f32 0.5, %v631_v21  ;;  %v608_v22 = vpop.f32.mrf.mxu2  ;;  %v667_v62 = vunpack.c.l.bf16 %v665_v7 }
 0x110   :  { %v621_v23 = vpop.f32.mrf.mxu3 }
 0x111   :  { %v636_v36 = vpack.c.bf16 %v634_v33, %v634_v33 }
 0x113   :  { %v639_v49 = vunpack.c.l.bf16 %v636_v36  ;;  %v2215_v60 = vpop.eup %2214 }
 0x114   :  { %v2217_v63 = vpop.eup %2216 }
 0x115   :  { %2218 = vtanh.f32 %v639_v49  ;;  %v643_v55 = vpack.c.bf16 %v2217_v63, %v2215_v60 }
 0x116   :  { %2220 = vtanh.f32 %v667_v62 }
 0x117   :  { %v645_v11 = vunpack.c.l.bf16 %v643_v55  ;;  %v646_v57 = vunpack.c.h.bf16 %v643_v55 }
 0x119   :  { %v648_v56 = vmul.f32 0.5, %v645_v11  ;;  %v649_v27 = vmul.f32 0.5, %v646_v57 }
 0x11b   :  { %v2219_v52 = vpop.eup %2218  ;;  %v651_v32 = vpack.c.bf16 %v649_v27, %v648_v56 }
 0x11c   :  { %v644_v30 = vpack.c.bf16 %v2219_v52, %v2219_v52  ;;  %v2221_v8 = vpop.eup %2220 }
 0x11d   :  { %v653_v13 = vunpack.c.l.bf16 %v651_v32  ;;  %v654_v51 = vunpack.c.h.bf16 %v651_v32  ;;  %v669_v33 = vpack.c.bf16 %v2221_v8, %v2221_v8 }
 0x11e   :  { %v647_v4 = vunpack.c.l.bf16 %v644_v30 }
 0x11f   :  { %v656_v12 = vadd.f32 0.5, %v653_v13  ;;  %v657_v21 = vadd.f32 0.5, %v654_v51  ;;  %v670_v36 = vunpack.c.l.bf16 %v669_v33 }
 0x120   :  { %v650_v22 = vmul.f32 0.5, %v647_v4 }
 0x121   :  { %v659_v7 = vpack.c.bf16 %v657_v21, %v656_v12  ;;  %v211_v12 = vadd.f32 %v2672_v37, %v2743_v25  ;;  %v245_v21 = vadd.f32 %v2674_v38, %v2745_v26 }
 0x122   :  { %v652_v63 = vpack.c.bf16 %v650_v22, %v650_v22 }
 0x123   :  { %v661_v23 = vunpack.c.l.bf16 %v659_v7  ;;  %v662_v49 = vunpack.c.h.bf16 %v659_v7 }
 0x124   :  { %v655_v57 = vunpack.c.l.bf16 %v652_v63  ;;  %v313_v63 = vadd.f32 %v2678_v46, %v2755_v0 }
 0x125   :  { %v671_v62 = vmul.f32 0.0, %v662_v49  ;;  %v672_v60 = vmul.f32 %v670_v36, %v661_v23 }
 0x126   :  { %v658_v27 = vadd.f32 0.5, %v655_v57 }
 0x127   :  { %v2759_v55 = vadd.f32 %v672_v60, %v671_v62  ;;  %v279_v60 = vadd.f32 %v2676_v42, %v2753_v19 }
 0x128   :  { %v660_v52 = vpack.c.bf16 %v658_v27, %v658_v27 }
 0x129   :  { %v674_v11 = vpack.c.bf16 %v2759_v55, %v2759_v55 }
 0x12a   :  { %v663_v8 = vunpack.c.l.bf16 %v660_v52 }
 0x12b   :  { %v675_v56 = vunpack.c.l.bf16 %v674_v11 }
 0x12d   :  { %2222 = vtanh.f32 %v675_v56 }
 0x133   :  { %v2223_v30 = vpop.eup %2222 }
 0x134   :  { %v677_v32 = vpack.c.bf16 %v2223_v30, %v2223_v30 }
 0x136   :  { %v678_v13 = vunpack.c.l.bf16 %v677_v32 }
 0x138   :  { %v679_v51 = vmul.f32 %v678_v13, %v663_v8 }
 0x13a   :  { %v685_v4 = vpack.c.bf16 %v679_v51, %v679_v51 }
 0x13c   :  { %694 = vmatmul.bf16.vlgmr.msra.gmra.mxu0 %v685_v4  ;;  %707 = vmatmul.bf16.vlgmr.msra.gmra.mxu1 %v685_v4 }
 0x13d   :  { %720 = vmatmul.bf16.vlgmr.msra.gmra.mxu2 %v685_v4  ;;  %733 = vmatmul.bf16.vlgmr.msra.gmra.mxu3 %v685_v4 }
 0x13e   :  { %916 = vmatpush.bf16.msra.mxu0 %v2492_v31  ;;  %929 = vmatpush.bf16.msra.mxu1 %v2494_v35 }
 0x13f   :  { %942 = vmatpush.bf16.msra.mxu2 %v2503_v44  ;;  %955 = vmatpush.bf16.msra.mxu3 %v2505_v45 }
 0x142   :  { %917 = vmatpush.bf16.msra.mxu0 %v2497_v39  ;;  %930 = vmatpush.bf16.msra.mxu1 %v2501_v43 }
 0x143   :  { %943 = vmatpush.bf16.msra.mxu2 %v2515_v54  ;;  %956 = vmatpush.bf16.msra.mxu3 %v2520_v59 }
 0x146   :  { %918 = vmatpush.bf16.msra.mxu0 %v2513_v53  ;;  %931 = vmatpush.bf16.msra.mxu1 %v2518_v58 }
 0x147   :  { %944 = vmatpush.bf16.msra.mxu2 %v2523_v2  ;;  %957 = vmatpush.bf16.msra.mxu3 %v2529_v6 }
 0x14a   :  { %919 = vmatpush.bf16.msra.mxu0 %v2527_v5  ;;  %932 = vmatpush.bf16.msra.mxu1 %v2532_v9 }
 0x14b   :  { %945 = vmatpush.bf16.msra.mxu2 %v2535_v16  ;;  %958 = vmatpush.bf16.msra.mxu3 %v2541_v18 }
 0x14e   :  { %920 = vmatpush.bf16.msra.mxu0 %v2539_v17  ;;  %933 = vmatpush.bf16.msra.mxu1 %v2544_v20 }
 0x14f   :  { %946 = vmatpush.bf16.msra.mxu2 %v2558_v29  ;;  %959 = vmatpush.bf16.msra.mxu3 %v2561_v34 }
 0x152   :  { %921 = vmatpush.bf16.msra.mxu0 %v2554_v24  ;;  %934 = vmatpush.bf16.msra.mxu1 %v2556_v28 }
 0x153   :  { %947 = vmatpush.bf16.msra.mxu2 %v2570_v48  ;;  %960 = vmatpush.bf16.msra.mxu3 %v2572_v50 }
 0x156   :  { %922 = vmatpush.bf16.msra.mxu0 %v2565_v40  ;;  %935 = vmatpush.bf16.msra.mxu1 %v2567_v41 }
 0x157   :  { %948 = vmatpush.bf16.msra.mxu2 %v2586_v3  ;;  %961 = vmatpush.bf16.msra.mxu3 %v2589_v10 }
 0x15a   :  { %923 = vmatpush.bf16.msra.mxu0 %v2582_v61  ;;  %936 = vmatpush.bf16.msra.mxu1 %v2584_v1 }
 0x15b   :  { %949 = vmatpush.bf16.msra.mxu2 %v2593_v14  ;;  %962 = vmatpush.bf16.msra.mxu3 %v2596_v15 }
 0x1b9   :  { %v695_v33 = vpop.f32.mrf.mxu0  ;;  %v708_v7 = vpop.f32.mrf.mxu1 }
 0x1ba   :  { %v738_v22 = vadd.f32 %v695_v33, %v211_v12  ;;  %v739_v23 = vadd.f32 %v708_v7, %v245_v21 }
 0x1bc   :  { %v742_v49 = vpack.c.bf16 %v739_v23, %v738_v22 }
 0x1be   :  { %v744_v36 = vunpack.c.l.bf16 %v742_v49  ;;  %v745_v62 = vunpack.c.h.bf16 %v742_v49 }
 0x1c0   :  { %v747_v11 = vmul.f32 0.5, %v744_v36  ;;  %v748_v57 = vmul.f32 0.5, %v745_v62  ;;  %v721_v56 = vpop.f32.mrf.mxu2  ;;  %v734_v37 = vpop.f32.mrf.mxu3 }
 0x1c1   :  { %v740_v27 = vadd.f32 %v721_v56, %v279_v60  ;;  %v741_v52 = vadd.f32 %v734_v37, %v313_v63  ;;  %v697_v38 = vpop.f32.mrf.mxu0  ;;  %v710_v30 = vpop.f32.mrf.mxu1 }
 0x1c2   :  { %v750_v32 = vpack.c.bf16 %v748_v57, %v747_v11 }
 0x1c3   :  { %v743_v8 = vpack.c.bf16 %v741_v52, %v740_v27 }
 0x1c4   :  { %v752_v13 = vunpack.c.l.bf16 %v750_v32  ;;  %v753_v51 = vunpack.c.h.bf16 %v750_v32 }
 0x1c5   :  { %v746_v4 = vunpack.c.l.bf16 %v743_v8  ;;  %v780_v42 = vrot.slane %v743_v8, 4 }
 0x1c6   :  { %2224 = vtanh.f32 %v752_v13 }
 0x1c7   :  { %2226 = vtanh.f32 %v753_v51  ;;  %v749_v12 = vmul.f32 0.5, %v746_v4  ;;  %v782_v22 = vunpack.c.l.bf16 %v780_v42 }
 0x1c8   :  { %v723_v21 = vpop.f32.mrf.mxu2  ;;  %v736_v33 = vpop.f32.mrf.mxu3 }
 0x1c9   :  { %v751_v46 = vpack.c.bf16 %v749_v12, %v749_v12 }
 0x1cb   :  { %v754_v7 = vunpack.c.l.bf16 %v751_v46 }
 0x1cc   :  { %v2225_v23 = vpop.eup %2224 }
 0x1cd   :  { %v2227_v49 = vpop.eup %2226  ;;  %2228 = vtanh.f32 %v754_v7 }
 0x1ce   :  { %v758_v36 = vpack.c.bf16 %v2227_v49, %v2225_v23  ;;  %2230 = vtanh.f32 %v782_v22 }
 0x1d0   :  { %v760_v62 = vunpack.c.l.bf16 %v758_v36  ;;  %v761_v60 = vunpack.c.h.bf16 %v758_v36 }
 0x1d2   :  { %v763_v63 = vmul.f32 0.5, %v760_v62  ;;  %v764_v11 = vmul.f32 0.5, %v761_v60 }
 0x1d3   :  { %v2229_v57 = vpop.eup %2228 }
 0x1d4   :  { %v759_v56 = vpack.c.bf16 %v2229_v57, %v2229_v57  ;;  %v766_v37 = vpack.c.bf16 %v764_v11, %v763_v63  ;;  %v2231_v27 = vpop.eup %2230 }
 0x1d5   :  { %v784_v13 = vpack.c.bf16 %v2231_v27, %v2231_v27 }
 0x1d6   :  { %v768_v52 = vunpack.c.l.bf16 %v766_v37  ;;  %v769_v38 = vunpack.c.h.bf16 %v766_v37  ;;  %v762_v30 = vunpack.c.l.bf16 %v759_v56 }
 0x1d7   :  { %v785_v21 = vunpack.c.l.bf16 %v784_v13 }
 0x1d8   :  { %v771_v32 = vadd.f32 0.5, %v768_v52  ;;  %v772_v8 = vadd.f32 0.5, %v769_v38  ;;  %v765_v4 = vmul.f32 0.5, %v762_v30  ;;  %v3200_v52 = vld [vmem:[#allocation13_spill] sm:$0xff] }
 0x1d9   :  { %v248_v38 = vadd.f32 %v3200_v52, %v2745_v26 }
 0x1da   :  { %v774_v51 = vpack.c.bf16 %v772_v8, %v771_v32  ;;  %v767_v7 = vpack.c.bf16 %v765_v4, %v765_v4 }
 0x1dc   :  { %v776_v12 = vunpack.c.l.bf16 %v774_v51  ;;  %v777_v42 = vunpack.c.h.bf16 %v774_v51  ;;  %v770_v49 = vunpack.c.l.bf16 %v767_v7 }
 0x1de   :  { %v786_v33 = vmul.f32 %v777_v42, %v2759_v55  ;;  %v787_v46 = vmul.f32 %v785_v21, %v776_v12  ;;  %v773_v62 = vadd.f32 0.5, %v770_v49  ;;  %v214_v55 = vadd.f32 %v2680_v47, %v2743_v25  ;;  %v3201_v42 = vld [vmem:[#allocation14_spill] sm:$0xff] }
 0x1df   :  { %v282_v21 = vadd.f32 %v3201_v42, %v2753_v19 }
 0x1e0   :  { %v2804_v22 = vadd.f32 %v787_v46, %v786_v33  ;;  %v775_v60 = vpack.c.bf16 %v773_v62, %v773_v62  ;;  %v3202_v33 = vld [vmem:[#allocation15_spill] sm:$0xff] }
 0x1e1   :  { %v316_v46 = vadd.f32 %v3202_v33, %v2755_v0 }
 0x1e2   :  { %v789_v23 = vpack.c.bf16 %v2804_v22, %v2804_v22  ;;  %v778_v57 = vunpack.c.l.bf16 %v775_v60 }
 0x1e4   :  { %v790_v36 = vunpack.c.l.bf16 %v789_v23 }
 0x1e6   :  { %2232 = vtanh.f32 %v790_v36 }
 0x1ec   :  { %v2233_v63 = vpop.eup %2232 }
 0x1ed   :  { %v792_v11 = vpack.c.bf16 %v2233_v63, %v2233_v63 }
 0x1ef   :  { %v793_v56 = vunpack.c.l.bf16 %v792_v11 }
 0x1f1   :  { %v794_v37 = vmul.f32 %v793_v56, %v778_v57 }
 0x1f3   :  { %v800_v27 = vpack.c.bf16 %v794_v37, %v794_v37 }
 0x1f5   :  { %809 = vmatmul.bf16.vlgmr.msrb.gmra.mxu0 %v800_v27  ;;  %822 = vmatmul.bf16.vlgmr.msrb.gmra.mxu1 %v800_v27 }
 0x1f6   :  { %835 = vmatmul.bf16.vlgmr.msrb.gmra.mxu2 %v800_v27  ;;  %848 = vmatmul.bf16.vlgmr.msrb.gmra.mxu3 %v800_v27 }
 0x1f7   :  { %1031 = vmatpush.bf16.msrb.mxu0 %v2492_v31  ;;  %1044 = vmatpush.bf16.msrb.mxu1 %v2494_v35 }
 0x1f8   :  { %1057 = vmatpush.bf16.msrb.mxu2 %v2503_v44  ;;  %1070 = vmatpush.bf16.msrb.mxu3 %v2505_v45 }
 0x1fb   :  { %1032 = vmatpush.bf16.msrb.mxu0 %v2497_v39  ;;  %1045 = vmatpush.bf16.msrb.mxu1 %v2501_v43 }
 0x1fc   :  { %1058 = vmatpush.bf16.msrb.mxu2 %v2515_v54  ;;  %1071 = vmatpush.bf16.msrb.mxu3 %v2520_v59 }
 0x1ff   :  { %1033 = vmatpush.bf16.msrb.mxu0 %v2513_v53  ;;  %1046 = vmatpush.bf16.msrb.mxu1 %v2518_v58 }
 0x200   :  { %1059 = vmatpush.bf16.msrb.mxu2 %v2523_v2  ;;  %1072 = vmatpush.bf16.msrb.mxu3 %v2529_v6 }
 0x203   :  { %1034 = vmatpush.bf16.msrb.mxu0 %v2527_v5  ;;  %1047 = vmatpush.bf16.msrb.mxu1 %v2532_v9 }
 0x204   :  { %1060 = vmatpush.bf16.msrb.mxu2 %v2535_v16  ;;  %1073 = vmatpush.bf16.msrb.mxu3 %v2541_v18 }
 0x207   :  { %1035 = vmatpush.bf16.msrb.mxu0 %v2539_v17  ;;  %1048 = vmatpush.bf16.msrb.mxu1 %v2544_v20 }
 0x208   :  { %1061 = vmatpush.bf16.msrb.mxu2 %v2558_v29  ;;  %1074 = vmatpush.bf16.msrb.mxu3 %v2561_v34 }
 0x20b   :  { %1036 = vmatpush.bf16.msrb.mxu0 %v2554_v24  ;;  %1049 = vmatpush.bf16.msrb.mxu1 %v2556_v28 }
 0x20c   :  { %1062 = vmatpush.bf16.msrb.mxu2 %v2570_v48  ;;  %1075 = vmatpush.bf16.msrb.mxu3 %v2572_v50 }
 0x20f   :  { %1037 = vmatpush.bf16.msrb.mxu0 %v2565_v40  ;;  %1050 = vmatpush.bf16.msrb.mxu1 %v2567_v41 }
 0x210   :  { %1063 = vmatpush.bf16.msrb.mxu2 %v2586_v3  ;;  %1076 = vmatpush.bf16.msrb.mxu3 %v2589_v10 }
 0x213   :  { %1038 = vmatpush.bf16.msrb.mxu0 %v2582_v61  ;;  %1051 = vmatpush.bf16.msrb.mxu1 %v2584_v1 }
 0x214   :  { %1064 = vmatpush.bf16.msrb.mxu2 %v2593_v14  ;;  %1077 = vmatpush.bf16.msrb.mxu3 %v2596_v15 }
 0x272   :  { %v810_v30 = vpop.f32.mrf.mxu0  ;;  %v823_v32 = vpop.f32.mrf.mxu1 }
 0x273   :  { %v853_v8 = vadd.f32 %v810_v30, %v214_v55  ;;  %v854_v13 = vadd.f32 %v823_v32, %v248_v38 }
 0x275   :  { %v857_v51 = vpack.c.bf16 %v854_v13, %v853_v8 }
 0x277   :  { %v859_v4 = vunpack.c.l.bf16 %v857_v51  ;;  %v860_v12 = vunpack.c.h.bf16 %v857_v51 }
 0x279   :  { %v862_v7 = vmul.f32 0.5, %v859_v4  ;;  %v863_v23 = vmul.f32 0.5, %v860_v12  ;;  %v836_v49 = vpop.f32.mrf.mxu2  ;;  %v849_v47 = vpop.f32.mrf.mxu3 }
 0x27a   :  { %v855_v36 = vadd.f32 %v836_v49, %v282_v21  ;;  %v856_v62 = vadd.f32 %v849_v47, %v316_v46  ;;  %v812_v60 = vpop.f32.mrf.mxu0  ;;  %v825_v63 = vpop.f32.mrf.mxu1 }
 0x27b   :  { %v865_v11 = vpack.c.bf16 %v863_v23, %v862_v7 }
 0x27c   :  { %v858_v57 = vpack.c.bf16 %v856_v62, %v855_v36 }
 0x27d   :  { %v867_v56 = vunpack.c.l.bf16 %v865_v11  ;;  %v868_v37 = vunpack.c.h.bf16 %v865_v11 }
 0x27e   :  { %v861_v27 = vunpack.c.l.bf16 %v858_v57  ;;  %v895_v52 = vrot.slane %v858_v57, 4 }
 0x27f   :  { %2234 = vtanh.f32 %v867_v56 }
 0x280   :  { %2236 = vtanh.f32 %v868_v37  ;;  %v864_v55 = vmul.f32 0.5, %v861_v27  ;;  %v897_v13 = vunpack.c.l.bf16 %v895_v52 }
 0x281   :  { %v838_v38 = vpop.f32.mrf.mxu2  ;;  %v851_v30 = vpop.f32.mrf.mxu3 }
 0x282   :  { %v866_v32 = vpack.c.bf16 %v864_v55, %v864_v55 }
 0x284   :  { %v869_v8 = vunpack.c.l.bf16 %v866_v32 }
 0x285   :  { %v2235_v51 = vpop.eup %2234 }
 0x286   :  { %v2237_v4 = vpop.eup %2236  ;;  %2238 = vtanh.f32 %v869_v8 }
 0x287   :  { %v873_v12 = vpack.c.bf16 %v2237_v4, %v2235_v51  ;;  %2240 = vtanh.f32 %v897_v13 }
 0x289   :  { %v875_v42 = vunpack.c.l.bf16 %v873_v12  ;;  %v876_v21 = vunpack.c.h.bf16 %v873_v12 }
 0x28b   :  { %v878_v33 = vmul.f32 0.5, %v875_v42  ;;  %v879_v46 = vmul.f32 0.5, %v876_v21 }
 0x28c   :  { %v2239_v7 = vpop.eup %2238 }
 0x28d   :  { %v874_v23 = vpack.c.bf16 %v2239_v7, %v2239_v7  ;;  %v881_v49 = vpack.c.bf16 %v879_v46, %v878_v33  ;;  %v2241_v47 = vpop.eup %2240 }
 0x28e   :  { %v899_v57 = vpack.c.bf16 %v2241_v47, %v2241_v47 }
 0x28f   :  { %v883_v36 = vunpack.c.l.bf16 %v881_v49  ;;  %v884_v62 = vunpack.c.h.bf16 %v881_v49  ;;  %v877_v60 = vunpack.c.l.bf16 %v874_v23 }
 0x290   :  { %v900_v52 = vunpack.c.l.bf16 %v899_v57 }
 0x291   :  { %v886_v63 = vadd.f32 0.5, %v883_v36  ;;  %v887_v11 = vadd.f32 0.5, %v884_v62  ;;  %v880_v37 = vmul.f32 0.5, %v877_v60  ;;  %v3204_v36 = vld [vmem:[#allocation17_spill] sm:$0xff] }
 0x292   :  { %v250_v62 = vadd.f32 %v3204_v36, %v2745_v26 }
 0x293   :  { %v889_v56 = vpack.c.bf16 %v887_v11, %v886_v63  ;;  %v882_v32 = vpack.c.bf16 %v880_v37, %v880_v37 }
 0x295   :  { %v891_v27 = vunpack.c.l.bf16 %v889_v56  ;;  %v892_v55 = vunpack.c.h.bf16 %v889_v56  ;;  %v885_v51 = vunpack.c.l.bf16 %v882_v32 }
 0x297   :  { %v901_v38 = vmul.f32 %v892_v55, %v2804_v22  ;;  %v902_v30 = vmul.f32 %v900_v52, %v891_v27  ;;  %v888_v12 = vadd.f32 0.5, %v885_v51  ;;  %v3203_v22 = vld [vmem:[#allocation16_spill] sm:$0xff]  ;;  %v3205_v55 = vld [vmem:[#allocation18_spill] sm:$0xff] }
 0x298   :  { %v216_v47 = vadd.f32 %v3203_v22, %v2743_v25  ;;  %v284_v52 = vadd.f32 %v3205_v55, %v2753_v19 }
 0x299   :  { %v2849_v8 = vadd.f32 %v902_v30, %v901_v38  ;;  %v890_v42 = vpack.c.bf16 %v888_v12, %v888_v12  ;;  %v3206_v38 = vld [vmem:[#allocation19_spill] sm:$0xff] }
 0x29a   :  { %v318_v30 = vadd.f32 %v3206_v38, %v2755_v0 }
 0x29b   :  { %v904_v13 = vpack.c.bf16 %v2849_v8, %v2849_v8  ;;  %v893_v46 = vunpack.c.l.bf16 %v890_v42 }
 0x29d   :  { %v905_v4 = vunpack.c.l.bf16 %v904_v13 }
 0x29f   :  { %2242 = vtanh.f32 %v905_v4 }
 0x2a5   :  { %v2243_v21 = vpop.eup %2242 }
 0x2a6   :  { %v907_v33 = vpack.c.bf16 %v2243_v21, %v2243_v21 }
 0x2a8   :  { %v908_v7 = vunpack.c.l.bf16 %v907_v33 }
 0x2aa   :  { %v909_v23 = vmul.f32 %v908_v7, %v893_v46 }
 0x2ac   :  { %v915_v49 = vpack.c.bf16 %v909_v23, %v909_v23 }
 0x2ae   :  { %924 = vmatmul.bf16.vlgmr.msra.gmra.mxu0 %v915_v49  ;;  %937 = vmatmul.bf16.vlgmr.msra.gmra.mxu1 %v915_v49 }
 0x2af   :  { %950 = vmatmul.bf16.vlgmr.msra.gmra.mxu2 %v915_v49  ;;  %963 = vmatmul.bf16.vlgmr.msra.gmra.mxu3 %v915_v49 }
 0x2b0   :  { %1146 = vmatpush.bf16.msra.mxu0 %v2492_v31  ;;  %1159 = vmatpush.bf16.msra.mxu1 %v2494_v35 }
 0x2b1   :  { %1172 = vmatpush.bf16.msra.mxu2 %v2503_v44  ;;  %1185 = vmatpush.bf16.msra.mxu3 %v2505_v45 }
 0x2b4   :  { %1147 = vmatpush.bf16.msra.mxu0 %v2497_v39  ;;  %1160 = vmatpush.bf16.msra.mxu1 %v2501_v43 }
 0x2b5   :  { %1173 = vmatpush.bf16.msra.mxu2 %v2515_v54  ;;  %1186 = vmatpush.bf16.msra.mxu3 %v2520_v59 }
 0x2b8   :  { %1148 = vmatpush.bf16.msra.mxu0 %v2513_v53  ;;  %1161 = vmatpush.bf16.msra.mxu1 %v2518_v58 }
 0x2b9   :  { %1174 = vmatpush.bf16.msra.mxu2 %v2523_v2  ;;  %1187 = vmatpush.bf16.msra.mxu3 %v2529_v6 }
 0x2bc   :  { %1149 = vmatpush.bf16.msra.mxu0 %v2527_v5  ;;  %1162 = vmatpush.bf16.msra.mxu1 %v2532_v9 }
 0x2bd   :  { %1175 = vmatpush.bf16.msra.mxu2 %v2535_v16  ;;  %1188 = vmatpush.bf16.msra.mxu3 %v2541_v18 }
 0x2c0   :  { %1150 = vmatpush.bf16.msra.mxu0 %v2539_v17  ;;  %1163 = vmatpush.bf16.msra.mxu1 %v2544_v20 }
 0x2c1   :  { %1176 = vmatpush.bf16.msra.mxu2 %v2558_v29  ;;  %1189 = vmatpush.bf16.msra.mxu3 %v2561_v34 }
 0x2c4   :  { %1151 = vmatpush.bf16.msra.mxu0 %v2554_v24  ;;  %1164 = vmatpush.bf16.msra.mxu1 %v2556_v28 }
 0x2c5   :  { %1177 = vmatpush.bf16.msra.mxu2 %v2570_v48  ;;  %1190 = vmatpush.bf16.msra.mxu3 %v2572_v50 }
 0x2c8   :  { %1152 = vmatpush.bf16.msra.mxu0 %v2565_v40  ;;  %1165 = vmatpush.bf16.msra.mxu1 %v2567_v41 }
 0x2c9   :  { %1178 = vmatpush.bf16.msra.mxu2 %v2586_v3  ;;  %1191 = vmatpush.bf16.msra.mxu3 %v2589_v10 }
 0x2cc   :  { %1153 = vmatpush.bf16.msra.mxu0 %v2582_v61  ;;  %1166 = vmatpush.bf16.msra.mxu1 %v2584_v1 }
 0x2cd   :  { %1179 = vmatpush.bf16.msra.mxu2 %v2593_v14  ;;  %1192 = vmatpush.bf16.msra.mxu3 %v2596_v15 }
 0x32b   :  { %v925_v60 = vpop.f32.mrf.mxu0  ;;  %v938_v63 = vpop.f32.mrf.mxu1 }
 0x32c   :  { %v968_v11 = vadd.f32 %v925_v60, %v216_v47  ;;  %v969_v57 = vadd.f32 %v938_v63, %v250_v62 }
 0x32e   :  { %v972_v56 = vpack.c.bf16 %v969_v57, %v968_v11 }
 0x330   :  { %v974_v37 = vunpack.c.l.bf16 %v972_v56  ;;  %v975_v27 = vunpack.c.h.bf16 %v972_v56 }
 0x332   :  { %v977_v32 = vmul.f32 0.5, %v974_v37  ;;  %v978_v13 = vmul.f32 0.5, %v975_v27  ;;  %v951_v51 = vpop.f32.mrf.mxu2  ;;  %v964_v4 = vpop.f32.mrf.mxu3 }
 0x333   :  { %v970_v12 = vadd.f32 %v951_v51, %v284_v52  ;;  %v971_v42 = vadd.f32 %v964_v4, %v318_v30  ;;  %v927_v21 = vpop.f32.mrf.mxu0  ;;  %v940_v33 = vpop.f32.mrf.mxu1 }
 0x334   :  { %v980_v46 = vpack.c.bf16 %v978_v13, %v977_v32 }
 0x335   :  { %v973_v7 = vpack.c.bf16 %v971_v42, %v970_v12 }
 0x336   :  { %v982_v23 = vunpack.c.l.bf16 %v980_v46  ;;  %v983_v49 = vunpack.c.h.bf16 %v980_v46 }
 0x337   :  { %v976_v22 = vunpack.c.l.bf16 %v973_v7  ;;  %v1010_v36 = vrot.slane %v973_v7, 4 }
 0x338   :  { %2244 = vtanh.f32 %v982_v23 }
 0x339   :  { %2246 = vtanh.f32 %v983_v49  ;;  %v979_v47 = vmul.f32 0.5, %v976_v22  ;;  %v1012_v57 = vunpack.c.l.bf16 %v1010_v36 }
 0x33a   :  { %v953_v62 = vpop.f32.mrf.mxu2  ;;  %v966_v60 = vpop.f32.mrf.mxu3 }
 0x33b   :  { %v981_v63 = vpack.c.bf16 %v979_v47, %v979_v47 }
 0x33d   :  { %v984_v11 = vunpack.c.l.bf16 %v981_v63 }
 0x33e   :  { %v2245_v56 = vpop.eup %2244 }
 0x33f   :  { %v2247_v37 = vpop.eup %2246  ;;  %2248 = vtanh.f32 %v984_v11 }
 0x340   :  { %v988_v27 = vpack.c.bf16 %v2247_v37, %v2245_v56  ;;  %2250 = vtanh.f32 %v1012_v57 }
 0x342   :  { %v990_v55 = vunpack.c.l.bf16 %v988_v27  ;;  %v991_v52 = vunpack.c.h.bf16 %v988_v27 }
 0x344   :  { %v993_v38 = vmul.f32 0.5, %v990_v55  ;;  %v994_v30 = vmul.f32 0.5, %v991_v52 }
 0x345   :  { %v2249_v32 = vpop.eup %2248 }
 0x346   :  { %v989_v13 = vpack.c.bf16 %v2249_v32, %v2249_v32  ;;  %v996_v51 = vpack.c.bf16 %v994_v30, %v993_v38  ;;  %v2251_v4 = vpop.eup %2250 }
 0x347   :  { %v1014_v7 = vpack.c.bf16 %v2251_v4, %v2251_v4 }
 0x348   :  { %v998_v12 = vunpack.c.l.bf16 %v996_v51  ;;  %v999_v42 = vunpack.c.h.bf16 %v996_v51  ;;  %v992_v21 = vunpack.c.l.bf16 %v989_v13 }
 0x349   :  { %v1015_v36 = vunpack.c.l.bf16 %v1014_v7 }
 0x34a   :  { %v1001_v33 = vadd.f32 0.5, %v998_v12  ;;  %v1002_v46 = vadd.f32 0.5, %v999_v42  ;;  %v995_v49 = vmul.f32 0.5, %v992_v21  ;;  %v3208_v12 = vld [vmem:[#allocation21_spill] sm:$0xff] }
 0x34b   :  { %v253_v42 = vadd.f32 %v3208_v12, %v2745_v26 }
 0x34c   :  { %v1004_v23 = vpack.c.bf16 %v1002_v46, %v1001_v33  ;;  %v997_v63 = vpack.c.bf16 %v995_v49, %v995_v49 }
 0x34e   :  { %v1006_v22 = vunpack.c.l.bf16 %v1004_v23  ;;  %v1007_v47 = vunpack.c.h.bf16 %v1004_v23  ;;  %v1000_v56 = vunpack.c.l.bf16 %v997_v63 }
 0x350   :  { %v1016_v62 = vmul.f32 %v1007_v47, %v2849_v8  ;;  %v1017_v60 = vmul.f32 %v1015_v36, %v1006_v22  ;;  %v1003_v27 = vadd.f32 0.5, %v1000_v56  ;;  %v3207_v8 = vld [vmem:[#allocation20_spill] sm:$0xff]  ;;  %v3209_v47 = vld [vmem:[#allocation22_spill] sm:$0xff] }
 0x351   :  { %v219_v4 = vadd.f32 %v3207_v8, %v2743_v25  ;;  %v287_v36 = vadd.f32 %v3209_v47, %v2753_v19 }
 0x352   :  { %v2894_v11 = vadd.f32 %v1017_v60, %v1016_v62  ;;  %v1005_v55 = vpack.c.bf16 %v1003_v27, %v1003_v27  ;;  %v3210_v62 = vld [vmem:[#allocation23_spill] sm:$0xff] }
 0x353   :  { %v321_v60 = vadd.f32 %v3210_v62, %v2755_v0 }
 0x354   :  { %v1019_v57 = vpack.c.bf16 %v2894_v11, %v2894_v11  ;;  %v1008_v30 = vunpack.c.l.bf16 %v1005_v55 }
 0x356   :  { %v1020_v37 = vunpack.c.l.bf16 %v1019_v57 }
 0x358   :  { %2252 = vtanh.f32 %v1020_v37 }
 0x35e   :  { %v2253_v52 = vpop.eup %2252 }
 0x35f   :  { %v1022_v38 = vpack.c.bf16 %v2253_v52, %v2253_v52 }
 0x361   :  { %v1023_v32 = vunpack.c.l.bf16 %v1022_v38 }
 0x363   :  { %v1024_v13 = vmul.f32 %v1023_v32, %v1008_v30 }
 0x365   :  { %v1030_v51 = vpack.c.bf16 %v1024_v13, %v1024_v13 }
 0x367   :  { %1039 = vmatmul.bf16.vlgmr.msrb.gmra.mxu0 %v1030_v51  ;;  %1052 = vmatmul.bf16.vlgmr.msrb.gmra.mxu1 %v1030_v51 }
 0x368   :  { %1065 = vmatmul.bf16.vlgmr.msrb.gmra.mxu2 %v1030_v51  ;;  %1078 = vmatmul.bf16.vlgmr.msrb.gmra.mxu3 %v1030_v51 }
 0x369   :  { %1261 = vmatpush.bf16.msrb.mxu0 %v2492_v31  ;;  %1274 = vmatpush.bf16.msrb.mxu1 %v2494_v35 }
 0x36a   :  { %1287 = vmatpush.bf16.msrb.mxu2 %v2503_v44  ;;  %1300 = vmatpush.bf16.msrb.mxu3 %v2505_v45 }
 0x36d   :  { %1262 = vmatpush.bf16.msrb.mxu0 %v2497_v39  ;;  %1275 = vmatpush.bf16.msrb.mxu1 %v2501_v43 }
 0x36e   :  { %1288 = vmatpush.bf16.msrb.mxu2 %v2515_v54  ;;  %1301 = vmatpush.bf16.msrb.mxu3 %v2520_v59 }
 0x371   :  { %1263 = vmatpush.bf16.msrb.mxu0 %v2513_v53  ;;  %1276 = vmatpush.bf16.msrb.mxu1 %v2518_v58 }
 0x372   :  { %1289 = vmatpush.bf16.msrb.mxu2 %v2523_v2  ;;  %1302 = vmatpush.bf16.msrb.mxu3 %v2529_v6 }
 0x375   :  { %1264 = vmatpush.bf16.msrb.mxu0 %v2527_v5  ;;  %1277 = vmatpush.bf16.msrb.mxu1 %v2532_v9 }
 0x376   :  { %1290 = vmatpush.bf16.msrb.mxu2 %v2535_v16  ;;  %1303 = vmatpush.bf16.msrb.mxu3 %v2541_v18 }
 0x379   :  { %1265 = vmatpush.bf16.msrb.mxu0 %v2539_v17  ;;  %1278 = vmatpush.bf16.msrb.mxu1 %v2544_v20 }
 0x37a   :  { %1291 = vmatpush.bf16.msrb.mxu2 %v2558_v29  ;;  %1304 = vmatpush.bf16.msrb.mxu3 %v2561_v34 }
 0x37d   :  { %1266 = vmatpush.bf16.msrb.mxu0 %v2554_v24  ;;  %1279 = vmatpush.bf16.msrb.mxu1 %v2556_v28 }
 0x37e   :  { %1292 = vmatpush.bf16.msrb.mxu2 %v2570_v48  ;;  %1305 = vmatpush.bf16.msrb.mxu3 %v2572_v50 }
 0x381   :  { %1267 = vmatpush.bf16.msrb.mxu0 %v2565_v40  ;;  %1280 = vmatpush.bf16.msrb.mxu1 %v2567_v41 }
 0x382   :  { %1293 = vmatpush.bf16.msrb.mxu2 %v2586_v3  ;;  %1306 = vmatpush.bf16.msrb.mxu3 %v2589_v10 }
 0x385   :  { %1268 = vmatpush.bf16.msrb.mxu0 %v2582_v61  ;;  %1281 = vmatpush.bf16.msrb.mxu1 %v2584_v1 }
 0x386   :  { %1294 = vmatpush.bf16.msrb.mxu2 %v2593_v14  ;;  %1307 = vmatpush.bf16.msrb.mxu3 %v2596_v15 }
 0x3e4   :  { %v1040_v21 = vpop.f32.mrf.mxu0  ;;  %v1053_v33 = vpop.f32.mrf.mxu1 }
 0x3e5   :  { %v1083_v46 = vadd.f32 %v1040_v21, %v219_v4  ;;  %v1084_v7 = vadd.f32 %v1053_v33, %v253_v42 }
 0x3e7   :  { %v1087_v23 = vpack.c.bf16 %v1084_v7, %v1083_v46 }
 0x3e9   :  { %v1089_v49 = vunpack.c.l.bf16 %v1087_v23  ;;  %v1090_v22 = vunpack.c.h.bf16 %v1087_v23 }
 0x3eb   :  { %v1092_v63 = vmul.f32 0.5, %v1089_v49  ;;  %v1093_v57 = vmul.f32 0.5, %v1090_v22  ;;  %v1066_v56 = vpop.f32.mrf.mxu2  ;;  %v1079_v37 = vpop.f32.mrf.mxu3 }
 0x3ec   :  { %v1085_v27 = vadd.f32 %v1066_v56, %v287_v36  ;;  %v1086_v55 = vadd.f32 %v1079_v37, %v321_v60  ;;  %v1042_v52 = vpop.f32.mrf.mxu0  ;;  %v1055_v38 = vpop.f32.mrf.mxu1 }
 0x3ed   :  { %v1095_v30 = vpack.c.bf16 %v1093_v57, %v1092_v63 }
 0x3ee   :  { %v1088_v32 = vpack.c.bf16 %v1086_v55, %v1085_v27 }
 0x3ef   :  { %v1097_v13 = vunpack.c.l.bf16 %v1095_v30  ;;  %v1098_v51 = vunpack.c.h.bf16 %v1095_v30 }
 0x3f0   :  { %v1091_v8 = vunpack.c.l.bf16 %v1088_v32  ;;  %v1125_v12 = vrot.slane %v1088_v32, 4 }
 0x3f1   :  { %2254 = vtanh.f32 %v1097_v13 }
 0x3f2   :  { %2256 = vtanh.f32 %v1098_v51  ;;  %v1094_v4 = vmul.f32 0.5, %v1091_v8  ;;  %v1127_v7 = vunpack.c.l.bf16 %v1125_v12 }
 0x3f3   :  { %v1068_v42 = vpop.f32.mrf.mxu2  ;;  %v1081_v21 = vpop.f32.mrf.mxu3 }
 0x3f4   :  { %v1096_v33 = vpack.c.bf16 %v1094_v4, %v1094_v4 }
 0x3f6   :  { %v1099_v46 = vunpack.c.l.bf16 %v1096_v33 }
 0x3f7   :  { %v2255_v23 = vpop.eup %2254 }
 0x3f8   :  { %v2257_v49 = vpop.eup %2256  ;;  %2258 = vtanh.f32 %v1099_v46 }
 0x3f9   :  { %v1103_v22 = vpack.c.bf16 %v2257_v49, %v2255_v23  ;;  %2260 = vtanh.f32 %v1127_v7 }
 0x3fb   :  { %v1105_v47 = vunpack.c.l.bf16 %v1103_v22  ;;  %v1106_v36 = vunpack.c.h.bf16 %v1103_v22 }
 0x3fd   :  { %v1108_v62 = vmul.f32 0.5, %v1105_v47  ;;  %v1109_v60 = vmul.f32 0.5, %v1106_v36 }
 0x3fe   :  { %v2259_v63 = vpop.eup %2258 }
 0x3ff   :  { %v1104_v57 = vpack.c.bf16 %v2259_v63, %v2259_v63  ;;  %v1111_v56 = vpack.c.bf16 %v1109_v60, %v1108_v62  ;;  %v2261_v37 = vpop.eup %2260 }
 0x400   :  { %v1129_v32 = vpack.c.bf16 %v2261_v37, %v2261_v37 }
 0x401   :  { %v1113_v27 = vunpack.c.l.bf16 %v1111_v56  ;;  %v1114_v55 = vunpack.c.h.bf16 %v1111_v56  ;;  %v1107_v52 = vunpack.c.l.bf16 %v1104_v57 }
 0x402   :  { %v1130_v12 = vunpack.c.l.bf16 %v1129_v32 }
 0x403   :  { %v1116_v38 = vadd.f32 0.5, %v1113_v27  ;;  %v1117_v30 = vadd.f32 0.5, %v1114_v55  ;;  %v1110_v51 = vmul.f32 0.5, %v1107_v52  ;;  %v3212_v27 = vld [vmem:[#allocation25_spill] sm:$0xff] }
 0x404   :  { %v255_v55 = vadd.f32 %v3212_v27, %v2745_v26 }
 0x405   :  { %v1119_v13 = vpack.c.bf16 %v1117_v30, %v1116_v38  ;;  %v1112_v33 = vpack.c.bf16 %v1110_v51, %v1110_v51 }
 0x407   :  { %v1121_v8 = vunpack.c.l.bf16 %v1119_v13  ;;  %v1122_v4 = vunpack.c.h.bf16 %v1119_v13  ;;  %v1115_v23 = vunpack.c.l.bf16 %v1112_v33 }
 0x409   :  { %v1131_v42 = vmul.f32 %v1122_v4, %v2894_v11  ;;  %v1132_v21 = vmul.f32 %v1130_v12, %v1121_v8  ;;  %v1118_v22 = vadd.f32 0.5, %v1115_v23  ;;  %v3211_v11 = vld [vmem:[#allocation24_spill] sm:$0xff]  ;;  %v3213_v4 = vld [vmem:[#allocation26_spill] sm:$0xff] }
 0x40a   :  { %v221_v37 = vadd.f32 %v3211_v11, %v2743_v25  ;;  %v289_v12 = vadd.f32 %v3213_v4, %v2753_v19 }
 0x40b   :  { %v2939_v46 = vadd.f32 %v1132_v21, %v1131_v42  ;;  %v1120_v47 = vpack.c.bf16 %v1118_v22, %v1118_v22  ;;  %v3214_v42 = vld [vmem:[#allocation27_spill] sm:$0xff] }
 0x40c   :  { %v323_v21 = vadd.f32 %v3214_v42, %v2755_v0 }
 0x40d   :  { %v1134_v7 = vpack.c.bf16 %v2939_v46, %v2939_v46  ;;  %v1123_v60 = vunpack.c.l.bf16 %v1120_v47 }
 0x40f   :  { %v1135_v49 = vunpack.c.l.bf16 %v1134_v7 }
 0x411   :  { %2262 = vtanh.f32 %v1135_v49 }
 0x417   :  { %v2263_v36 = vpop.eup %2262 }
 0x418   :  { %v1137_v62 = vpack.c.bf16 %v2263_v36, %v2263_v36 }
 0x41a   :  { %v1138_v63 = vunpack.c.l.bf16 %v1137_v62 }
 0x41c   :  { %v1139_v57 = vmul.f32 %v1138_v63, %v1123_v60 }
 0x41e   :  { %v1145_v56 = vpack.c.bf16 %v1139_v57, %v1139_v57 }
 0x420   :  { %1154 = vmatmul.bf16.vlgmr.msra.gmra.mxu0 %v1145_v56  ;;  %1167 = vmatmul.bf16.vlgmr.msra.gmra.mxu1 %v1145_v56 }
 0x421   :  { %1180 = vmatmul.bf16.vlgmr.msra.gmra.mxu2 %v1145_v56  ;;  %1193 = vmatmul.bf16.vlgmr.msra.gmra.mxu3 %v1145_v56 }
 0x422   :  { %1376 = vmatpush.bf16.msra.mxu0 %v2492_v31  ;;  %1389 = vmatpush.bf16.msra.mxu1 %v2494_v35 }
 0x423   :  { %1402 = vmatpush.bf16.msra.mxu2 %v2503_v44  ;;  %1415 = vmatpush.bf16.msra.mxu3 %v2505_v45 }
 0x426   :  { %1377 = vmatpush.bf16.msra.mxu0 %v2497_v39  ;;  %1390 = vmatpush.bf16.msra.mxu1 %v2501_v43 }
 0x427   :  { %1403 = vmatpush.bf16.msra.mxu2 %v2515_v54  ;;  %1416 = vmatpush.bf16.msra.mxu3 %v2520_v59 }
 0x42a   :  { %1378 = vmatpush.bf16.msra.mxu0 %v2513_v53  ;;  %1391 = vmatpush.bf16.msra.mxu1 %v2518_v58 }
 0x42b   :  { %1404 = vmatpush.bf16.msra.mxu2 %v2523_v2  ;;  %1417 = vmatpush.bf16.msra.mxu3 %v2529_v6 }
 0x42e   :  { %1379 = vmatpush.bf16.msra.mxu0 %v2527_v5  ;;  %1392 = vmatpush.bf16.msra.mxu1 %v2532_v9 }
 0x42f   :  { %1405 = vmatpush.bf16.msra.mxu2 %v2535_v16  ;;  %1418 = vmatpush.bf16.msra.mxu3 %v2541_v18 }
 0x432   :  { %1380 = vmatpush.bf16.msra.mxu0 %v2539_v17  ;;  %1393 = vmatpush.bf16.msra.mxu1 %v2544_v20 }
 0x433   :  { %1406 = vmatpush.bf16.msra.mxu2 %v2558_v29  ;;  %1419 = vmatpush.bf16.msra.mxu3 %v2561_v34 }
 0x436   :  { %1381 = vmatpush.bf16.msra.mxu0 %v2554_v24  ;;  %1394 = vmatpush.bf16.msra.mxu1 %v2556_v28 }
 0x437   :  { %1407 = vmatpush.bf16.msra.mxu2 %v2570_v48  ;;  %1420 = vmatpush.bf16.msra.mxu3 %v2572_v50 }
 0x43a   :  { %1382 = vmatpush.bf16.msra.mxu0 %v2565_v40  ;;  %1395 = vmatpush.bf16.msra.mxu1 %v2567_v41 }
 0x43b   :  { %1408 = vmatpush.bf16.msra.mxu2 %v2586_v3  ;;  %1421 = vmatpush.bf16.msra.mxu3 %v2589_v10 }
 0x43e   :  { %1383 = vmatpush.bf16.msra.mxu0 %v2582_v61  ;;  %1396 = vmatpush.bf16.msra.mxu1 %v2584_v1 }
 0x43f   :  { %1409 = vmatpush.bf16.msra.mxu2 %v2593_v14  ;;  %1422 = vmatpush.bf16.msra.mxu3 %v2596_v15 }
 0x49d   :  { %v1155_v52 = vpop.f32.mrf.mxu0  ;;  %v1168_v38 = vpop.f32.mrf.mxu1 }
 0x49e   :  { %v1198_v30 = vadd.f32 %v1155_v52, %v221_v37  ;;  %v1199_v32 = vadd.f32 %v1168_v38, %v255_v55 }
 0x4a0   :  { %v1202_v13 = vpack.c.bf16 %v1199_v32, %v1198_v30 }
 0x4a2   :  { %v1204_v51 = vunpack.c.l.bf16 %v1202_v13  ;;  %v1205_v8 = vunpack.c.h.bf16 %v1202_v13 }
 0x4a4   :  { %v1207_v33 = vmul.f32 0.5, %v1204_v51  ;;  %v1208_v7 = vmul.f32 0.5, %v1205_v8  ;;  %v1181_v23 = vpop.f32.mrf.mxu2  ;;  %v1194_v49 = vpop.f32.mrf.mxu3 }
 0x4a5   :  { %v1200_v22 = vadd.f32 %v1181_v23, %v289_v12  ;;  %v1201_v47 = vadd.f32 %v1194_v49, %v323_v21  ;;  %v1157_v36 = vpop.f32.mrf.mxu0  ;;  %v1170_v62 = vpop.f32.mrf.mxu1 }
 0x4a6   :  { %v1210_v60 = vpack.c.bf16 %v1208_v7, %v1207_v33 }
 0x4a7   :  { %v1203_v63 = vpack.c.bf16 %v1201_v47, %v1200_v22 }
 0x4a8   :  { %v1212_v57 = vunpack.c.l.bf16 %v1210_v60  ;;  %v1213_v56 = vunpack.c.h.bf16 %v1210_v60 }
 0x4a9   :  { %v1206_v11 = vunpack.c.l.bf16 %v1203_v63  ;;  %v1240_v27 = vrot.slane %v1203_v63, 4 }
 0x4aa   :  { %2264 = vtanh.f32 %v1212_v57 }
 0x4ab   :  { %2266 = vtanh.f32 %v1213_v56  ;;  %v1209_v37 = vmul.f32 0.5, %v1206_v11  ;;  %v1242_v32 = vunpack.c.l.bf16 %v1240_v27 }
 0x4ac   :  { %v1183_v55 = vpop.f32.mrf.mxu2  ;;  %v1196_v52 = vpop.f32.mrf.mxu3 }
 0x4ad   :  { %v1211_v38 = vpack.c.bf16 %v1209_v37, %v1209_v37 }
 0x4af   :  { %v1214_v30 = vunpack.c.l.bf16 %v1211_v38 }
 0x4b0   :  { %v2265_v13 = vpop.eup %2264 }
 0x4b1   :  { %v2267_v51 = vpop.eup %2266  ;;  %2268 = vtanh.f32 %v1214_v30 }
 0x4b2   :  { %v1218_v8 = vpack.c.bf16 %v2267_v51, %v2265_v13  ;;  %2270 = vtanh.f32 %v1242_v32 }
 0x4b4   :  { %v1220_v4 = vunpack.c.l.bf16 %v1218_v8  ;;  %v1221_v12 = vunpack.c.h.bf16 %v1218_v8 }
 0x4b6   :  { %v1223_v42 = vmul.f32 0.5, %v1220_v4  ;;  %v1224_v21 = vmul.f32 0.5, %v1221_v12 }
 0x4b7   :  { %v2269_v33 = vpop.eup %2268 }
 0x4b8   :  { %v1219_v7 = vpack.c.bf16 %v2269_v33, %v2269_v33  ;;  %v1226_v23 = vpack.c.bf16 %v1224_v21, %v1223_v42  ;;  %v2271_v49 = vpop.eup %2270 }
 0x4b9   :  { %v1244_v63 = vpack.c.bf16 %v2271_v49, %v2271_v49 }
 0x4ba   :  { %v1228_v22 = vunpack.c.l.bf16 %v1226_v23  ;;  %v1229_v47 = vunpack.c.h.bf16 %v1226_v23  ;;  %v1222_v36 = vunpack.c.l.bf16 %v1219_v7 }
 0x4bb   :  { %v1245_v27 = vunpack.c.l.bf16 %v1244_v63 }
 0x4bc   :  { %v1231_v62 = vadd.f32 0.5, %v1228_v22  ;;  %v1232_v60 = vadd.f32 0.5, %v1229_v47  ;;  %v1225_v56 = vmul.f32 0.5, %v1222_v36  ;;  %v3216_v22 = vld [vmem:[#allocation29_spill] sm:$0xff] }
 0x4bd   :  { %v258_v47 = vadd.f32 %v3216_v22, %v2745_v26 }
 0x4be   :  { %v1234_v57 = vpack.c.bf16 %v1232_v60, %v1231_v62  ;;  %v1227_v38 = vpack.c.bf16 %v1225_v56, %v1225_v56 }
 0x4c0   :  { %v1236_v11 = vunpack.c.l.bf16 %v1234_v57  ;;  %v1237_v37 = vunpack.c.h.bf16 %v1234_v57  ;;  %v1230_v13 = vunpack.c.l.bf16 %v1227_v38 }
 0x4c2   :  { %v1246_v55 = vmul.f32 %v1237_v37, %v2939_v46  ;;  %v1247_v52 = vmul.f32 %v1245_v27, %v1236_v11  ;;  %v1233_v8 = vadd.f32 0.5, %v1230_v13  ;;  %v3215_v46 = vld [vmem:[#allocation28_spill] sm:$0xff]  ;;  %v3217_v37 = vld [vmem:[#allocation30_spill] sm:$0xff] }
 0x4c3   :  { %v224_v49 = vadd.f32 %v3215_v46, %v2743_v25  ;;  %v292_v27 = vadd.f32 %v3217_v37, %v2753_v19 }
 0x4c4   :  { %v2984_v30 = vadd.f32 %v1247_v52, %v1246_v55  ;;  %v1235_v4 = vpack.c.bf16 %v1233_v8, %v1233_v8  ;;  %v3218_v55 = vld [vmem:[#allocation31_spill] sm:$0xff] }
 0x4c5   :  { %v326_v52 = vadd.f32 %v3218_v55, %v2755_v0 }
 0x4c6   :  { %v1249_v32 = vpack.c.bf16 %v2984_v30, %v2984_v30  ;;  %v1238_v21 = vunpack.c.l.bf16 %v1235_v4 }
 0x4c8   :  { %v1250_v51 = vunpack.c.l.bf16 %v1249_v32 }
 0x4ca   :  { %2272 = vtanh.f32 %v1250_v51 }
 0x4d0   :  { %v2273_v12 = vpop.eup %2272 }
 0x4d1   :  { %v1252_v42 = vpack.c.bf16 %v2273_v12, %v2273_v12 }
 0x4d3   :  { %v1253_v33 = vunpack.c.l.bf16 %v1252_v42 }
 0x4d5   :  { %v1254_v7 = vmul.f32 %v1253_v33, %v1238_v21 }
 0x4d7   :  { %v1260_v23 = vpack.c.bf16 %v1254_v7, %v1254_v7 }
 0x4d9   :  { %1269 = vmatmul.bf16.vlgmr.msrb.gmra.mxu0 %v1260_v23  ;;  %1282 = vmatmul.bf16.vlgmr.msrb.gmra.mxu1 %v1260_v23 }
 0x4da   :  { %1295 = vmatmul.bf16.vlgmr.msrb.gmra.mxu2 %v1260_v23  ;;  %1308 = vmatmul.bf16.vlgmr.msrb.gmra.mxu3 %v1260_v23 }
 0x4db   :  { %1491 = vmatpush.bf16.msrb.mxu0 %v2492_v31  ;;  %1504 = vmatpush.bf16.msrb.mxu1 %v2494_v35 }
 0x4dc   :  { %1517 = vmatpush.bf16.msrb.mxu2 %v2503_v44  ;;  %1530 = vmatpush.bf16.msrb.mxu3 %v2505_v45 }
 0x4df   :  { %1492 = vmatpush.bf16.msrb.mxu0 %v2497_v39  ;;  %1505 = vmatpush.bf16.msrb.mxu1 %v2501_v43 }
 0x4e0   :  { %1518 = vmatpush.bf16.msrb.mxu2 %v2515_v54  ;;  %1531 = vmatpush.bf16.msrb.mxu3 %v2520_v59 }
 0x4e3   :  { %1493 = vmatpush.bf16.msrb.mxu0 %v2513_v53  ;;  %1506 = vmatpush.bf16.msrb.mxu1 %v2518_v58 }
 0x4e4   :  { %1519 = vmatpush.bf16.msrb.mxu2 %v2523_v2  ;;  %1532 = vmatpush.bf16.msrb.mxu3 %v2529_v6 }
 0x4e7   :  { %1494 = vmatpush.bf16.msrb.mxu0 %v2527_v5  ;;  %1507 = vmatpush.bf16.msrb.mxu1 %v2532_v9 }
 0x4e8   :  { %1520 = vmatpush.bf16.msrb.mxu2 %v2535_v16  ;;  %1533 = vmatpush.bf16.msrb.mxu3 %v2541_v18 }
 0x4eb   :  { %1495 = vmatpush.bf16.msrb.mxu0 %v2539_v17  ;;  %1508 = vmatpush.bf16.msrb.mxu1 %v2544_v20 }
 0x4ec   :  { %1521 = vmatpush.bf16.msrb.mxu2 %v2558_v29  ;;  %1534 = vmatpush.bf16.msrb.mxu3 %v2561_v34 }
 0x4ef   :  { %1496 = vmatpush.bf16.msrb.mxu0 %v2554_v24  ;;  %1509 = vmatpush.bf16.msrb.mxu1 %v2556_v28 }
 0x4f0   :  { %1522 = vmatpush.bf16.msrb.mxu2 %v2570_v48  ;;  %1535 = vmatpush.bf16.msrb.mxu3 %v2572_v50 }
 0x4f3   :  { %1497 = vmatpush.bf16.msrb.mxu0 %v2565_v40  ;;  %1510 = vmatpush.bf16.msrb.mxu1 %v2567_v41 }
 0x4f4   :  { %1523 = vmatpush.bf16.msrb.mxu2 %v2586_v3  ;;  %1536 = vmatpush.bf16.msrb.mxu3 %v2589_v10 }
 0x4f7   :  { %1498 = vmatpush.bf16.msrb.mxu0 %v2582_v61  ;;  %1511 = vmatpush.bf16.msrb.mxu1 %v2584_v1 }
 0x4f8   :  { %1524 = vmatpush.bf16.msrb.mxu2 %v2593_v14  ;;  %1537 = vmatpush.bf16.msrb.mxu3 %v2596_v15 }
 0x556   :  { %v1270_v36 = vpop.f32.mrf.mxu0  ;;  %v1283_v62 = vpop.f32.mrf.mxu1 }
 0x557   :  { %v1313_v60 = vadd.f32 %v1270_v36, %v224_v49  ;;  %v1314_v63 = vadd.f32 %v1283_v62, %v258_v47 }
 0x559   :  { %v1317_v57 = vpack.c.bf16 %v1314_v63, %v1313_v60 }
 0x55b   :  { %v1319_v56 = vunpack.c.l.bf16 %v1317_v57  ;;  %v1320_v11 = vunpack.c.h.bf16 %v1317_v57 }
 0x55d   :  { %v1322_v38 = vmul.f32 0.5, %v1319_v56  ;;  %v1323_v32 = vmul.f32 0.5, %v1320_v11  ;;  %v1296_v13 = vpop.f32.mrf.mxu2  ;;  %v1309_v51 = vpop.f32.mrf.mxu3 }
 0x55e   :  { %v1315_v8 = vadd.f32 %v1296_v13, %v292_v27  ;;  %v1316_v4 = vadd.f32 %v1309_v51, %v326_v52  ;;  %v1272_v12 = vpop.f32.mrf.mxu0  ;;  %v1285_v42 = vpop.f32.mrf.mxu1 }
 0x55f   :  { %v1325_v21 = vpack.c.bf16 %v1323_v32, %v1322_v38 }
 0x560   :  { %v1318_v33 = vpack.c.bf16 %v1316_v4, %v1315_v8 }
 0x561   :  { %v1327_v7 = vunpack.c.l.bf16 %v1325_v21  ;;  %v1328_v23 = vunpack.c.h.bf16 %v1325_v21 }
 0x562   :  { %v1321_v46 = vunpack.c.l.bf16 %v1318_v33  ;;  %v1355_v22 = vrot.slane %v1318_v33, 4 }
 0x563   :  { %2274 = vtanh.f32 %v1327_v7 }
 0x564   :  { %2276 = vtanh.f32 %v1328_v23  ;;  %v1324_v49 = vmul.f32 0.5, %v1321_v46  ;;  %v1357_v63 = vunpack.c.l.bf16 %v1355_v22 }
 0x565   :  { %v1298_v47 = vpop.f32.mrf.mxu2  ;;  %v1311_v36 = vpop.f32.mrf.mxu3 }
 0x566   :  { %v1326_v62 = vpack.c.bf16 %v1324_v49, %v1324_v49 }
 0x568   :  { %v1329_v60 = vunpack.c.l.bf16 %v1326_v62 }
 0x569   :  { %v2275_v57 = vpop.eup %2274 }
 0x56a   :  { %v2277_v56 = vpop.eup %2276  ;;  %2278 = vtanh.f32 %v1329_v60 }
 0x56b   :  { %v1333_v11 = vpack.c.bf16 %v2277_v56, %v2275_v57  ;;  %2280 = vtanh.f32 %v1357_v63 }
 0x56d   :  { %v1335_v37 = vunpack.c.l.bf16 %v1333_v11  ;;  %v1336_v27 = vunpack.c.h.bf16 %v1333_v11 }
 0x56f   :  { %v1338_v55 = vmul.f32 0.5, %v1335_v37  ;;  %v1339_v52 = vmul.f32 0.5, %v1336_v27 }
 0x570   :  { %v2279_v38 = vpop.eup %2278 }
 0x571   :  { %v1334_v32 = vpack.c.bf16 %v2279_v38, %v2279_v38  ;;  %v1341_v13 = vpack.c.bf16 %v1339_v52, %v1338_v55  ;;  %v2281_v51 = vpop.eup %2280 }
 0x572   :  { %v1359_v33 = vpack.c.bf16 %v2281_v51, %v2281_v51 }
 0x573   :  { %v1343_v8 = vunpack.c.l.bf16 %v1341_v13  ;;  %v1344_v4 = vunpack.c.h.bf16 %v1341_v13  ;;  %v1337_v12 = vunpack.c.l.bf16 %v1334_v32 }
 0x574   :  { %v1360_v22 = vunpack.c.l.bf16 %v1359_v33 }
 0x575   :  { %v1346_v42 = vadd.f32 0.5, %v1343_v8  ;;  %v1347_v21 = vadd.f32 0.5, %v1344_v4  ;;  %v1340_v23 = vmul.f32 0.5, %v1337_v12 }
 0x577   :  { %v1349_v7 = vpack.c.bf16 %v1347_v21, %v1346_v42  ;;  %v1342_v62 = vpack.c.bf16 %v1340_v23, %v1340_v23 }
 0x579   :  { %v1351_v46 = vunpack.c.l.bf16 %v1349_v7  ;;  %v1352_v49 = vunpack.c.h.bf16 %v1349_v7  ;;  %v1345_v57 = vunpack.c.l.bf16 %v1342_v62 }
 0x57b   :  { %v1361_v47 = vmul.f32 %v1352_v49, %v2984_v30  ;;  %v1362_v36 = vmul.f32 %v1360_v22, %v1351_v46  ;;  %v1348_v11 = vadd.f32 0.5, %v1345_v57 }
 0x57d   :  { %v3029_v60 = vadd.f32 %v1362_v36, %v1361_v47  ;;  %v1350_v37 = vpack.c.bf16 %v1348_v11, %v1348_v11 }
 0x57f   :  { %v1364_v63 = vpack.c.bf16 %v3029_v60, %v3029_v60  ;;  %v1353_v52 = vunpack.c.l.bf16 %v1350_v37 }
 0x581   :  { %v1365_v56 = vunpack.c.l.bf16 %v1364_v63 }
 0x583   :  { %2282 = vtanh.f32 %v1365_v56 }
 0x589   :  { %v2283_v27 = vpop.eup %2282 }
 0x58a   :  { %v1367_v55 = vpack.c.bf16 %v2283_v27, %v2283_v27 }
 0x58c   :  { %v1368_v38 = vunpack.c.l.bf16 %v1367_v55 }
 0x58e   :  { %v1369_v32 = vmul.f32 %v1368_v38, %v1353_v52 }
 0x590   :  { %v1375_v13 = vpack.c.bf16 %v1369_v32, %v1369_v32 }
 0x592   :  { %1384 = vmatmul.bf16.vlgmr.msra.gmra.mxu0 %v1375_v13  ;;  %1397 = vmatmul.bf16.vlgmr.msra.gmra.mxu1 %v1375_v13 }
 0x593   :  { %1410 = vmatmul.bf16.vlgmr.msra.gmra.mxu2 %v1375_v13  ;;  %1423 = vmatmul.bf16.vlgmr.msra.gmra.mxu3 %v1375_v13 }
 0x594   :  { %1606 = vmatpush.bf16.msra.mxu0 %v2492_v31  ;;  %1619 = vmatpush.bf16.msra.mxu1 %v2494_v35  ;;  %v3219_v31 = vld [vmem:[#allocation32_spill] sm:$0xff] }
 0x595   :  { %1632 = vmatpush.bf16.msra.mxu2 %v2503_v44  ;;  %1645 = vmatpush.bf16.msra.mxu3 %v2505_v45  ;;  %v226_v35 = vadd.f32 %v3219_v31, %v2743_v25 }
 0x598   :  { %1607 = vmatpush.bf16.msra.mxu0 %v2497_v39  ;;  %1620 = vmatpush.bf16.msra.mxu1 %v2501_v43  ;;  %v3220_v39 = vld [vmem:[#allocation33_spill] sm:$0xff] }
 0x599   :  { %1633 = vmatpush.bf16.msra.mxu2 %v2515_v54  ;;  %1646 = vmatpush.bf16.msra.mxu3 %v2520_v59  ;;  %v260_v43 = vadd.f32 %v3220_v39, %v2745_v26 }
 0x59c   :  { %1608 = vmatpush.bf16.msra.mxu0 %v2513_v53  ;;  %1621 = vmatpush.bf16.msra.mxu1 %v2518_v58 }
 0x59d   :  { %1634 = vmatpush.bf16.msra.mxu2 %v2523_v2  ;;  %1647 = vmatpush.bf16.msra.mxu3 %v2529_v6 }
 0x5a0   :  { %1609 = vmatpush.bf16.msra.mxu0 %v2527_v5  ;;  %1622 = vmatpush.bf16.msra.mxu1 %v2532_v9  ;;  %v3221_v5 = vld [vmem:[#allocation34_spill] sm:$0xff]  ;;  %v3222_v9 = vld [vmem:[#allocation35_spill] sm:$0xff] }
 0x5a1   :  { %1635 = vmatpush.bf16.msra.mxu2 %v2535_v16  ;;  %1648 = vmatpush.bf16.msra.mxu3 %v2541_v18  ;;  %v294_v6 = vadd.f32 %v3221_v5, %v2753_v19  ;;  %v328_v16 = vadd.f32 %v3222_v9, %v2755_v0 }
 0x5a4   :  { %1610 = vmatpush.bf16.msra.mxu0 %v2539_v17  ;;  %1623 = vmatpush.bf16.msra.mxu1 %v2544_v20 }
 0x5a5   :  { %1636 = vmatpush.bf16.msra.mxu2 %v2558_v29  ;;  %1649 = vmatpush.bf16.msra.mxu3 %v2561_v34 }
 0x5a8   :  { %1611 = vmatpush.bf16.msra.mxu0 %v2554_v24  ;;  %1624 = vmatpush.bf16.msra.mxu1 %v2556_v28 }
 0x5a9   :  { %1637 = vmatpush.bf16.msra.mxu2 %v2570_v48  ;;  %1650 = vmatpush.bf16.msra.mxu3 %v2572_v50 }
 0x5ac   :  { %1612 = vmatpush.bf16.msra.mxu0 %v2565_v40  ;;  %1625 = vmatpush.bf16.msra.mxu1 %v2567_v41 }
 0x5ad   :  { %1638 = vmatpush.bf16.msra.mxu2 %v2586_v3  ;;  %1651 = vmatpush.bf16.msra.mxu3 %v2589_v10 }
 0x5b0   :  { %1613 = vmatpush.bf16.msra.mxu0 %v2582_v61  ;;  %1626 = vmatpush.bf16.msra.mxu1 %v2584_v1 }
 0x5b1   :  { %1639 = vmatpush.bf16.msra.mxu2 %v2593_v14  ;;  %1652 = vmatpush.bf16.msra.mxu3 %v2596_v15 }
 0x60f   :  { %v1385_v44 = vpop.f32.mrf.mxu0  ;;  %v1398_v45 = vpop.f32.mrf.mxu1 }
 0x610   :  { %v1428_v53 = vadd.f32 %v1385_v44, %v226_v35  ;;  %v1429_v54 = vadd.f32 %v1398_v45, %v260_v43 }
 0x612   :  { %v1432_v58 = vpack.c.bf16 %v1429_v54, %v1428_v53 }
 0x614   :  { %v1434_v59 = vunpack.c.l.bf16 %v1432_v58  ;;  %v1435_v2 = vunpack.c.h.bf16 %v1432_v58 }
 0x616   :  { %v1437_v17 = vmul.f32 0.5, %v1434_v59  ;;  %v1438_v18 = vmul.f32 0.5, %v1435_v2  ;;  %v1411_v20 = vpop.f32.mrf.mxu2  ;;  %v1424_v24 = vpop.f32.mrf.mxu3 }
 0x617   :  { %v1430_v28 = vadd.f32 %v1411_v20, %v294_v6  ;;  %v1431_v29 = vadd.f32 %v1424_v24, %v328_v16  ;;  %v1387_v34 = vpop.f32.mrf.mxu0  ;;  %v1400_v40 = vpop.f32.mrf.mxu1  ;;  %v3224_v16 = vld [vmem:[#allocation37_spill] sm:$0xff] }
 0x618   :  { %v1440_v41 = vpack.c.bf16 %v1438_v18, %v1437_v17  ;;  %v263_v17 = vadd.f32 %v3224_v16, %v2745_v26  ;;  %v2177_v16 = vld [vmem:[%s3166_s5 + $0x4] sm:$0xf] }
 0x619   :  { %v1433_v48 = vpack.c.bf16 %v1431_v29, %v1430_v28 }
 0x61a   :  { %v1442_v50 = vunpack.c.l.bf16 %v1440_v41  ;;  %v1443_v61 = vunpack.c.h.bf16 %v1440_v41  ;;  %v3225_v41 = vld [vmem:[#allocation38_spill] sm:$0xff] }
 0x61b   :  { %v1436_v1 = vunpack.c.l.bf16 %v1433_v48  ;;  %v1470_v10 = vrot.slane %v1433_v48, 4  ;;  %v297_v48 = vadd.f32 %v3225_v41, %v2753_v19  ;;  %v2128_v41 = vld [vmem:[%s3166_s5 + $0x38] sm:$0xf0] }
 0x61c   :  { %2284 = vtanh.f32 %v1442_v50  ;;  %v3226_v50 = vld [vmem:[#allocation39_spill] sm:$0xff] }
 0x61d   :  { %2286 = vtanh.f32 %v1443_v61  ;;  %v1439_v3 = vmul.f32 0.5, %v1436_v1  ;;  %v1472_v8 = vunpack.c.l.bf16 %v1470_v10  ;;  %v331_v61 = vadd.f32 %v3226_v50, %v2755_v0 }
 0x61e   :  { %v1413_v14 = vpop.f32.mrf.mxu2  ;;  %v1426_v15 = vpop.f32.mrf.mxu3 }
 0x61f   :  { %v1441_v30 = vpack.c.bf16 %v1439_v3, %v1439_v3 }
 0x621   :  { %v1444_v51 = vunpack.c.l.bf16 %v1441_v30 }
 0x622   :  { %v2285_v4 = vpop.eup %2284 }
 0x623   :  { %v2287_v12 = vpop.eup %2286  ;;  %2288 = vtanh.f32 %v1444_v51 }
 0x624   :  { %v1448_v42 = vpack.c.bf16 %v2287_v12, %v2285_v4  ;;  %2290 = vtanh.f32 %v1472_v8 }
 0x626   :  { %v1450_v21 = vunpack.c.l.bf16 %v1448_v42  ;;  %v1451_v33 = vunpack.c.h.bf16 %v1448_v42 }
 0x628   :  { %v1453_v7 = vmul.f32 0.5, %v1450_v21  ;;  %v1454_v23 = vmul.f32 0.5, %v1451_v33 }
 0x629   :  { %v2289_v46 = vpop.eup %2288 }
 0x62a   :  { %v1449_v49 = vpack.c.bf16 %v2289_v46, %v2289_v46  ;;  %v1456_v22 = vpack.c.bf16 %v1454_v23, %v1453_v7  ;;  %v2291_v47 = vpop.eup %2290 }
 0x62b   :  { %v1474_v11 = vpack.c.bf16 %v2291_v47, %v2291_v47 }
 0x62c   :  { %v1458_v36 = vunpack.c.l.bf16 %v1456_v22  ;;  %v1459_v62 = vunpack.c.h.bf16 %v1456_v22  ;;  %v1452_v63 = vunpack.c.l.bf16 %v1449_v49 }
 0x62d   :  { %v1475_v38 = vunpack.c.l.bf16 %v1474_v11 }
 0x62e   :  { %v1461_v57 = vadd.f32 0.5, %v1458_v36  ;;  %v1462_v56 = vadd.f32 0.5, %v1459_v62  ;;  %v1455_v27 = vmul.f32 0.5, %v1452_v63 }
 0x630   :  { %v1464_v37 = vpack.c.bf16 %v1462_v56, %v1461_v57  ;;  %v1457_v31 = vpack.c.bf16 %v1455_v27, %v1455_v27 }
 0x632   :  { %v1466_v55 = vunpack.c.l.bf16 %v1464_v37  ;;  %v1467_v52 = vunpack.c.h.bf16 %v1464_v37  ;;  %v1460_v43 = vunpack.c.l.bf16 %v1457_v31 }
 0x634   :  { %v1476_v32 = vmul.f32 %v1467_v52, %v3029_v60  ;;  %v1477_v13 = vmul.f32 %v1475_v38, %v1466_v55  ;;  %v1463_v45 = vadd.f32 0.5, %v1460_v43  ;;  %v3223_v60 = vld [vmem:[#allocation36_spill] sm:$0xff]  ;;  %v2118_v43 = vld [vmem:[%s3166_s5 + $0x20] sm:$0xf] }
 0x635   :  { %v229_v9 = vadd.f32 %v3223_v60, %v2743_v25 }
 0x636   :  { %v3074_v35 = vadd.f32 %v1477_v13, %v1476_v32  ;;  %v1465_v53 = vpack.c.bf16 %v1463_v45, %v1463_v45  ;;  %v2181_v45 = vld [vmem:[%s3166_s5 + $0x24] sm:$0xf] }
 0x638   :  { %v1479_v39 = vpack.c.bf16 %v3074_v35, %v3074_v35  ;;  %v1468_v59 = vunpack.c.l.bf16 %v1465_v53 }
 0x63a   :  { %v1480_v44 = vunpack.c.l.bf16 %v1479_v39 }
 0x63c   :  { %2292 = vtanh.f32 %v1480_v44  ;;  %v2183_v44 = vld [vmem:[%s3166_s5 + $0x2c] sm:$0xf0] }
 0x642   :  { %v2293_v54 = vpop.eup %2292 }
 0x643   :  { %v1482_v58 = vpack.c.bf16 %v2293_v54, %v2293_v54  ;;  %v2119_v54 = vor.u32 %v2183_v44, %v2118_v43  ;;  %v3229_v43 = vld [vmem:[#allocation42_spill] sm:$0xff] }
 0x644   :  { %v299_v44 = vadd.f32 %v3229_v43, %v2753_v19 }
 0x645   :  { %v1483_v2 = vunpack.c.l.bf16 %v1482_v58  ;;  %v2120_v58 = vld [vmem:[%s3166_s5 + $0x30] sm:$0xf0] }
 0x647   :  { %v1484_v5 = vmul.f32 %v1483_v2, %v1468_v59  ;;  %v2102_v59 = vld [vmem:[%s3166_s5] sm:$0xf]  ;;  %v2179_v2 = vld [vmem:[%s3166_s5 + $0xc] sm:$0xf0] }
 0x649   :  { %v1490_v6 = vpack.c.bf16 %v1484_v5, %v1484_v5 }
 0x64b   :  { %1499 = vmatmul.bf16.vlgmr.msrb.gmra.mxu0 %v1490_v6  ;;  %1512 = vmatmul.bf16.vlgmr.msrb.gmra.mxu1 %v1490_v6 }
 0x64c   :  { %1525 = vmatmul.bf16.vlgmr.msrb.gmra.mxu2 %v1490_v6  ;;  %1538 = vmatmul.bf16.vlgmr.msrb.gmra.mxu3 %v1490_v6 }
 0x64d   :  { %1784 = vmatpush.bf16.msrb.mxu0 %v2119_v54 }
 0x6c8   :  { %v1500_v18 = vpop.f32.mrf.mxu0  ;;  %v1513_v20 = vpop.f32.mrf.mxu1 }
 0x6c9   :  { %v1543_v24 = vadd.f32 %v1500_v18, %v229_v9  ;;  %v1544_v28 = vadd.f32 %v1513_v20, %v263_v17  ;;  %v2123_v9 = vor.u32 %v2181_v45, %v2120_v58  ;;  %v2103_v17 = vor.u32 %v2179_v2, %v2102_v59  ;;  %v2104_v18 = vld [vmem:[%s3166_s5 + $0x10] sm:$0xf0]  ;;  %v2126_v20 = vld [vmem:[%s3166_s5 + $0x28] sm:$0xf]  ;;  %v3230_v45 = vld [vmem:[#allocation43_spill] sm:$0xff] }
 0x6cb   :  { %v1547_v29 = vpack.c.bf16 %v1544_v28, %v1543_v24  ;;  %v2184_v24 = vld [vmem:[%s3166_s5 + $0x34] sm:$0xf0]  ;;  %1797 = vmatpush.bf16.msrb.mxu1 %v2123_v9  ;;  %1785 = vmatpush.bf16.msrb.mxu0 %v2103_v17 }
 0x6cd   :  { %v1549_v34 = vunpack.c.l.bf16 %v1547_v29  ;;  %v1550_v40 = vunpack.c.h.bf16 %v1547_v29  ;;  %v2107_v29 = vor.u32 %v2177_v16, %v2104_v18  ;;  %v1725_v16 = vld [vmem:[%s3167_s6] sm:$0xf] }
 0x6cf   :  { %v1552_v1 = vmul.f32 0.5, %v1549_v34  ;;  %v1553_v3 = vmul.f32 0.5, %v1550_v40  ;;  %v1526_v10 = vpop.f32.mrf.mxu2  ;;  %v1539_v14 = vpop.f32.mrf.mxu3  ;;  %v2127_v34 = vor.u32 %v2184_v24, %v2126_v20  ;;  %v2182_v40 = vld [vmem:[%s3166_s5 + $0x2c] sm:$0xf]  ;;  %1798 = vmatpush.bf16.msrb.mxu1 %v2107_v29  ;;  %v1727_v20 = vperm.slane %v1725_v16, 0 }
 0x6d0   :  { %v1545_v15 = vadd.f32 %v1526_v10, %v297_v48  ;;  %v1546_v30 = vadd.f32 %v1539_v14, %v331_v61  ;;  %v1502_v51 = vpop.f32.mrf.mxu0  ;;  %v1515_v8 = vpop.f32.mrf.mxu1  ;;  %v2110_v48 = vld [vmem:[%s3166_s5 + $0x8] sm:$0xf]  ;;  %v2131_v50 = vor.u32 %v2182_v40, %v2128_v41  ;;  %v2180_v61 = vld [vmem:[%s3166_s5 + $0x14] sm:$0xf0] }
 0x6d1   :  { %v1555_v4 = vpack.c.bf16 %v1553_v3, %v1552_v1  ;;  %v2178_v1 = vld [vmem:[%s3166_s5 + $0xc] sm:$0xf]  ;;  %v2112_v3 = vld [vmem:[%s3166_s5 + $0x18] sm:$0xf0]  ;;  %1810 = vmatpush.bf16.msrb.mxu2 %v2127_v34 }
 0x6d2   :  { %v1548_v12 = vpack.c.bf16 %v1546_v30, %v1545_v15  ;;  %v2111_v30 = vor.u32 %v2180_v61, %v2110_v48  ;;  %1823 = vmatpush.bf16.msrb.mxu3 %v2131_v50  ;;  %v2115_v51 = vor.u32 %v2178_v1, %v2112_v3 }
 0x6d3   :  { %v1557_v42 = vunpack.c.l.bf16 %v1555_v4  ;;  %v1558_v21 = vunpack.c.h.bf16 %v1555_v4 }
 0x6d4   :  { %v1551_v33 = vunpack.c.l.bf16 %v1548_v12  ;;  %v1585_v7 = vrot.slane %v1548_v12, 4 }
 0x6d5   :  { %2294 = vtanh.f32 %v1557_v42  ;;  %1811 = vmatpush.bf16.msrb.mxu2 %v2111_v30  ;;  %v1729_v30 = vperm.slane %v1725_v16, 2 }
 0x6d6   :  { %2296 = vtanh.f32 %v1558_v21  ;;  %v1554_v23 = vmul.f32 0.5, %v1551_v33  ;;  %v1587_v47 = vunpack.c.l.bf16 %v1585_v7  ;;  %1824 = vmatpush.bf16.msrb.mxu3 %v2115_v51  ;;  %v1730_v51 = vperm.slane %v1725_v16, 3 }
 0x6d7   :  { %v1528_v46 = vpop.f32.mrf.mxu2  ;;  %v1541_v49 = vpop.f32.mrf.mxu3 }
 0x6d8   :  { %v1556_v22 = vpack.c.bf16 %v1554_v23, %v1554_v23 }
 0x6da   :  { %v1559_v36 = vunpack.c.l.bf16 %v1556_v22 }
 0x6db   :  { %v2295_v62 = vpop.eup %2294 }
 0x6dc   :  { %v2297_v63 = vpop.eup %2296  ;;  %2298 = vtanh.f32 %v1559_v36 }
 0x6dd   :  { %v1563_v57 = vpack.c.bf16 %v2297_v63, %v2295_v62  ;;  %2300 = vtanh.f32 %v1587_v47  ;;  %v1715_v63 = vld [vmem:[#allocation2 + $0x48] sm:$0xff] }
 0x6df   :  { %v1565_v56 = vunpack.c.l.bf16 %v1563_v57  ;;  %v1566_v11 = vunpack.c.h.bf16 %v1563_v57  ;;  %v1716_v57 = vpack.c.bf16 %v1715_v63, %v1715_v63 }
 0x6e1   :  { %v1568_v37 = vmul.f32 0.5, %v1565_v56  ;;  %v1569_v27 = vmul.f32 0.5, %v1566_v11  ;;  %v3227_v56 = vld [vmem:[#allocation40_spill] sm:$0xff] }
 0x6e2   :  { %v2299_v55 = vpop.eup %2298  ;;  %v231_v11 = vadd.f32 %v3227_v56, %v2743_v25 }
 0x6e3   :  { %v2301_v52 = vpop.eup %2300  ;;  %v1564_v38 = vpack.c.bf16 %v2299_v55, %v2299_v55  ;;  %v1571_v32 = vpack.c.bf16 %v1569_v27, %v1568_v37  ;;  %v3228_v37 = vld [vmem:[#allocation41_spill] sm:$0xff] }
 0x6e4   :  { %v1589_v53 = vpack.c.bf16 %v2301_v52, %v2301_v52  ;;  %v265_v27 = vadd.f32 %v3228_v37, %v2745_v26 }
 0x6e5   :  { %v1567_v13 = vunpack.c.l.bf16 %v1564_v38  ;;  %v1573_v31 = vunpack.c.l.bf16 %v1571_v32  ;;  %v1574_v39 = vunpack.c.h.bf16 %v1571_v32 }
 0x6e6   :  { %v1590_v15 = vunpack.c.l.bf16 %v1589_v53  ;;  %v333_v53 = vadd.f32 %v3230_v45, %v2755_v0  ;;  %v1728_v0 = vperm.slane %v1725_v16, 1 }
 0x6e7   :  { %v1570_v5 = vmul.f32 0.5, %v1567_v13  ;;  %v1576_v6 = vadd.f32 0.5, %v1573_v31  ;;  %v1577_v60 = vadd.f32 0.5, %v1574_v39 }
 0x6e9   :  { %v1579_v28 = vpack.c.bf16 %v1577_v60, %v1576_v6  ;;  %v1572_v12 = vpack.c.bf16 %v1570_v5, %v1570_v5 }
 0x6eb   :  { %v1581_v10 = vunpack.c.l.bf16 %v1579_v28  ;;  %v1582_v14 = vunpack.c.h.bf16 %v1579_v28  ;;  %v1575_v33 = vunpack.c.l.bf16 %v1572_v12 }
 0x6ed   :  { %v1591_v8 = vmul.f32 %v1582_v14, %v3074_v35  ;;  %v1592_v4 = vmul.f32 %v1590_v15, %v1581_v10  ;;  %v1578_v23 = vadd.f32 0.5, %v1575_v33 }
 0x6ef   :  { %v3135_v42 = vadd.f32 %v1592_v4, %v1591_v8  ;;  %v1580_v46 = vpack.c.bf16 %v1578_v23, %v1578_v23 }
 0x6f1   :  { %v1594_v21 = vpack.c.bf16 %v3135_v42, %v3135_v42  ;;  %v1583_v47 = vunpack.c.l.bf16 %v1580_v46 }
 0x6f3   :  { %v1595_v7 = vunpack.c.l.bf16 %v1594_v21 }
 0x6f5   :  { %2302 = vtanh.f32 %v1595_v7 }
 0x6fb   :  { %v2303_v49 = vpop.eup %2302 }
 0x6fc   :  { %v1597_v22 = vpack.c.bf16 %v2303_v49, %v2303_v49 }
 0x6fe   :  { %v1598_v36 = vunpack.c.l.bf16 %v1597_v22 }
 0x700   :  { %v1599_v35 = vmul.f32 %v1598_v36, %v1583_v47 }
 0x702   :  { %v1605_v62 = vpack.c.bf16 %v1599_v35, %v1599_v35 }
 0x704   :  { %1614 = vmatmul.bf16.vlgmr.msra.gmra.mxu0 %v1605_v62  ;;  %1627 = vmatmul.bf16.vlgmr.msra.gmra.mxu1 %v1605_v62 }
 0x705   :  { %1640 = vmatmul.bf16.vlgmr.msra.gmra.mxu2 %v1605_v62  ;;  %1653 = vmatmul.bf16.vlgmr.msra.gmra.mxu3 %v1605_v62 }
 0x714   :  { %2132 = vmatmul.msk.bf16.vlgmr.msrb.gmra.mxu0 %vm183_vm0, %v1716_v57  ;;  %2133 = vmatmul.msk.bf16.vlgmr.msrb.gmra.mxu1 %vm183_vm0, %v1716_v57 }
 0x715   :  { %2134 = vmatmul.msk.bf16.vlgmr.msrb.gmra.mxu2 %vm183_vm0, %v1716_v57  ;;  %2135 = vmatmul.msk.bf16.vlgmr.msrb.gmra.mxu3 %vm183_vm0, %v1716_v57 }
 0x781   :  { %v1615_v55 = vpop.f32.mrf.mxu0  ;;  %v1628_v52 = vpop.f32.mrf.mxu1 }
 0x782   :  { %v1658_v38 = vadd.f32 %v1615_v55, %v231_v11  ;;  %v1659_v32 = vadd.f32 %v1628_v52, %v265_v27 }
 0x784   :  { %v1662_v13 = vpack.c.bf16 %v1659_v32, %v1658_v38 }
 0x786   :  { %v1664_v31 = vunpack.c.l.bf16 %v1662_v13  ;;  %v1665_v39 = vunpack.c.h.bf16 %v1662_v13 }
 0x788   :  { %v1667_v54 = vmul.f32 0.5, %v1664_v31  ;;  %v1668_v58 = vmul.f32 0.5, %v1665_v39  ;;  %v1641_v59 = vpop.f32.mrf.mxu2  ;;  %v1654_v25 = vpop.f32.mrf.mxu3 }
 0x789   :  { %v1660_v2 = vadd.f32 %v1641_v59, %v299_v44  ;;  %v1661_v5 = vadd.f32 %v1654_v25, %v333_v53  ;;  %v1617_v26 = vpop.f32.mrf.mxu0  ;;  %v1630_v6 = vpop.f32.mrf.mxu1 }
 0x78a   :  { %v1670_v60 = vpack.c.bf16 %v1668_v58, %v1667_v54 }
 0x78b   :  { %v1663_v9 = vpack.c.bf16 %v1661_v5, %v1660_v2 }
 0x78c   :  { %v1672_v17 = vunpack.c.l.bf16 %v1670_v60  ;;  %v1673_v18 = vunpack.c.h.bf16 %v1670_v60 }
 0x78d   :  { %v1666_v19 = vunpack.c.l.bf16 %v1663_v9  ;;  %v1700_v28 = vrot.slane %v1663_v9, 4 }
 0x78e   :  { %2304 = vtanh.f32 %v1672_v17 }
 0x78f   :  { %2306 = vtanh.f32 %v1673_v18  ;;  %v1669_v24 = vmul.f32 0.5, %v1666_v19  ;;  %v1702_v3 = vunpack.c.l.bf16 %v1700_v28 }
 0x790   :  { %v1643_v29 = vpop.f32.mrf.mxu2  ;;  %v1656_v34 = vpop.f32.mrf.mxu3 }
 0x791   :  { %v1671_v40 = vpack.c.bf16 %v1669_v24, %v1669_v24  ;;  %v1787_v41 = vpop.f32.mrf.mxu0  ;;  %v1800_v48 = vpop.f32.mrf.mxu1 }
 0x792   :  { %v1788_v50 = vadd.f32 %v1787_v41, %v1727_v20  ;;  %v1801_v61 = vadd.f32 %v1800_v48, %v1728_v0 }
 0x793   :  { %v1674_v1 = vunpack.c.l.bf16 %v1671_v40 }
 0x794   :  { %v2305_v10 = vpop.eup %2304  ;;  %v1830_v14 = vpack.c.bf16 %v1801_v61, %v1788_v50 }
 0x795   :  { %v2307_v15 = vpop.eup %2306  ;;  %2308 = vtanh.f32 %v1674_v1 }
 0x796   :  { %v1678_v8 = vpack.c.bf16 %v2307_v15, %v2305_v10  ;;  %v1832_v4 = vunpack.c.l.bf16 %v1830_v14  ;;  %v1833_v12 = vunpack.c.h.bf16 %v1830_v14  ;;  %2310 = vtanh.f32 %v1702_v3 }
 0x798   :  { %v1680_v21 = vunpack.c.l.bf16 %v1678_v8  ;;  %v1681_v33 = vunpack.c.h.bf16 %v1678_v8  ;;  %v1835_v7 = vmul.f32 0.5, %v1832_v4  ;;  %v1813_v23 = vpop.f32.mrf.mxu2  ;;  %v1826_v46 = vpop.f32.mrf.mxu3  ;;  %v1836_v49 = vmul.f32 0.5, %v1833_v12 }
 0x799   :  { %v1789_v22 = vpop.f32.mrf.mxu0  ;;  %v1802_v47 = vpop.f32.mrf.mxu1  ;;  %v1814_v36 = vadd.f32 %v1813_v23, %v1729_v30  ;;  %v1827_v35 = vadd.f32 %v1826_v46, %v1730_v51 }
 0x79a   :  { %v1683_v62 = vmul.f32 0.5, %v1680_v21  ;;  %v1684_v63 = vmul.f32 0.5, %v1681_v33  ;;  %v1838_v56 = vpack.c.bf16 %v1836_v49, %v1835_v7 }
 0x79b   :  { %v2309_v57 = vpop.eup %2308  ;;  %v1831_v11 = vpack.c.bf16 %v1827_v35, %v1814_v36 }
 0x79c   :  { %v1679_v37 = vpack.c.bf16 %v2309_v57, %v2309_v57  ;;  %v1686_v27 = vpack.c.bf16 %v1684_v63, %v1683_v62  ;;  %v2311_v55 = vpop.eup %2310  ;;  %v1840_v52 = vunpack.c.l.bf16 %v1838_v56  ;;  %v1841_v38 = vunpack.c.h.bf16 %v1838_v56 }
 0x79d   :  { %v1834_v32 = vunpack.c.l.bf16 %v1831_v11  ;;  %v1868_v39 = vrot.slane %v1831_v11, 4  ;;  %v1704_v54 = vpack.c.bf16 %v2311_v55, %v2311_v55 }
 0x79e   :  { %v1688_v13 = vunpack.c.l.bf16 %v1686_v27  ;;  %v1689_v31 = vunpack.c.h.bf16 %v1686_v27  ;;  %v1682_v43 = vunpack.c.l.bf16 %v1679_v37  ;;  %2312 = vtanh.f32 %v1840_v52 }
 0x79f   :  { %v1837_v44 = vmul.f32 0.5, %v1834_v32  ;;  %2314 = vtanh.f32 %v1841_v38  ;;  %v1870_v5 = vunpack.c.l.bf16 %v1868_v39  ;;  %v1705_v16 = vunpack.c.l.bf16 %v1704_v54 }
 0x7a0   :  { %v1691_v45 = vadd.f32 0.5, %v1688_v13  ;;  %v1692_v53 = vadd.f32 0.5, %v1689_v31  ;;  %v1815_v58 = vpop.f32.mrf.mxu2  ;;  %v1828_v59 = vpop.f32.mrf.mxu3  ;;  %v1685_v26 = vmul.f32 0.5, %v1682_v43 }
 0x7a1   :  { %v1839_v25 = vpack.c.bf16 %v1837_v44, %v1837_v44 }
 0x7a2   :  { %v1694_v2 = vpack.c.bf16 %v1692_v53, %v1691_v45  ;;  %v1687_v0 = vpack.c.bf16 %v1685_v26, %v1685_v26 }
 0x7a3   :  { %v1842_v6 = vunpack.c.l.bf16 %v1839_v25 }
 0x7a4   :  { %v1696_v60 = vunpack.c.l.bf16 %v1694_v2  ;;  %v1697_v9 = vunpack.c.h.bf16 %v1694_v2  ;;  %v2313_v17 = vpop.eup %2312  ;;  %v1690_v48 = vunpack.c.l.bf16 %v1687_v0 }
 0x7a5   :  { %2316 = vtanh.f32 %v1842_v6  ;;  %v2315_v18 = vpop.eup %2314 }
 0x7a6   :  { %v1706_v19 = vmul.f32 %v1697_v9, %v3135_v42  ;;  %v1707_v20 = vmul.f32 %v1705_v16, %v1696_v60  ;;  %2318 = vtanh.f32 %v1870_v5  ;;  %v1846_v24 = vpack.c.bf16 %v2315_v18, %v2313_v17 }
 0x7a7   :  { %v1693_v15 = vadd.f32 0.5, %v1690_v48 }
 0x7a8   :  { %v1708_v28 = vadd.f32 %v1707_v20, %v1706_v19  ;;  %v1848_v29 = vunpack.c.l.bf16 %v1846_v24  ;;  %v1849_v34 = vunpack.c.h.bf16 %v1846_v24 }
 0x7a9   :  { %v1695_v21 = vpack.c.bf16 %v1693_v15, %v1693_v15 }
 0x7aa   :  { %v1709_v40 = vpack.c.bf16 %v1708_v28, %v1708_v28  ;;  %v1851_v50 = vmul.f32 0.5, %v1848_v29  ;;  %v1852_v61 = vmul.f32 0.5, %v1849_v34 }
 0x7ab   :  { %v2317_v41 = vpop.eup %2316  ;;  %v1698_v36 = vunpack.c.l.bf16 %v1695_v21 }
 0x7ac   :  { %v2319_v1 = vpop.eup %2318  ;;  %v1710_v3 = vunpack.c.l.bf16 %v1709_v40  ;;  %v1847_v10 = vpack.c.bf16 %v2317_v41, %v2317_v41  ;;  %v1854_v14 = vpack.c.bf16 %v1852_v61, %v1851_v50 }
 0x7ad   :  { %v1872_v51 = vpack.c.bf16 %v2319_v1, %v2319_v1 }
 0x7ae   :  { %2320 = vtanh.f32 %v1710_v3  ;;  %v1856_v30 = vunpack.c.l.bf16 %v1854_v14  ;;  %v1857_v42 = vunpack.c.h.bf16 %v1854_v14  ;;  %v1850_v8 = vunpack.c.l.bf16 %v1847_v10 }
 0x7af   :  { %v1873_v7 = vunpack.c.l.bf16 %v1872_v51 }
 0x7b0   :  { %v1859_v4 = vadd.f32 0.5, %v1856_v30  ;;  %v1860_v12 = vadd.f32 0.5, %v1857_v42  ;;  %v1853_v46 = vmul.f32 0.5, %v1850_v8 }
 0x7b2   :  { %v1862_v33 = vpack.c.bf16 %v1860_v12, %v1859_v4  ;;  %v1855_v57 = vpack.c.bf16 %v1853_v46, %v1853_v46 }
 0x7b4   :  { %v2321_v23 = vpop.eup %2320  ;;  %v1864_v22 = vunpack.c.l.bf16 %v1862_v33  ;;  %v1865_v47 = vunpack.c.h.bf16 %v1862_v33  ;;  %v1858_v27 = vunpack.c.l.bf16 %v1855_v57 }
 0x7b5   :  { %v1712_v49 = vpack.c.bf16 %v2321_v23, %v2321_v23 }
 0x7b6   :  { %v1874_v62 = vmul.f32 0.0, %v1865_v47  ;;  %v1875_v63 = vmul.f32 %v1873_v7, %v1864_v22  ;;  %v1861_v52 = vadd.f32 0.5, %v1858_v27 }
 0x7b7   :  { %v1713_v35 = vunpack.c.l.bf16 %v1712_v49 }
 0x7b8   :  { %v1876_v11 = vadd.f32 %v1875_v63, %v1874_v62  ;;  %v1863_v38 = vpack.c.bf16 %v1861_v52, %v1861_v52 }
 0x7b9   :  { %v1714_v56 = vmul.f32 %v1713_v35, %v1698_v36 }
 0x7ba   :  { %v1877_v37 = vpack.c.bf16 %v1876_v11, %v1876_v11  ;;  %v1866_v31 = vunpack.c.l.bf16 %v1863_v38 }
 0x7bb   :  { %1883 = vst [vmem:[%s3168_s7] sm:$0xff] %v1714_v56 }
 0x7bc   :  { %v1878_v55 = vunpack.c.l.bf16 %v1877_v37 }
 0x7be   :  { %2322 = vtanh.f32 %v1878_v55 }
 0x7c4   :  { %v2323_v32 = vpop.eup %2322 }
 0x7c5   :  { %v1880_v13 = vpack.c.bf16 %v2323_v32, %v2323_v32 }
 0x7c7   :  { %v1881_v39 = vunpack.c.l.bf16 %v1880_v13 }
 0x7c9   :  { %v1882_v43 = vmul.f32 %v1881_v39, %v1866_v31 }
 0x7cb   :  { %1884 = vst [vmem:[%s3168_s7 + $0x8] sm:$0xff] %v1882_v43 }
 0x7cc   :  { %1889 = vsyncpa [#allocation8], 1 }
 0x7cd   :  { %1890 = vsyncmov [#allocation4] }
 0x7d0   :  { %s1891_s10 = vpop.sfrf %1890 }
 0x7d1   :  { %p2136_p3 = scmp.ne.s32.totalorder %s1891_s10, 0 }
 0x7d3   :  { %1895 = shalt.err (%p2136_p3)  }

</bundles_post_ra>
